<compile_context>
chip_gen: v7x
topology: tpu7x:2x2x1
jax: 0.10.0
libtpu: 0.0.40
codegen_flags: <defaults>
</compile_context>

<pallas_src>
import functools

import numpy as np
import jax
import jax.numpy as jnp
from jax import lax
from jax.experimental import pallas as pl
from jax.experimental.pallas import tpu as pltpu

# ----------------------------------------------------------------------------
# "cfg" constants (deterministic, synthetic — no checkpoint / pickle loading)
# ----------------------------------------------------------------------------
IMG_SIZE = 128
W_VERTEX_EYES_REG = 2.0
W_VERTEX_FACE_REG = 1.0
W_EDGE_LENGTH_EYES = 0.5
W_EDGE_LENGTH_FACE = 0.5
W_GAZE_ACOS = 1.0

N_EYE = 481      # vertices per eye template (matches eyes3d)
N_IRIS = 32      # iris landmark indices (matches iris_idxs481)
N_TRI = 256      # synthetic triangle list size


def _round_up(x, m):
    return ((x + m - 1) // m) * m


# ----------------------------------------------------------------------------
# Pallas kernel (vertex mode, fully fused)
# ----------------------------------------------------------------------------
def _vertex_fused_kernel(v_ref, w_ref, out_ref, *, coord_rows, scale):
    """Fused vertex-mode reductions.

    v_ref   : (4*3*CP, N_PAD)   rows = set*(3*CP) + coord*CP + b
                                 sets = [pred_l, pred_r, trg_l, trg_r], zero-padded
                                 batch rows (b >= B) and lanes (n >= N).
    w_ref   : (N_PAD, 128+EC)   static matrix: col 0 = (1/N - mask/n_iris)
                                 (gaze "back - front" weights); cols 1..127 = 0;
                                 cols 128.. = per-edge +1/-1 difference columns.
    out_ref : (4*3*CP + 8, 128) rows 0..4*3*CP-1, lane 0 = raw gaze vectors;
                                 row 4*3*CP, lanes 0..3 =
                                 [l1_sum_l, l1_sum_r, edge_sum_l, edge_sum_r]*scale.
    """
    CP = coord_rows
    SET = 3 * CP
    ROWS = 4 * SET

    V = v_ref[...]                                            # (ROWS, N_PAD)
    # One MXU matmul does: gaze vectors (col 0) + all triangle edge differences.
    big = jnp.dot(V, w_ref[...], preferred_element_type=jnp.float32)

    # ---- L1 reconstruction sums (per side); padded rows/lanes contribute 0 ---
    ad = jnp.abs(V[: 2 * SET, :] - V[2 * SET:, :])            # (2*SET, N_PAD)
    l1_l = jnp.sum(ad[:SET, :], keepdims=True)                # (1, 1)
    l1_r = jnp.sum(ad[SET:, :], keepdims=True)                # (1, 1)

    # ---- edge lengths from the edge-difference columns ------------------------
    ed = big[:, 128:]                                         # (ROWS, EC)
    sq = ed * ed

    def set_len(s):
        base = s * SET
        lensq = (sq[base:base + CP, :]
                 + sq[base + CP:base + 2 * CP, :]
                 + sq[base + 2 * CP:base + 3 * CP, :])        # (CP, EC)
        return jnp.sqrt(lensq)

    len_pl = set_len(0)
    len_pr = set_len(1)
    len_tl = set_len(2)
    len_tr = set_len(3)
    e_l = jnp.sum(jnp.abs(len_pl - len_tl), keepdims=True)    # (1, 1)
    e_r = jnp.sum(jnp.abs(len_pr - len_tr), keepdims=True)    # (1, 1)

    # ---- single lane-dense output --------------------------------------------
    # Gaze vectors (lane 0 of the first 128 matmul columns); scale dropped —
    # it cancels in the downstream normalization.
    out_ref[0:ROWS, :] = big[:, 0:128]

    # Packed scalar sums, scaled here (L1/edge sums are linear in scale).
    row = lax.broadcasted_iota(jnp.int32, (8, 128), 0)
    lane = lax.broadcasted_iota(jnp.int32, (8, 128), 1)

    def put(k, val):
        return val * ((row == 0) & (lane == k)).astype(jnp.float32)

    out_ref[ROWS:ROWS + 8, :] = (put(0, l1_l * scale) + put(1, l1_r * scale)
                                 + put(2, e_l * scale) + put(3, e_r * scale))


# ----------------------------------------------------------------------------
# Fused pallas_call wrapper (vertex mode)
# ----------------------------------------------------------------------------
def _fused_vertex_reductions(vp_l, vp_r, vt_l, vt_r, w_matrix, *, scale):
    B, N, _ = vp_l.shape
    CP = _round_up(B, 8)          # batch rows per coordinate group (8-aligned)
    SET = 3 * CP                  # rows per set
    ROWS = 4 * SET
    N_PAD = w_matrix.shape[0]
    COLS = w_matrix.shape[1]

    # Coord-major, 8-aligned, lane-dense vertex block:
    #   row = set*(3*CP) + coord*CP + b ; lanes = vertex index (padded to N_PAD).
    all_v = jnp.stack([vp_l, vp_r, vt_l, vt_r], axis=0).astype(jnp.float32)  # (4,B,N,3)
    v = jnp.transpose(all_v, (0, 3, 1, 2))                                   # (4,3,B,N)
    v = jnp.pad(v, ((0, 0), (0, 0), (0, CP - B), (0, N_PAD - N)))
    V = v.reshape(ROWS, N_PAD)

    flops = 2 * ROWS * N_PAD * COLS
    bytes_accessed = 4 * (ROWS * N_PAD + N_PAD * COLS + (ROWS + 8) * 128)

    out = pl.pallas_call(
        functools.partial(_vertex_fused_kernel, coord_rows=CP, scale=float(scale)),
        grid=(1,),
        in_specs=[pl.BlockSpec((ROWS, N_PAD), lambda i: (0, 0)),
                  pl.BlockSpec((N_PAD, COLS), lambda i: (0, 0))],
        out_specs=pl.BlockSpec((ROWS + 8, 128), lambda i: (0, 0)),
        out_shape=jax.ShapeDtypeStruct((ROWS + 8, 128), jnp.float32),
        compiler_params=pltpu.CompilerParams(dimension_semantics=("arbitrary",)),
        cost_estimate=pl.CostEstimate(flops=flops,
                                      transcendentals=4 * CP * (COLS - 128),
                                      bytes_accessed=bytes_accessed),
    )(V, w_matrix)

    # sums lanes: [l1_sum_l, l1_sum_r, edge_sum_l, edge_sum_r] (already scaled)
    sums = out[ROWS, 0:4]
    # raw (un-normalized) gaze vectors, order [pred_l, pred_r, trg_l, trg_r]
    vec = out[0:ROWS, 0].reshape(4, 3, CP)[:, :, :B]
    gaze_vecs = jnp.transpose(vec, (0, 2, 1))                 # (4, B, 3)
    return gaze_vecs, sums


# ----------------------------------------------------------------------------
# Tiny JAX helpers (epilogue on (B,3) data — below custom-kernel payoff)
# ----------------------------------------------------------------------------
def _unit(v):
    # TODO(synk): torch reference has no epsilon; the tiny floor only guards the
    # degenerate zero-vector case (which would be NaN in torch anyway).
    return v / jnp.maximum(jnp.linalg.norm(v, axis=-1, keepdims=True), 1e-12)


def _acos_mean(w, a, b):
    dot = jnp.sum(a * b, axis=-1)
    na = jnp.linalg.norm(a, axis=-1)
    nb = jnp.linalg.norm(b, axis=-1)
    cos = dot / jnp.maximum(na * nb, 1e-8)
    cos = jnp.clip(cos, -1.0 + 1e-7, 1.0 - 1e-7)
    return w * jnp.mean(jnp.arccos(cos))


def pitchyaw_to_vector(py):
    pitch, yaw = py[:, 0], py[:, 1]
    x = -jnp.cos(pitch) * jnp.sin(yaw)
    y = -jnp.sin(pitch)
    z = -jnp.cos(pitch) * jnp.cos(yaw)
    return jnp.stack([x, y, z], axis=1)


# ----------------------------------------------------------------------------
# BaseLoss module
# ----------------------------------------------------------------------------
class BaseLoss:
    def __init__(self, mode='vertex'):
        self.mode = mode
        self.img_size = IMG_SIZE
        self.w_vertex_eyes_reg = W_VERTEX_EYES_REG
        self.w_vertex_face_reg = W_VERTEX_FACE_REG
        self.w_edge_length_eyes = W_EDGE_LENGTH_EYES
        self.w_edge_length_face = W_EDGE_LENGTH_FACE
        self.w_gaze_acos = W_GAZE_ACOS

        if self.mode == 'vertex':
            self.loss_names = ['L_l1', 'L_edge_length', 'L_gaze', 'L_gaze_vector',
                               'L_gaze_face', 'L_gaze_comb']
            self.loss_names_opt = ['L_l1', 'L_edge_length', 'L_gaze', 'L_gaze_vector']
            self.loss_name_performance = 'L_gaze_comb'
        else:
            self.loss_names = ['L_gaze_vector', 'L_gaze_pitchyaws']
            self.loss_names_opt = ['L_gaze_vector']
            self.loss_name_performance = 'L_gaze_vector'

        # Synthetic, deterministic eyes3d template (in place of data/eyes3d.pkl).
        iris_idxs = np.arange(N_EYE - N_IRIS, N_EYE, dtype=np.int32)
        tri_i = np.arange(N_TRI)
        trilist = np.stack([tri_i % N_EYE,
                            (tri_i * 7 + 1) % N_EYE,
                            (tri_i * 13 + 5) % N_EYE], axis=1).astype(np.int32)
        mean_template = (np.sin(np.arange(N_EYE * 3, dtype=np.float32))
                         .reshape(N_EYE, 3) * 0.1)

        self.trilist_eye = jnp.asarray(trilist, dtype=jnp.int32)
        self.iris_lms_idx = jnp.asarray(iris_idxs, dtype=jnp.int32)
        self.mean_l = jnp.asarray(mean_template, dtype=jnp.float32)              # unused in fwd
        self.mean_r = jnp.asarray(mean_template[:, ::-1].copy(), jnp.float32)    # unused in fwd

        # Static MXU matrix: gaze-vector weights (col 0) + edge-difference columns.
        n_pad = _round_up(N_EYE, 128)
        ec_pad = _round_up(3 * N_TRI, 128)
        W = np.zeros((n_pad, 128 + ec_pad), dtype=np.float32)
        W[:N_EYE, 0] = 1.0 / N_EYE                       # "back" (mean over all)
        W[iris_idxs, 0] -= 1.0 / N_IRIS                  # minus "front" (iris mean)
        for e, (a, b) in enumerate(((0, 1), (0, 2), (1, 2))):
            cols = 128 + e * N_TRI + np.arange(N_TRI)
            W[trilist[:, a], cols] += 1.0
            W[trilist[:, b], cols] -= 1.0
        # TODO(synk): could be stored bf16/int8 to save VMEM on v5e/v6e at larger
        # templates; kept f32 here for exact parity (footprint ~1.8 MB).
        self.w_matrix = jnp.asarray(W)

        # jit whole forward paths so the tiny prologue + (B,3) epilogue fuse
        # around the single Pallas custom call.
        self._vertex_fn = jax.jit(self._vertex_losses_impl)
        self._gaze_fn = jax.jit(self._gaze_losses_impl)

    # --- vertex mode ----------------------------------------------------------
    def _vertex_losses_impl(self, vp_l, vp_r, vt_l, vt_r, gaze_vector):
        # TODO(synk): original unbox_output_eyes crop/scale bookkeeping is
        # approximated; the img_size/2 pixel scaling is folded into the kernel's
        # final scalar sums (linear) and dropped from the (normalized) gaze vectors.
        B, N, _ = vp_l.shape
        T = self.trilist_eye.shape[0]

        gaze_vecs, sums = _fused_vertex_reductions(
            vp_l, vp_r, vt_l, vt_r, self.w_matrix, scale=self.img_size / 2.0)

        gv_pred_l = _unit(gaze_vecs[0])
        gv_pred_r = _unit(gaze_vecs[1])
        gv_trg_l = _unit(gaze_vecs[2])
        gv_trg_r = _unit(gaze_vecs[3])
        gv_pred_f = _unit(gv_pred_r + gv_pred_l)
        gv_trg_f = _unit(gv_trg_r + gv_trg_l)
        g = _unit(gaze_vector.astype(jnp.float32))
        gv_comb = _unit(gv_pred_f + g)

        # sums lanes: [l1_sum_l, l1_sum_r, edge_sum_l, edge_sum_r]
        l1_loss = self.w_vertex_eyes_reg * (sums[0] + sums[1]) / (B * N)
        edge_loss = self.w_edge_length_eyes * (sums[2] + sums[3]) / (3.0 * B * T)
        gaze_loss = (_acos_mean(self.w_gaze_acos, gv_pred_l, gv_trg_l)
                     + _acos_mean(self.w_gaze_acos, gv_pred_r, gv_trg_r))
        gaze_loss_vec = _acos_mean(self.w_gaze_acos, g, gv_trg_f)
        gaze_loss_face = _acos_mean(self.w_gaze_acos, gv_pred_f, gv_trg_f)
        gaze_loss_comb = _acos_mean(self.w_gaze_acos, gv_comb, gv_trg_f)

        return l1_loss, edge_loss, gaze_loss, gaze_loss_vec, gaze_loss_face, gaze_loss_comb

    def forward_vertex(self, output, meta):
        losses = self._vertex_fn(output['verts_l'], output['verts_r'],
                                 meta['verts_l'], meta['verts_r'],
                                 output['gaze_vector'])
        return {name: loss for name, loss in zip(self.loss_names, losses)}

    # --- gaze mode ------------------------------------------------------------
    def _gaze_losses_impl(self, pred_vec, pred_py, trg_vec, trg_py):
        # Pure-JAX: the (B,3) cosine/arccos work is far below Pallas payoff, and
        # keeping it in XLA lets pitchyaw_to_vector + cosine + arccos fuse.
        gaze_vector_loss = _acos_mean(self.w_gaze_acos,
                                      pred_vec.astype(jnp.float32),
                                      trg_vec.astype(jnp.float32))
        gaze_pitchyaws_loss = _acos_mean(self.w_gaze_acos,
                                         pitchyaw_to_vector(pred_py.astype(jnp.float32)),
                                         pitchyaw_to_vector(trg_py.astype(jnp.float32)))
        return gaze_vector_loss, gaze_pitchyaws_loss

    def forward_gaze(self, output, meta):
        losses = self._gaze_fn(output['gaze_vector'], output['gaze_pitchyaws'],
                               meta['gaze_vector'], meta['gaze_pitchyaws'])
        return {name: loss for name, loss in zip(self.loss_names, losses)}

    def __call__(self, output, meta):
        return getattr(self, f'forward_{self.mode}')(output, meta)


# ----------------------------------------------------------------------------
# Demo
# ----------------------------------------------------------------------------
if __name__ == "__main__":
    B = 2
    key = jax.random.PRNGKey(0)
    k1, k2, k3, k4, k5, k6, k7, k8, k9 = jax.random.split(key, 9)

    # --- vertex mode ---
    output_v = {
        'verts_l': jax.random.normal(k1, (B, N_EYE, 3), jnp.float32) * 0.1,
        'verts_r': jax.random.normal(k2, (B, N_EYE, 3), jnp.float32) * 0.1,
        'gaze_vector': jax.random.normal(k3, (B, 3), jnp.float32),
    }
    meta_v = {
        'verts_l': jax.random.normal(k4, (B, N_EYE, 3), jnp.float32) * 0.1,
        'verts_r': jax.random.normal(k5, (B, N_EYE, 3), jnp.float32) * 0.1,
    }
    loss_vertex = BaseLoss(mode='vertex')
    losses_v = loss_vertex(output_v, meta_v)

    # --- gaze mode ---
    output_g = {
        'gaze_vector': jax.random.normal(k6, (B, 3), jnp.float32),
        'gaze_pitchyaws': jax.random.normal(k7, (B, 2), jnp.float32) * 0.3,
    }
    meta_g = {
        'gaze_vector': jax.random.normal(k8, (B, 3), jnp.float32),
        'gaze_pitchyaws': jax.random.normal(k9, (B, 2), jnp.float32) * 0.3,
    }
    loss_gaze = BaseLoss(mode='gaze')
    losses_g = loss_gaze(output_g, meta_g)

    ok = True
    for d in (losses_v, losses_g):
        for name, val in d.items():
            val = jax.block_until_ready(val)
            if not bool(jnp.isfinite(val)):
                ok = False

    if ok:
        print("KERNEL_OK")
</pallas_src>

<mosaic_0001>
module attributes {stable_mosaic.version = 11 : i64} {
  func.func @_vertex_fused_kernel(%arg0: i32, %arg1: memref<96x512xf32, #tpu.memory_space<vmem>>, %arg2: memref<512x896xf32, #tpu.memory_space<vmem>>, %arg3: memref<104x128xf32, #tpu.memory_space<vmem>>) attributes {dimension_semantics = [#tpu.dimension_semantics<arbitrary>], iteration_bounds = array<i64: 1>, scalar_prefetch = 0 : i64, scratch_operands = 0 : i64, tpu.core_type = #tpu.core_type<tc>, window_params = [{pipeline_mode = #tpu.pipeline_mode<synchronous>, transform_indices = @transform_0, window_bounds = array<i64: 96, 512>}, {pipeline_mode = #tpu.pipeline_mode<synchronous>, transform_indices = @transform_1, window_bounds = array<i64: 512, 896>}, {pipeline_mode = #tpu.pipeline_mode<synchronous>, transform_indices = @transform_2, window_bounds = array<i64: 104, 128>}]} {
    %c0 = arith.constant 0 : index
    %c0_0 = arith.constant 0 : index
    %0 = vector.load %arg1[%c0, %c0_0] : memref<96x512xf32, #tpu.memory_space<vmem>>, vector<96x512xf32>
    %c0_1 = arith.constant 0 : index
    %c0_2 = arith.constant 0 : index
    %1 = vector.load %arg2[%c0_1, %c0_2] : memref<512x896xf32, #tpu.memory_space<vmem>>, vector<512x896xf32>
    %cst = arith.constant dense<0.000000e+00> : vector<96x896xf32>
    %2 = tpu.matmul %0, %1, %cst {dimension_numbers = #tpu.dot_dimension_numbers<[1], [0], [0], [1], [0, 0, 1, 1], [], []>} : vector<96x512xf32>, vector<512x896xf32>, vector<96x896xf32> -> vector<96x896xf32>
    %3 = vector.extract_strided_slice %0 {offsets = [0, 0], sizes = [48, 512], strides = [1, 1]} : vector<96x512xf32> to vector<48x512xf32>
    %4 = vector.extract_strided_slice %0 {offsets = [48, 0], sizes = [48, 512], strides = [1, 1]} : vector<96x512xf32> to vector<48x512xf32>
    %5 = arith.subf %3, %4 : vector<48x512xf32>
    %6 = math.absf %5 : vector<48x512xf32>
    %7 = vector.extract_strided_slice %6 {offsets = [0, 0], sizes = [24, 512], strides = [1, 1]} : vector<48x512xf32> to vector<24x512xf32>
    %8 = vector.shape_cast %7 : vector<24x512xf32> to vector<1x24x512xf32>
    %cst_3 = arith.constant dense<0.000000e+00> : vector<1xf32>
    %9 = vector.multi_reduction <add>, %8, %cst_3 [1, 2] : vector<1x24x512xf32> to vector<1xf32>
    %10 = vector.shape_cast %9 : vector<1xf32> to vector<1x1x1xf32>
    %11 = vector.extract %10[0, 0, 0] : f32 from vector<1x1x1xf32>
    %12 = vector.broadcast %11 : f32 to vector<1x1xf32>
    %13 = vector.extract_strided_slice %6 {offsets = [24, 0], sizes = [24, 512], strides = [1, 1]} : vector<48x512xf32> to vector<24x512xf32>
    %14 = vector.shape_cast %13 : vector<24x512xf32> to vector<1x24x512xf32>
    %cst_4 = arith.constant dense<0.000000e+00> : vector<1xf32>
    %15 = vector.multi_reduction <add>, %14, %cst_4 [1, 2] : vector<1x24x512xf32> to vector<1xf32>
    %16 = vector.shape_cast %15 : vector<1xf32> to vector<1x1x1xf32>
    %17 = vector.extract %16[0, 0, 0] : f32 from vector<1x1x1xf32>
    %18 = vector.broadcast %17 : f32 to vector<1x1xf32>
    %19 = vector.extract_strided_slice %2 {offsets = [0, 128], sizes = [96, 768], strides = [1, 1]} : vector<96x896xf32> to vector<96x768xf32>
    %20 = arith.mulf %19, %19 : vector<96x768xf32>
    %21 = vector.extract_strided_slice %20 {offsets = [0, 0], sizes = [8, 768], strides = [1, 1]} : vector<96x768xf32> to vector<8x768xf32>
    %22 = vector.extract_strided_slice %20 {offsets = [8, 0], sizes = [8, 768], strides = [1, 1]} : vector<96x768xf32> to vector<8x768xf32>
    %23 = arith.addf %21, %22 : vector<8x768xf32>
    %24 = vector.extract_strided_slice %20 {offsets = [16, 0], sizes = [8, 768], strides = [1, 1]} : vector<96x768xf32> to vector<8x768xf32>
    %25 = arith.addf %23, %24 : vector<8x768xf32>
    %26 = math.sqrt %25 : vector<8x768xf32>
    %27 = vector.extract_strided_slice %20 {offsets = [24, 0], sizes = [8, 768], strides = [1, 1]} : vector<96x768xf32> to vector<8x768xf32>
    %28 = vector.extract_strided_slice %20 {offsets = [32, 0], sizes = [8, 768], strides = [1, 1]} : vector<96x768xf32> to vector<8x768xf32>
    %29 = arith.addf %27, %28 : vector<8x768xf32>
    %30 = vector.extract_strided_slice %20 {offsets = [40, 0], sizes = [8, 768], strides = [1, 1]} : vector<96x768xf32> to vector<8x768xf32>
    %31 = arith.addf %29, %30 : vector<8x768xf32>
    %32 = math.sqrt %31 : vector<8x768xf32>
    %33 = vector.extract_strided_slice %20 {offsets = [48, 0], sizes = [8, 768], strides = [1, 1]} : vector<96x768xf32> to vector<8x768xf32>
    %34 = vector.extract_strided_slice %20 {offsets = [56, 0], sizes = [8, 768], strides = [1, 1]} : vector<96x768xf32> to vector<8x768xf32>
    %35 = arith.addf %33, %34 : vector<8x768xf32>
    %36 = vector.extract_strided_slice %20 {offsets = [64, 0], sizes = [8, 768], strides = [1, 1]} : vector<96x768xf32> to vector<8x768xf32>
    %37 = arith.addf %35, %36 : vector<8x768xf32>
    %38 = math.sqrt %37 : vector<8x768xf32>
    %39 = vector.extract_strided_slice %20 {offsets = [72, 0], sizes = [8, 768], strides = [1, 1]} : vector<96x768xf32> to vector<8x768xf32>
    %40 = vector.extract_strided_slice %20 {offsets = [80, 0], sizes = [8, 768], strides = [1, 1]} : vector<96x768xf32> to vector<8x768xf32>
    %41 = arith.addf %39, %40 : vector<8x768xf32>
    %42 = vector.extract_strided_slice %20 {offsets = [88, 0], sizes = [8, 768], strides = [1, 1]} : vector<96x768xf32> to vector<8x768xf32>
    %43 = arith.addf %41, %42 : vector<8x768xf32>
    %44 = math.sqrt %43 : vector<8x768xf32>
    %45 = arith.subf %26, %38 : vector<8x768xf32>
    %46 = math.absf %45 : vector<8x768xf32>
    %47 = vector.shape_cast %46 : vector<8x768xf32> to vector<1x8x768xf32>
    %cst_5 = arith.constant dense<0.000000e+00> : vector<1xf32>
    %48 = vector.multi_reduction <add>, %47, %cst_5 [1, 2] : vector<1x8x768xf32> to vector<1xf32>
    %49 = vector.shape_cast %48 : vector<1xf32> to vector<1x1x1xf32>
    %50 = vector.extract %49[0, 0, 0] : f32 from vector<1x1x1xf32>
    %51 = vector.broadcast %50 : f32 to vector<1x1xf32>
    %52 = arith.subf %32, %44 : vector<8x768xf32>
    %53 = math.absf %52 : vector<8x768xf32>
    %54 = vector.shape_cast %53 : vector<8x768xf32> to vector<1x8x768xf32>
    %cst_6 = arith.constant dense<0.000000e+00> : vector<1xf32>
    %55 = vector.multi_reduction <add>, %54, %cst_6 [1, 2] : vector<1x8x768xf32> to vector<1xf32>
    %56 = vector.shape_cast %55 : vector<1xf32> to vector<1x1x1xf32>
    %57 = vector.extract %56[0, 0, 0] : f32 from vector<1x1x1xf32>
    %58 = vector.broadcast %57 : f32 to vector<1x1xf32>
    %59 = vector.extract_strided_slice %2 {offsets = [0, 0], sizes = [96, 128], strides = [1, 1]} : vector<96x896xf32> to vector<96x128xf32>
    %c0_7 = arith.constant 0 : index
    %c0_8 = arith.constant 0 : index
    %60 = vector.load %arg3[%c0_7, %c0_8] : memref<104x128xf32, #tpu.memory_space<vmem>>, vector<96x128xf32>
    tpu.vector_store %arg3[%c0_7, %c0_8], %59 {strides = array<i32>} : memref<104x128xf32, #tpu.memory_space<vmem>>, vector<96x128xf32>,
    %61 = tpu.iota {dimensions = array<i32: 0>} : vector<8x128xi32>
    %62 = tpu.iota {dimensions = array<i32: 1>} : vector<8x128xi32>
    %cst_9 = arith.constant 6.400000e+01 : f32
    %63 = vector.broadcast %cst_9 : f32 to vector<1x1xf32>
    %64 = arith.mulf %12, %63 : vector<1x1xf32>
    %c0_i32 = arith.constant 0 : i32
    %65 = vector.broadcast %c0_i32 : i32 to vector<8x128xi32>
    %66 = arith.cmpi eq, %61, %65 : vector<8x128xi32>
    %c0_i32_10 = arith.constant 0 : i32
    %67 = vector.broadcast %c0_i32_10 : i32 to vector<8x128xi32>
    %68 = arith.cmpi eq, %62, %67 : vector<8x128xi32>
    %69 = arith.andi %66, %68 : vector<8x128xi1>
    %70 = arith.extui %69 : vector<8x128xi1> to vector<8x128xi32>
    %71 = arith.sitofp %70 : vector<8x128xi32> to vector<8x128xf32>
    %72 = vector.broadcast %64 : vector<1x1xf32> to vector<8x128xf32>
    %73 = arith.mulf %72, %71 : vector<8x128xf32>
    %cst_11 = arith.constant 6.400000e+01 : f32
    %74 = vector.broadcast %cst_11 : f32 to vector<1x1xf32>
    %75 = arith.mulf %18, %74 : vector<1x1xf32>
    %c0_i32_12 = arith.constant 0 : i32
    %76 = vector.broadcast %c0_i32_12 : i32 to vector<8x128xi32>
    %77 = arith.cmpi eq, %61, %76 : vector<8x128xi32>
    %c1_i32 = arith.constant 1 : i32
    %78 = vector.broadcast %c1_i32 : i32 to vector<8x128xi32>
    %79 = arith.cmpi eq, %62, %78 : vector<8x128xi32>
    %80 = arith.andi %77, %79 : vector<8x128xi1>
    %81 = arith.extui %80 : vector<8x128xi1> to vector<8x128xi32>
    %82 = arith.sitofp %81 : vector<8x128xi32> to vector<8x128xf32>
    %83 = vector.broadcast %75 : vector<1x1xf32> to vector<8x128xf32>
    %84 = arith.mulf %83, %82 : vector<8x128xf32>
    %85 = arith.addf %73, %84 : vector<8x128xf32>
    %cst_13 = arith.constant 6.400000e+01 : f32
    %86 = vector.broadcast %cst_13 : f32 to vector<1x1xf32>
    %87 = arith.mulf %51, %86 : vector<1x1xf32>
    %c0_i32_14 = arith.constant 0 : i32
    %88 = vector.broadcast %c0_i32_14 : i32 to vector<8x128xi32>
    %89 = arith.cmpi eq, %61, %88 : vector<8x128xi32>
    %c2_i32 = arith.constant 2 : i32
    %90 = vector.broadcast %c2_i32 : i32 to vector<8x128xi32>
    %91 = arith.cmpi eq, %62, %90 : vector<8x128xi32>
    %92 = arith.andi %89, %91 : vector<8x128xi1>
    %93 = arith.extui %92 : vector<8x128xi1> to vector<8x128xi32>
    %94 = arith.sitofp %93 : vector<8x128xi32> to vector<8x128xf32>
    %95 = vector.broadcast %87 : vector<1x1xf32> to vector<8x128xf32>
    %96 = arith.mulf %95, %94 : vector<8x128xf32>
    %97 = arith.addf %85, %96 : vector<8x128xf32>
    %cst_15 = arith.constant 6.400000e+01 : f32
    %98 = vector.broadcast %cst_15 : f32 to vector<1x1xf32>
    %99 = arith.mulf %58, %98 : vector<1x1xf32>
    %c0_i32_16 = arith.constant 0 : i32
    %100 = vector.broadcast %c0_i32_16 : i32 to vector<8x128xi32>
    %101 = arith.cmpi eq, %61, %100 : vector<8x128xi32>
    %c3_i32 = arith.constant 3 : i32
    %102 = vector.broadcast %c3_i32 : i32 to vector<8x128xi32>
    %103 = arith.cmpi eq, %62, %102 : vector<8x128xi32>
    %104 = arith.andi %101, %103 : vector<8x128xi1>
    %105 = arith.extui %104 : vector<8x128xi1> to vector<8x128xi32>
    %106 = arith.sitofp %105 : vector<8x128xi32> to vector<8x128xf32>
    %107 = vector.broadcast %99 : vector<1x1xf32> to vector<8x128xf32>
    %108 = arith.mulf %107, %106 : vector<8x128xf32>
    %109 = arith.addf %97, %108 : vector<8x128xf32>
    %c96 = arith.constant 96 : index
    %c0_17 = arith.constant 0 : index
    %110 = vector.load %arg3[%c96, %c0_17] : memref<104x128xf32, #tpu.memory_space<vmem>>, vector<8x128xf32>
    tpu.vector_store %arg3[%c96, %c0_17], %109 {strides = array<i32>} : memref<104x128xf32, #tpu.memory_space<vmem>>, vector<8x128xf32>,
    return
  }
  func.func @transform_0(%arg0: i32) -> (i32, i32) {
    %c0_i32 = arith.constant 0 : i32
    %c0_i32_0 = arith.constant 0 : i32
    %c0_i32_1 = arith.constant 0 : i32
    return %c0_i32, %c0_i32_0 : i32, i32
  }
  func.func @transform_1(%arg0: i32) -> (i32, i32) {
    %c0_i32 = arith.constant 0 : i32
    %c0_i32_0 = arith.constant 0 : i32
    %c0_i32_1 = arith.constant 0 : i32
    return %c0_i32, %c0_i32_0 : i32, i32
  }
  func.func @transform_2(%arg0: i32) -> (i32, i32) {
    %c0_i32 = arith.constant 0 : i32
    %c0_i32_0 = arith.constant 0 : i32
    %c0_i32_1 = arith.constant 0 : i32
    return %c0_i32, %c0_i32_0 : i32, i32
  }
}

</mosaic_0001>

<bundles_post_ra>
// kernel: squeeze.11
= control target key start
LH: loop header
LB: loop body
LE: loop exit
PB: predicated region body
PF: predicated region fallthrough
CT: control target
= control target key end

     0   :  { %s115_s8 = smov 120   ;;  %vm7_vm0 = vcmask 64512   ;;  %s116_s9 = smov 96   ;;  %s162_s0 = inlined_call_operand.vmem [shape: f32[96], index: 0, kind: input, shape index: {}]   ;;  %s163_s1 = inlined_call_operand.vmem [shape: f32[4,3,8], index: 1, kind: output, shape index: {}]  }
   0x1   :  { %v4_v0 = vld [vmem:[%s162_s0] sm:$0x1]  ;;  %s114_s0 = smov 104   ;;  %s117_s10 = smov 112  }
   0x2   :  { %5 = vst [vmem:[#allocation1] sm:$0x1] %v4_v0  ;;  %s118_s11 = smov 80   ;;  %s119_s12 = smov 88  }
   0x3   :  { %s120_s13 = smov 64   ;;  %s121_s14 = smov 72  }
   0x4   :  { %s122_s15 = smov 56   ;;  %s123_s16 = smov 48  }
   0x5   :  { %s124_s17 = smov 40  }
   0x9   :  { %v21_v1 = vld [vmem:[#allocation1] sm:$0x1]  }
   0xa   :  { %v9_v2 = vld [vmem:[#allocation1] sm:$0x1]   ;;  %22 = vrot.lane.b32.xlu1 %v21_v1, %s114_s0 }
   0xb   :  { %10 = vrot.lane.b32.xlu0 %v9_v2, %s115_s8  ;;  %v27_v3 = vld [vmem:[#allocation1] sm:$0x1]  }
   0xc   :  { %v15_v4 = vld [vmem:[#allocation1] sm:$0x1]  }
   0xd   :  { %v6_v5 = vld [vmem:[#allocation1] sm:$0x1]  }
   0xe   :  { %8 = vst.msk [vmem:[#allocation0] sm:$0x1] %vm7_vm0, %v6_v5   ;;  %28 = vrot.lane.b32.xlu1 %v27_v3, %s116_s9  ;;  %v39_v6 = vld [vmem:[#allocation1] sm:$0x1]  }
   0xf   :  { %16 = vrot.lane.b32.xlu0 %v15_v4, %s117_s10  ;;  %v33_v7 = vld [vmem:[#allocation1] sm:$0x1]  }
  0x10   :  { %v51_v8 = vld [vmem:[#allocation1] sm:$0x1]  }
  0x11   :  { %v45_v9 = vld [vmem:[#allocation1] sm:$0x1]  }
  0x12   :  { %40 = vrot.lane.b32.xlu1 %v39_v6, %s118_s11  ;;  %v57_v10 = vld [vmem:[#allocation1] sm:$0x1]  }
  0x13   :  { %34 = vrot.lane.b32.xlu0 %v33_v7, %s119_s12  ;;  %v63_v11 = vld [vmem:[#allocation1] sm:$0x1]  }
  0x14   :  { %v69_v12 = vld [vmem:[#allocation1] sm:$0x1]  }
  0x16   :  { %52 = vrot.lane.b32.xlu1 %v51_v8, %s120_s13 }
  0x17   :  { %46 = vrot.lane.b32.xlu0 %v45_v9, %s121_s14 }
  0x1a   :  { %64 = vrot.lane.b32.xlu1 %v63_v11, %s123_s16 }
  0x1b   :  { %58 = vrot.lane.b32.xlu0 %v57_v10, %s122_s15 }
  0x1f   :  { %70 = vrot.lane.b32.xlu0 %v69_v12, %s124_s17 }
  0x7c   :  { %v23_v13 = vpop.permute.xlu1 %22  }
  0x7d   :  { %v11_v14 = vpop.permute.xlu0 %10   ;;  %26 = vst.msk [vmem:[#allocation0 + $0x8] sm:$0x1] %vm7_vm0, %v23_v13  }
  0x7e   :  { %14 = vst.msk [vmem:[#allocation0 + $0x1] sm:$0x1] %vm7_vm0, %v11_v14  }
  0x80   :  { %v29_v15 = vpop.permute.xlu1 %28  }
  0x81   :  { %v17_v16 = vpop.permute.xlu0 %16   ;;  %32 = vst.msk [vmem:[#allocation0 + $0x9] sm:$0x1] %vm7_vm0, %v29_v15  }
  0x82   :  { %20 = vst.msk [vmem:[#allocation0 + $0x2] sm:$0x1] %vm7_vm0, %v17_v16  }
  0x84   :  { %v41_v17 = vpop.permute.xlu1 %40  }
  0x85   :  { %v35_v18 = vpop.permute.xlu0 %34   ;;  %44 = vst.msk [vmem:[#allocation0 + $0x10] sm:$0x1] %vm7_vm0, %v41_v17  }
  0x86   :  { %38 = vst.msk [vmem:[#allocation0 + $0xa] sm:$0x1] %vm7_vm0, %v35_v18  }
  0x88   :  { %v53_v20 = vpop.permute.xlu1 %52  }
  0x89   :  { %v78_v19 = vld [vmem:[#allocation0] sm:$0xf]  ;;  %v47_v21 = vpop.permute.xlu0 %46   ;;  %56 = vst.msk [vmem:[#allocation0 + $0x12] sm:$0x1] %vm7_vm0, %v53_v20  }
  0x8a   :  { %80 = vst [vmem:[%s163_s1] sm:$0xf] %v78_v19  ;;  %50 = vst.msk [vmem:[#allocation0 + $0x11] sm:$0x1] %vm7_vm0, %v47_v21  }
  0x8c   :  { %v65_v24 = vpop.permute.xlu1 %64  }
  0x8d   :  { %v82_v22 = vld [vmem:[#allocation0 + $0x8] sm:$0xf]  ;;  %v59_v23 = vpop.permute.xlu0 %58   ;;  %68 = vst.msk [vmem:[#allocation0 + $0x19] sm:$0x1] %vm7_vm0, %v65_v24  }
  0x8e   :  { %100 = vst [vmem:[%s163_s1 + $0x4] sm:$0xf] %v82_v22  ;;  %62 = vst.msk [vmem:[#allocation0 + $0x18] sm:$0x1] %vm7_vm0, %v59_v23  }
  0x91   :  { %v87_v25 = vld [vmem:[#allocation0 + $0x10] sm:$0xf]  ;;  %v71_v26 = vpop.permute.xlu0 %70  }
  0x92   :  { %101 = vst [vmem:[%s163_s1 + $0x8] sm:$0xf] %v87_v25  ;;  %74 = vst.msk [vmem:[#allocation0 + $0x1a] sm:$0x1] %vm7_vm0, %v71_v26  }
  0x99   :  { %v93_v27 = vld [vmem:[#allocation0 + $0x18] sm:$0xf] }
  0x9a   :  { %102 = vst [vmem:[%s163_s1 + $0xc] sm:$0xf] %v93_v27 }

// kernel: _vertex_losses_impl.1
= control target key start
LH: loop header
LB: loop body
LE: loop exit
PB: predicated region body
PF: predicated region fallthrough
CT: control target
= control target key end

     0   :  { %7 = vsyncpa [#allocation3], 0  ;;  %s2861_s9 = smov [#allocation2]   ;;  %s3785_s0 = inlined_call_operand.vmem [shape: f32[96,512], index: 0, kind: input, shape index: {}]   ;;  %s3786_s1 = inlined_call_operand.hbm [shape: f32[512,896], index: 1, kind: input, shape index: {}]   ;;  %s3787_s2 = inlined_call_operand.vmem [shape: f32[104,128], index: 2, kind: output, shape index: {}]  }
   0x1   :  { %s15_s10 = sshll.u32 %s2861_s9, 4  ;;  %s2837_s13 = scalar_lea.hbm %s3786_s1, 57344  ;;  %s16_s10 = int_to_ptr.vmem [resolvable:$true] %s15_s10 }
   0x2   :  { %p2838_p0 = scmp.ne.s32.totalorder %s3786_s1, %s2837_s13  ;;  %p2841_p1 = scmp.lt.u32.totalorder %s2837_s13, %s3786_s1 }
   0x4   :  { %p2843_p2 = pnand %p2841_p1, %p2838_p0 }
   0x6   :  { %2846 = shalt.err (!%p2843_p2)
}
   0x7   :  { %s2847_s18 = scalar_lea.vmem %s16_s10, 57344  ;;  %p2852_p4 = scmp.lt.s32.totalorder %s16_s10, %s16_s10 }
   0x8   :  { %p2848_p3 = scmp.ne.s32.totalorder %s16_s10, %s2847_s18  ;;  %p2853_p5 = scmp.lt.s32.totalorder %s2847_s18, %s2847_s18 }
   0xa   :  { %p2854_p6 = por %p2853_p5, %p2852_p4 }
   0xc   :  { %p2855_p7 = pnand %p2854_p6, %p2848_p3 }
   0xe   :  { %2858 = shalt.err (!%p2855_p7)
}
   0xf   :  { %s2862_s19 = smov 896   ;;  %s2863_s20 = smov 56  }
  0x10   :  { %21 = dma.hbm_to_vmem [thread:$0]  %s3786_s1, 57344, %s16_s10, [#allocation3], %s2862_s19, %s2862_s19, %s2863_s20  }
  0x11   :  { %2859 = dma.done.wait [#allocation3], 57344  }
  0x12   :  { %2860 = vsyncadd [#allocation3], 4294909952  ;;  %v74_v0 = vld [vmem:[#allocation2 + $0x8] sm:$0xff]  ;;  %v81_v1 = vld [vmem:[#allocation2 + $0x40] sm:$0xff] }
  0x13   :  { %v76_v2 = vld [vmem:[#allocation2 + $0x18] sm:$0xff]  ;;  %v2215_v3 = vpack.c.bf16 %v81_v1, %v74_v0  ;;  %v83_v4 = vld [vmem:[#allocation2 + $0x50] sm:$0xff]  ;;  %v73_v5 = vld [vmem:[#allocation2] sm:$0xff] }
  0x14   :  { %v80_v6 = vld [vmem:[#allocation2 + $0x38] sm:$0xff]  ;;  %v2343_v7 = vpack.c.bf16 %v83_v4, %v76_v2  ;;  %v75_v9 = vld [vmem:[#allocation2 + $0x10] sm:$0xff]  ;;  %v82_v10 = vld [vmem:[#allocation2 + $0x48] sm:$0xff] }
  0x15   :  { %v2217_v8 = vpack.c.bf16 %v80_v6, %v73_v5  ;;  %v88_v11 = vld [vmem:[#allocation2 + $0x78] sm:$0xff]  ;;  %2216 = vmatprep.subr.bf16.mxu0 %v2215_v3  ;;  %v2345_v12 = vpack.c.bf16 %v82_v10, %v75_v9  ;;  %v95_v13 = vld [vmem:[#allocation2 + $0xb0] sm:$0xff]  ;;  %v90_v14 = vld [vmem:[#allocation2 + $0x88] sm:$0xff] }
  0x16   :  { %v97_v15 = vld [vmem:[#allocation2 + $0xc0] sm:$0xff]  ;;  %2344 = vmatprep.subr.bf16.mxu1 %v2343_v7  ;;  %v2219_v16 = vpack.c.bf16 %v95_v13, %v88_v11  ;;  %v87_v18 = vld [vmem:[#allocation2 + $0x70] sm:$0xff]  ;;  %v94_v19 = vld [vmem:[#allocation2 + $0xa8] sm:$0xff] }
  0x17   :  { %2218 = vmatpush1.bf16.msra.mxu0 %v2217_v8  ;;  %v2347_v17 = vpack.c.bf16 %v97_v15, %v90_v14  ;;  %v89_v20 = vld [vmem:[#allocation2 + $0x80] sm:$0xff]  ;;  %2346 = vmatpush1.bf16.msra.mxu1 %v2345_v12  ;;  %v2221_v21 = vpack.c.bf16 %v94_v19, %v87_v18  ;;  %v96_v22 = vld [vmem:[#allocation2 + $0xb8] sm:$0xff]  ;;  %v102_v23 = vld [vmem:[#allocation2 + $0xe8] sm:$0xff] }
  0x18   :  { %v109_v24 = vld [vmem:[#allocation2 + $0x120] sm:$0xff]  ;;  %2220 = vmatprep.subr.bf16.mxu0 %v2219_v16  ;;  %v2349_v25 = vpack.c.bf16 %v96_v22, %v89_v20  ;;  %v104_v27 = vld [vmem:[#allocation2 + $0xf8] sm:$0xff]  ;;  %v111_v28 = vld [vmem:[#allocation2 + $0x130] sm:$0xff] }
  0x19   :  { %2348 = vmatprep.subr.bf16.mxu1 %v2347_v17  ;;  %v2223_v26 = vpack.c.bf16 %v109_v24, %v102_v23  ;;  %v101_v29 = vld [vmem:[#allocation2 + $0xe0] sm:$0xff]  ;;  %v2351_v30 = vpack.c.bf16 %v111_v28, %v104_v27  ;;  %v108_v31 = vld [vmem:[#allocation2 + $0x118] sm:$0xff]  ;;  %v103_v32 = vld [vmem:[#allocation2 + $0xf0] sm:$0xff] }
  0x1a   :  { %v110_v33 = vld [vmem:[#allocation2 + $0x128] sm:$0xff]  ;;  %v2225_v34 = vpack.c.bf16 %v108_v31, %v101_v29  ;;  %v116_v35 = vld [vmem:[#allocation2 + $0x158] sm:$0xff]  ;;  %v123_v36 = vld [vmem:[#allocation2 + $0x190] sm:$0xff] }
  0x1b   :  { %2222 = vmatpush1.bf16.msra.mxu0 %v2221_v21  ;;  %v118_v37 = vld [vmem:[#allocation2 + $0x168] sm:$0xff]  ;;  %2350 = vmatpush1.bf16.msra.mxu1 %v2349_v25  ;;  %v2353_v38 = vpack.c.bf16 %v110_v33, %v103_v32  ;;  %v2227_v39 = vpack.c.bf16 %v123_v36, %v116_v35  ;;  %v125_v40 = vld [vmem:[#allocation2 + $0x1a0] sm:$0xff]  ;;  %v115_v41 = vld [vmem:[#allocation2 + $0x150] sm:$0xff] }
  0x1c   :  { %2224 = vmatprep.subr.bf16.mxu0 %v2223_v26  ;;  %v122_v42 = vld [vmem:[#allocation2 + $0x188] sm:$0xff]  ;;  %2352 = vmatprep.subr.bf16.mxu1 %v2351_v30  ;;  %v2355_v43 = vpack.c.bf16 %v125_v40, %v118_v37  ;;  %v117_v44 = vld [vmem:[#allocation2 + $0x160] sm:$0xff]  ;;  %v124_v45 = vld [vmem:[#allocation2 + $0x198] sm:$0xff] }
  0x1d   :  { %v130_v46 = vld [vmem:[#allocation2 + $0x1c8] sm:$0xff]  ;;  %v137_v47 = vld [vmem:[#allocation2 + $0x200] sm:$0xff]  ;;  %v132_v48 = vld [vmem:[#allocation2 + $0x1d8] sm:$0xff]  ;;  %v2229_v50 = vpack.c.bf16 %v122_v42, %v115_v41  ;;  %v2357_v51 = vpack.c.bf16 %v124_v45, %v117_v44 }
  0x1e   :  { %v139_v49 = vld [vmem:[#allocation2 + $0x210] sm:$0xff]  ;;  %v2231_v52 = vpack.c.bf16 %v137_v47, %v130_v46  ;;  %v129_v53 = vld [vmem:[#allocation2 + $0x1c0] sm:$0xff]  ;;  %v136_v54 = vld [vmem:[#allocation2 + $0x1f8] sm:$0xff] }
  0x1f   :  { %2226 = vmatpush1.bf16.msra.mxu0 %v2225_v34  ;;  %2354 = vmatpush1.bf16.msra.mxu1 %v2353_v38  ;;  %v131_v55 = vld [vmem:[#allocation2 + $0x1d0] sm:$0xff]  ;;  %v2359_v56 = vpack.c.bf16 %v139_v49, %v132_v48  ;;  %v138_v57 = vld [vmem:[#allocation2 + $0x208] sm:$0xff]  ;;  %v144_v58 = vld [vmem:[#allocation2 + $0x238] sm:$0xff]  ;;  %v2233_v62 = vpack.c.bf16 %v136_v54, %v129_v53 }
  0x20   :  { %2228 = vmatprep.subr.bf16.mxu0 %v2227_v39  ;;  %2356 = vmatprep.subr.bf16.mxu1 %v2355_v43  ;;  %v151_v59 = vld [vmem:[#allocation2 + $0x270] sm:$0xff]  ;;  %v146_v60 = vld [vmem:[#allocation2 + $0x248] sm:$0xff]  ;;  %v153_v61 = vld [vmem:[#allocation2 + $0x280] sm:$0xff]  ;;  %v2361_v63 = vpack.c.bf16 %v138_v57, %v131_v55 }
  0x21   :  { %v2235_v0 = vpack.c.bf16 %v151_v59, %v144_v58  ;;  %v143_v1 = vld [vmem:[#allocation2 + $0x230] sm:$0xff]  ;;  %v150_v2 = vld [vmem:[#allocation2 + $0x268] sm:$0xff]  ;;  %v145_v3 = vld [vmem:[#allocation2 + $0x240] sm:$0xff]  ;;  %v2363_v4 = vpack.c.bf16 %v153_v61, %v146_v60 }
  0x22   :  { %v152_v5 = vld [vmem:[#allocation2 + $0x278] sm:$0xff]  ;;  %v158_v6 = vld [vmem:[#allocation2 + $0x2a8] sm:$0xff]  ;;  %v165_v7 = vld [vmem:[#allocation2 + $0x2e0] sm:$0xff]  ;;  %v2237_v10 = vpack.c.bf16 %v150_v2, %v143_v1 }
  0x23   :  { %2230 = vmatpush1.bf16.msra.mxu0 %v2229_v50  ;;  %2358 = vmatpush1.bf16.msra.mxu1 %v2357_v51  ;;  %v160_v8 = vld [vmem:[#allocation2 + $0x2b8] sm:$0xff]  ;;  %v167_v9 = vld [vmem:[#allocation2 + $0x2f0] sm:$0xff]  ;;  %v2365_v11 = vpack.c.bf16 %v152_v5, %v145_v3  ;;  %v2239_v12 = vpack.c.bf16 %v165_v7, %v158_v6  ;;  %v157_v13 = vld [vmem:[#allocation2 + $0x2a0] sm:$0xff] }
  0x24   :  { %2232 = vmatprep.subr.bf16.mxu0 %v2231_v52  ;;  %2360 = vmatprep.subr.bf16.mxu1 %v2359_v56  ;;  %v164_v14 = vld [vmem:[#allocation2 + $0x2d8] sm:$0xff]  ;;  %v159_v15 = vld [vmem:[#allocation2 + $0x2b0] sm:$0xff]  ;;  %v2367_v16 = vpack.c.bf16 %v167_v9, %v160_v8  ;;  %v166_v17 = vld [vmem:[#allocation2 + $0x2e8] sm:$0xff] }
  0x25   :  { %v172_v18 = vld [vmem:[#allocation2 + $0x318] sm:$0xff]  ;;  %v179_v19 = vld [vmem:[#allocation2 + $0x350] sm:$0xff]  ;;  %v174_v20 = vld [vmem:[#allocation2 + $0x328] sm:$0xff]  ;;  %v2241_v22 = vpack.c.bf16 %v164_v14, %v157_v13  ;;  %v2369_v23 = vpack.c.bf16 %v166_v17, %v159_v15 }
  0x26   :  { %v181_v21 = vld [vmem:[#allocation2 + $0x360] sm:$0xff]  ;;  %v2243_v24 = vpack.c.bf16 %v179_v19, %v172_v18  ;;  %v171_v25 = vld [vmem:[#allocation2 + $0x310] sm:$0xff]  ;;  %v178_v26 = vld [vmem:[#allocation2 + $0x348] sm:$0xff] }
  0x27   :  { %2234 = vmatpush1.bf16.msra.mxu0 %v2233_v62  ;;  %2362 = vmatpush1.bf16.msra.mxu1 %v2361_v63  ;;  %v173_v27 = vld [vmem:[#allocation2 + $0x320] sm:$0xff]  ;;  %v2371_v28 = vpack.c.bf16 %v181_v21, %v174_v20  ;;  %v180_v29 = vld [vmem:[#allocation2 + $0x358] sm:$0xff]  ;;  %v186_v30 = vld [vmem:[#allocation2 + $0x388] sm:$0xff]  ;;  %v2245_v34 = vpack.c.bf16 %v178_v26, %v171_v25 }
  0x28   :  { %2236 = vmatprep.subr.bf16.mxu0 %v2235_v0  ;;  %2364 = vmatprep.subr.bf16.mxu1 %v2363_v4  ;;  %v193_v31 = vld [vmem:[#allocation2 + $0x3c0] sm:$0xff]  ;;  %v188_v32 = vld [vmem:[#allocation2 + $0x398] sm:$0xff]  ;;  %v195_v33 = vld [vmem:[#allocation2 + $0x3d0] sm:$0xff]  ;;  %v2373_v35 = vpack.c.bf16 %v180_v29, %v173_v27 }
  0x29   :  { %v2247_v36 = vpack.c.bf16 %v193_v31, %v186_v30  ;;  %v185_v37 = vld [vmem:[#allocation2 + $0x380] sm:$0xff]  ;;  %v192_v38 = vld [vmem:[#allocation2 + $0x3b8] sm:$0xff]  ;;  %v187_v39 = vld [vmem:[#allocation2 + $0x390] sm:$0xff]  ;;  %v2375_v40 = vpack.c.bf16 %v195_v33, %v188_v32 }
  0x2a   :  { %v194_v41 = vld [vmem:[#allocation2 + $0x3c8] sm:$0xff]  ;;  %v200_v42 = vld [vmem:[#allocation2 + $0x3f8] sm:$0xff]  ;;  %v207_v43 = vld [vmem:[#allocation2 + $0x430] sm:$0xff]  ;;  %v2249_v46 = vpack.c.bf16 %v192_v38, %v185_v37 }
  0x2b   :  { %2238 = vmatpush1.bf16.msra.mxu0 %v2237_v10  ;;  %2366 = vmatpush1.bf16.msra.mxu1 %v2365_v11  ;;  %v202_v44 = vld [vmem:[#allocation2 + $0x408] sm:$0xff]  ;;  %v209_v45 = vld [vmem:[#allocation2 + $0x440] sm:$0xff]  ;;  %v2377_v47 = vpack.c.bf16 %v194_v41, %v187_v39  ;;  %v2251_v48 = vpack.c.bf16 %v207_v43, %v200_v42  ;;  %v199_v49 = vld [vmem:[#allocation2 + $0x3f0] sm:$0xff] }
  0x2c   :  { %2240 = vmatprep.subr.bf16.mxu0 %v2239_v12  ;;  %2368 = vmatprep.subr.bf16.mxu1 %v2367_v16  ;;  %v206_v50 = vld [vmem:[#allocation2 + $0x428] sm:$0xff]  ;;  %v201_v51 = vld [vmem:[#allocation2 + $0x400] sm:$0xff]  ;;  %v2379_v52 = vpack.c.bf16 %v209_v45, %v202_v44  ;;  %v208_v53 = vld [vmem:[#allocation2 + $0x438] sm:$0xff] }
  0x2d   :  { %v214_v54 = vld [vmem:[#allocation2 + $0x468] sm:$0xff]  ;;  %v221_v55 = vld [vmem:[#allocation2 + $0x4a0] sm:$0xff]  ;;  %v216_v56 = vld [vmem:[#allocation2 + $0x478] sm:$0xff]  ;;  %v2253_v58 = vpack.c.bf16 %v206_v50, %v199_v49  ;;  %v2381_v59 = vpack.c.bf16 %v208_v53, %v201_v51 }
  0x2e   :  { %v223_v57 = vld [vmem:[#allocation2 + $0x4b0] sm:$0xff]  ;;  %v2255_v60 = vpack.c.bf16 %v221_v55, %v214_v54  ;;  %v213_v61 = vld [vmem:[#allocation2 + $0x460] sm:$0xff]  ;;  %v220_v62 = vld [vmem:[#allocation2 + $0x498] sm:$0xff] }
  0x2f   :  { %2242 = vmatpush1.bf16.msra.mxu0 %v2241_v22  ;;  %2370 = vmatpush1.bf16.msra.mxu1 %v2369_v23  ;;  %v215_v63 = vld [vmem:[#allocation2 + $0x470] sm:$0xff]  ;;  %v2383_v0 = vpack.c.bf16 %v223_v57, %v216_v56  ;;  %v222_v1 = vld [vmem:[#allocation2 + $0x4a8] sm:$0xff]  ;;  %v228_v2 = vld [vmem:[#allocation2 + $0x4d8] sm:$0xff]  ;;  %v2257_v6 = vpack.c.bf16 %v220_v62, %v213_v61 }
  0x30   :  { %2244 = vmatprep.subr.bf16.mxu0 %v2243_v24  ;;  %2372 = vmatprep.subr.bf16.mxu1 %v2371_v28  ;;  %v235_v3 = vld [vmem:[#allocation2 + $0x510] sm:$0xff]  ;;  %v230_v4 = vld [vmem:[#allocation2 + $0x4e8] sm:$0xff]  ;;  %v237_v5 = vld [vmem:[#allocation2 + $0x520] sm:$0xff]  ;;  %v2385_v8 = vpack.c.bf16 %v222_v1, %v215_v63 }
  0x31   :  { %v227_v7 = vld [vmem:[#allocation2 + $0x4d0] sm:$0xff]  ;;  %v2259_v9 = vpack.c.bf16 %v235_v3, %v228_v2  ;;  %v234_v10 = vld [vmem:[#allocation2 + $0x508] sm:$0xff]  ;;  %v229_v11 = vld [vmem:[#allocation2 + $0x4e0] sm:$0xff]  ;;  %v2387_v13 = vpack.c.bf16 %v237_v5, %v230_v4 }
  0x32   :  { %v236_v12 = vld [vmem:[#allocation2 + $0x518] sm:$0xff]  ;;  %v242_v14 = vld [vmem:[#allocation2 + $0x548] sm:$0xff]  ;;  %v249_v15 = vld [vmem:[#allocation2 + $0x580] sm:$0xff]  ;;  %v2261_v19 = vpack.c.bf16 %v234_v10, %v227_v7 }
  0x33   :  { %2246 = vmatpush1.bf16.msra.mxu0 %v2245_v34  ;;  %2374 = vmatpush1.bf16.msra.mxu1 %v2373_v35  ;;  %v26_v16 = vld [vmem:[%s3785_s0 + $0x8] sm:$0xff]  ;;  %v244_v17 = vld [vmem:[#allocation2 + $0x558] sm:$0xff]  ;;  %v251_v18 = vld [vmem:[#allocation2 + $0x590] sm:$0xff]  ;;  %v2389_v20 = vpack.c.bf16 %v236_v12, %v229_v11  ;;  %v2263_v21 = vpack.c.bf16 %v249_v15, %v242_v14 }
  0x34   :  { %2248 = vmatprep.subr.bf16.mxu0 %v2247_v36  ;;  %2376 = vmatprep.subr.bf16.mxu1 %v2375_v40  ;;  %v241_v22 = vld [vmem:[#allocation2 + $0x540] sm:$0xff]  ;;  %v248_v23 = vld [vmem:[#allocation2 + $0x578] sm:$0xff]  ;;  %v243_v24 = vld [vmem:[#allocation2 + $0x550] sm:$0xff]  ;;  %v2391_v25 = vpack.c.bf16 %v251_v18, %v244_v17 }
  0x35   :  { %585 = vmatprep.mubr.f32.mxu0 %v26_v16  ;;  %859 = vmatprep.mubr.f32.mxu1 %v26_v16  ;;  %v250_v26 = vld [vmem:[#allocation2 + $0x588] sm:$0xff]  ;;  %v256_v27 = vld [vmem:[#allocation2 + $0x5b8] sm:$0xff]  ;;  %v263_v28 = vld [vmem:[#allocation2 + $0x5f0] sm:$0xff]  ;;  %v2265_v31 = vpack.c.bf16 %v248_v23, %v241_v22 }
  0x36   :  { %v258_v29 = vld [vmem:[#allocation2 + $0x5c8] sm:$0xff]  ;;  %v265_v30 = vld [vmem:[#allocation2 + $0x600] sm:$0xff]  ;;  %v2393_v32 = vpack.c.bf16 %v250_v26, %v243_v24  ;;  %v2267_v33 = vpack.c.bf16 %v263_v28, %v256_v27  ;;  %v255_v34 = vld [vmem:[#allocation2 + $0x5b0] sm:$0xff] }
  0x37   :  { %2250 = vmatpush1.bf16.msra.mxu0 %v2249_v46  ;;  %2378 = vmatpush1.bf16.msra.mxu1 %v2377_v47  ;;  %v262_v35 = vld [vmem:[#allocation2 + $0x5e8] sm:$0xff]  ;;  %v257_v36 = vld [vmem:[#allocation2 + $0x5c0] sm:$0xff]  ;;  %v2395_v37 = vpack.c.bf16 %v265_v30, %v258_v29  ;;  %v264_v38 = vld [vmem:[#allocation2 + $0x5f8] sm:$0xff] }
  0x38   :  { %2252 = vmatprep.subr.bf16.mxu0 %v2251_v48  ;;  %2380 = vmatprep.subr.bf16.mxu1 %v2379_v52  ;;  %v270_v39 = vld [vmem:[#allocation2 + $0x628] sm:$0xff]  ;;  %v277_v40 = vld [vmem:[#allocation2 + $0x660] sm:$0xff]  ;;  %v272_v41 = vld [vmem:[#allocation2 + $0x638] sm:$0xff]  ;;  %v2269_v43 = vpack.c.bf16 %v262_v35, %v255_v34  ;;  %v2397_v44 = vpack.c.bf16 %v264_v38, %v257_v36 }
  0x39   :  { %v279_v42 = vld [vmem:[#allocation2 + $0x670] sm:$0xff]  ;;  %v2271_v45 = vpack.c.bf16 %v277_v40, %v270_v39  ;;  %v269_v46 = vld [vmem:[#allocation2 + $0x620] sm:$0xff]  ;;  %v276_v47 = vld [vmem:[#allocation2 + $0x658] sm:$0xff] }
  0x3a   :  { %v271_v48 = vld [vmem:[#allocation2 + $0x630] sm:$0xff]  ;;  %v2399_v49 = vpack.c.bf16 %v279_v42, %v272_v41  ;;  %v278_v50 = vld [vmem:[#allocation2 + $0x668] sm:$0xff]  ;;  %v284_v51 = vld [vmem:[#allocation2 + $0x698] sm:$0xff]  ;;  %v2273_v55 = vpack.c.bf16 %v276_v47, %v269_v46 }
  0x3b   :  { %2254 = vmatpush1.bf16.msra.mxu0 %v2253_v58  ;;  %2382 = vmatpush1.bf16.msra.mxu1 %v2381_v59  ;;  %v291_v52 = vld [vmem:[#allocation2 + $0x6d0] sm:$0xff]  ;;  %v286_v53 = vld [vmem:[#allocation2 + $0x6a8] sm:$0xff]  ;;  %v293_v54 = vld [vmem:[#allocation2 + $0x6e0] sm:$0xff]  ;;  %v2401_v56 = vpack.c.bf16 %v278_v50, %v271_v48 }
  0x3c   :  { %2256 = vmatprep.subr.bf16.mxu0 %v2255_v60  ;;  %2384 = vmatprep.subr.bf16.mxu1 %v2383_v0  ;;  %v2275_v57 = vpack.c.bf16 %v291_v52, %v284_v51  ;;  %v283_v58 = vld [vmem:[#allocation2 + $0x690] sm:$0xff]  ;;  %v290_v59 = vld [vmem:[#allocation2 + $0x6c8] sm:$0xff]  ;;  %v285_v60 = vld [vmem:[#allocation2 + $0x6a0] sm:$0xff]  ;;  %v2403_v61 = vpack.c.bf16 %v293_v54, %v286_v53 }
  0x3d   :  { %v292_v62 = vld [vmem:[#allocation2 + $0x6d8] sm:$0xff]  ;;  %v298_v63 = vld [vmem:[#allocation2 + $0x708] sm:$0xff]  ;;  %v305_v0 = vld [vmem:[#allocation2 + $0x740] sm:$0xff]  ;;  %v2277_v3 = vpack.c.bf16 %v290_v59, %v283_v58 }
  0x3e   :  { %v300_v1 = vld [vmem:[#allocation2 + $0x718] sm:$0xff]  ;;  %v307_v2 = vld [vmem:[#allocation2 + $0x750] sm:$0xff]  ;;  %v2405_v4 = vpack.c.bf16 %v292_v62, %v285_v60  ;;  %v2279_v5 = vpack.c.bf16 %v305_v0, %v298_v63  ;;  %v306_v10 = vld [vmem:[#allocation2 + $0x748] sm:$0xff] }
  0x3f   :  { %2258 = vmatpush1.bf16.msra.mxu0 %v2257_v6  ;;  %2386 = vmatpush1.bf16.msra.mxu1 %v2385_v8  ;;  %v297_v6 = vld [vmem:[#allocation2 + $0x700] sm:$0xff]  ;;  %v304_v7 = vld [vmem:[#allocation2 + $0x738] sm:$0xff]  ;;  %v299_v8 = vld [vmem:[#allocation2 + $0x710] sm:$0xff] }
  0x40   :  { %2260 = vmatprep.subr.bf16.mxu0 %v2259_v9  ;;  %2388 = vmatprep.subr.bf16.mxu1 %v2387_v13  ;;  %v2407_v9 = vpack.c.bf16 %v307_v2, %v300_v1  ;;  %v312_v11 = vld [vmem:[#allocation2 + $0x778] sm:$0xff]  ;;  %v319_v12 = vld [vmem:[#allocation2 + $0x7b0] sm:$0xff]  ;;  %v314_v13 = vld [vmem:[#allocation2 + $0x788] sm:$0xff]  ;;  %v2281_v16 = vpack.c.bf16 %v304_v7, %v297_v6  ;;  %v2409_v17 = vpack.c.bf16 %v306_v10, %v299_v8 }
  0x41   :  { %v321_v14 = vld [vmem:[#allocation2 + $0x7c0] sm:$0xff]  ;;  %v2283_v18 = vpack.c.bf16 %v319_v12, %v312_v11  ;;  %v320_v23 = vld [vmem:[#allocation2 + $0x7b8] sm:$0xff]  ;;  %v326_v24 = vld [vmem:[#allocation2 + $0x7e8] sm:$0xff] }
  0x42   :  { %v25_v15 = vld [vmem:[%s3785_s0] sm:$0xff]  ;;  %v2411_v22 = vpack.c.bf16 %v321_v14, %v314_v13  ;;  %v328_v26 = vld [vmem:[#allocation2 + $0x7f8] sm:$0xff]  ;;  %v335_v27 = vld [vmem:[#allocation2 + $0x830] sm:$0xff] }
  0x43   :  { %2262 = vmatpush1.bf16.msra.mxu0 %v2261_v19  ;;  %2390 = vmatpush1.bf16.msra.mxu1 %v2389_v20  ;;  %v311_v19 = vld [vmem:[#allocation2 + $0x770] sm:$0xff]  ;;  %v318_v20 = vld [vmem:[#allocation2 + $0x7a8] sm:$0xff]  ;;  %v29_v30 = vld [vmem:[%s3785_s0 + $0x20] sm:$0xff]  ;;  %v2415_v36 = vpack.c.bf16 %v335_v27, %v328_v26 }
  0x44   :  { %2264 = vmatprep.subr.bf16.mxu0 %v2263_v21  ;;  %2392 = vmatprep.subr.bf16.mxu1 %v2391_v25  ;;  %v313_v21 = vld [vmem:[#allocation2 + $0x780] sm:$0xff]  ;;  %v30_v28 = vld [vmem:[%s3785_s0 + $0x28] sm:$0xff]  ;;  %v2285_v29 = vpack.c.bf16 %v318_v20, %v311_v19  ;;  %v332_v34 = vld [vmem:[#allocation2 + $0x818] sm:$0xff] }
  0x45   :  { %v333_v25 = vld [vmem:[#allocation2 + $0x820] sm:$0xff]  ;;  %v327_v35 = vld [vmem:[#allocation2 + $0x7f0] sm:$0xff]  ;;  %v340_v38 = vld [vmem:[#allocation2 + $0x858] sm:$0xff] }
  0x46   :  { %v347_v39 = vld [vmem:[#allocation2 + $0x890] sm:$0xff]  ;;  %v342_v40 = vld [vmem:[#allocation2 + $0x868] sm:$0xff]  ;;  %v349_v41 = vld [vmem:[#allocation2 + $0x8a0] sm:$0xff] }
  0x47   :  { %2266 = vmatpush1.bf16.msra.mxu0 %v2265_v31  ;;  %2394 = vmatpush1.bf16.msra.mxu1 %v2393_v32  ;;  %v2413_v31 = vpack.c.bf16 %v320_v23, %v313_v21  ;;  %v2287_v32 = vpack.c.bf16 %v333_v25, %v326_v24  ;;  %v34_v42 = vld [vmem:[%s3785_s0 + $0x48] sm:$0xff]  ;;  %v2291_v46 = vpack.c.bf16 %v347_v39, %v340_v38  ;;  %v339_v47 = vld [vmem:[#allocation2 + $0x850] sm:$0xff]  ;;  %v348_v51 = vld [vmem:[#allocation2 + $0x898] sm:$0xff] }
  0x48   :  { %2268 = vmatprep.subr.bf16.mxu0 %v2267_v33  ;;  %2396 = vmatprep.subr.bf16.mxu1 %v2395_v37  ;;  %v325_v33 = vld [vmem:[#allocation2 + $0x7e0] sm:$0xff]  ;;  %v334_v37 = vld [vmem:[#allocation2 + $0x828] sm:$0xff]  ;;  %v2419_v50 = vpack.c.bf16 %v349_v41, %v342_v40  ;;  %v356_v54 = vld [vmem:[#allocation2 + $0x8d8] sm:$0xff] }
  0x49   :  { %v346_v48 = vld [vmem:[#allocation2 + $0x888] sm:$0xff]  ;;  %v361_v53 = vld [vmem:[#allocation2 + $0x900] sm:$0xff]  ;;  %v360_v62 = vld [vmem:[#allocation2 + $0x8f8] sm:$0xff] }
  0x4a   :  { %v354_v52 = vld [vmem:[#allocation2 + $0x8c8] sm:$0xff]  ;;  %v37_v58 = vld [vmem:[%s3785_s0 + $0x60] sm:$0xff]  ;;  %v355_v63 = vld [vmem:[#allocation2 + $0x8d0] sm:$0xff] }
  0x4b   :  { %2270 = vmatpush1.bf16.msra.mxu0 %v2269_v43  ;;  %2398 = vmatpush1.bf16.msra.mxu1 %v2397_v44  ;;  %v2289_v43 = vpack.c.bf16 %v332_v34, %v325_v33  ;;  %v33_v44 = vld [vmem:[%s3785_s0 + $0x40] sm:$0xff]  ;;  %v2295_v60 = vpack.c.bf16 %v361_v53, %v354_v52  ;;  %v362_v1 = vld [vmem:[#allocation2 + $0x908] sm:$0xff]  ;;  %v368_v2 = vld [vmem:[#allocation2 + $0x938] sm:$0xff] }
  0x4c   :  { %2272 = vmatprep.subr.bf16.mxu0 %v2271_v45  ;;  %2400 = vmatprep.subr.bf16.mxu1 %v2399_v49  ;;  %v2417_v45 = vpack.c.bf16 %v334_v37, %v327_v35  ;;  %v341_v49 = vld [vmem:[#allocation2 + $0x860] sm:$0xff]  ;;  %v42_v6 = vld [vmem:[%s3785_s0 + $0x88] sm:$0xff]  ;;  %v367_v11 = vld [vmem:[#allocation2 + $0x930] sm:$0xff] }
  0x4d   :  { %v2421_v59 = vpack.c.bf16 %v348_v51, %v341_v49  ;;  %v41_v8 = vld [vmem:[%s3785_s0 + $0x80] sm:$0xff]  ;;  %v374_v12 = vld [vmem:[#allocation2 + $0x968] sm:$0xff]  ;;  %v391_v19 = vld [vmem:[#allocation2 + $0x9f0] sm:$0xff] }
  0x4e   :  { %v369_v13 = vld [vmem:[#allocation2 + $0x940] sm:$0xff]  ;;  %v46_v20 = vld [vmem:[%s3785_s0 + $0xa8] sm:$0xff]  ;;  %v2301_v21 = vpack.c.bf16 %v374_v12, %v367_v11  ;;  %v388_v26 = vld [vmem:[#allocation2 + $0x9d8] sm:$0xff] }
  0x4f   :  { %2274 = vmatpush1.bf16.msra.mxu0 %v2273_v55  ;;  %2402 = vmatpush1.bf16.msra.mxu1 %v2401_v56  ;;  %v363_v55 = vld [vmem:[#allocation2 + $0x910] sm:$0xff]  ;;  %v38_v56 = vld [vmem:[%s3785_s0 + $0x68] sm:$0xff]  ;;  %v381_v25 = vld [vmem:[#allocation2 + $0x9a0] sm:$0xff] }
  0x50   :  { %2276 = vmatprep.subr.bf16.mxu0 %v2275_v57  ;;  %2404 = vmatprep.subr.bf16.mxu1 %v2403_v61  ;;  %v2293_v57 = vpack.c.bf16 %v346_v48, %v339_v47  ;;  %v353_v61 = vld [vmem:[#allocation2 + $0x8c0] sm:$0xff]  ;;  %v2423_v0 = vpack.c.bf16 %v363_v55, %v356_v54  ;;  %v383_v27 = vld [vmem:[#allocation2 + $0x9b0] sm:$0xff]  ;;  %v50_v34 = vld [vmem:[%s3785_s0 + $0xc8] sm:$0xff]  ;;  %v2305_v35 = vpack.c.bf16 %v388_v26, %v381_v25 }
  0x51   :  { %v2297_v7 = vpack.c.bf16 %v360_v62, %v353_v61  ;;  %v405_v33 = vld [vmem:[#allocation2 + $0xa60] sm:$0xff]  ;;  %v395_v39 = vld [vmem:[#allocation2 + $0xa10] sm:$0xff]  ;;  %v402_v40 = vld [vmem:[#allocation2 + $0xa48] sm:$0xff] }
  0x52   :  { %v397_v41 = vld [vmem:[#allocation2 + $0xa20] sm:$0xff]  ;;  %v419_v47 = vld [vmem:[#allocation2 + $0xad0] sm:$0xff]  ;;  %v54_v48 = vld [vmem:[%s3785_s0 + $0xe8] sm:$0xff]  ;;  %v2309_v49 = vpack.c.bf16 %v402_v40, %v395_v39 }
  0x53   :  { %2278 = vmatpush1.bf16.msra.mxu0 %v2277_v3  ;;  %2406 = vmatpush1.bf16.msra.mxu1 %v2405_v4  ;;  %v375_v3 = vld [vmem:[#allocation2 + $0x970] sm:$0xff]  ;;  %v370_v4 = vld [vmem:[#allocation2 + $0x948] sm:$0xff]  ;;  %v409_v53 = vld [vmem:[#allocation2 + $0xa80] sm:$0xff] }
  0x54   :  { %2280 = vmatprep.subr.bf16.mxu0 %v2279_v5  ;;  %2408 = vmatprep.subr.bf16.mxu1 %v2407_v9  ;;  %v377_v5 = vld [vmem:[#allocation2 + $0x980] sm:$0xff]  ;;  %v2425_v9 = vpack.c.bf16 %v362_v1, %v355_v63  ;;  %v2299_v10 = vpack.c.bf16 %v375_v3, %v368_v2  ;;  %v416_v54 = vld [vmem:[#allocation2 + $0xab8] sm:$0xff]  ;;  %v411_v55 = vld [vmem:[#allocation2 + $0xa90] sm:$0xff] }
  0x55   :  { %v2427_v14 = vpack.c.bf16 %v377_v5, %v370_v4  ;;  %v433_v61 = vld [vmem:[#allocation2 + $0xb40] sm:$0xff]  ;;  %v58_v62 = vld [vmem:[%s3785_s0 + $0x108] sm:$0xff]  ;;  %v2313_v63 = vpack.c.bf16 %v416_v54, %v409_v53  ;;  %v423_v3 = vld [vmem:[#allocation2 + $0xaf0] sm:$0xff] }
  0x56   :  { %586 = vmatmul.mubr.f32.vlgmr.msra.gmra.mrb[0].mxu0 %v25_v15  ;;  %860 = vmatmul.mubr.f32.vlgmr.msra.gmra.mrb[0].mxu1 %v25_v15  ;;  %v376_v15 = vld [vmem:[#allocation2 + $0x978] sm:$0xff]  ;;  %v430_v4 = vld [vmem:[#allocation2 + $0xb28] sm:$0xff]  ;;  %v425_v5 = vld [vmem:[#allocation2 + $0xb00] sm:$0xff] }
  0x57   :  { %2282 = vmatpush1.bf16.msra.mxu0 %v2281_v16  ;;  %2410 = vmatpush1.bf16.msra.mxu1 %v2409_v17  ;;  %v382_v16 = vld [vmem:[#allocation2 + $0x9a8] sm:$0xff]  ;;  %v389_v17 = vld [vmem:[#allocation2 + $0x9e0] sm:$0xff]  ;;  %v2429_v23 = vpack.c.bf16 %v376_v15, %v369_v13  ;;  %v447_v11 = vld [vmem:[#allocation2 + $0xbb0] sm:$0xff]  ;;  %v2317_v13 = vpack.c.bf16 %v430_v4, %v423_v3 }
  0x58   :  { %2284 = vmatprep.subr.bf16.mxu0 %v2283_v18  ;;  %2412 = vmatprep.subr.bf16.mxu1 %v2411_v22  ;;  %v384_v18 = vld [vmem:[#allocation2 + $0x9b8] sm:$0xff]  ;;  %v45_v22 = vld [vmem:[%s3785_s0 + $0xa0] sm:$0xff]  ;;  %v2303_v24 = vpack.c.bf16 %v389_v17, %v382_v16  ;;  %v62_v12 = vld [vmem:[%s3785_s0 + $0x128] sm:$0xff] }
  0x59   :  { %591 = vmatprep.mubr.f32.mxu0 %v30_v28  ;;  %865 = vmatprep.mubr.f32.mxu1 %v30_v28  ;;  %v2431_v28 = vpack.c.bf16 %v391_v19, %v384_v18  ;;  %v437_v17 = vld [vmem:[#allocation2 + $0xb60] sm:$0xff]  ;;  %v444_v18 = vld [vmem:[#allocation2 + $0xb98] sm:$0xff]  ;;  %v439_v19 = vld [vmem:[#allocation2 + $0xb70] sm:$0xff] }
  0x5a   :  { %592 = vmatmul.mubr.f32.gmra.mrb[2].mxu0 %v29_v30  ;;  %866 = vmatmul.mubr.f32.gmra.mrb[2].mxu1 %v29_v30  ;;  %v396_v30 = vld [vmem:[#allocation2 + $0xa18] sm:$0xff]  ;;  %v461_v25 = vld [vmem:[#allocation2 + $0xc20] sm:$0xff]  ;;  %v66_v26 = vld [vmem:[%s3785_s0 + $0x148] sm:$0xff] }
  0x5b   :  { %2286 = vmatpush1.bf16.msra.mxu0 %v2285_v29  ;;  %2414 = vmatpush1.bf16.msra.mxu1 %v2413_v31  ;;  %v390_v29 = vld [vmem:[#allocation2 + $0x9e8] sm:$0xff]  ;;  %v403_v31 = vld [vmem:[#allocation2 + $0xa50] sm:$0xff]  ;;  %v489_v53 = vld [vmem:[#allocation2 + $0xd00] sm:$0xff] }
  0x5c   :  { %2288 = vmatprep.subr.bf16.mxu0 %v2287_v32  ;;  %2416 = vmatprep.subr.bf16.mxu1 %v2415_v36  ;;  %v398_v32 = vld [vmem:[#allocation2 + $0xa28] sm:$0xff]  ;;  %v49_v36 = vld [vmem:[%s3785_s0 + $0xc0] sm:$0xff]  ;;  %v2433_v37 = vpack.c.bf16 %v390_v29, %v383_v27  ;;  %v2307_v38 = vpack.c.bf16 %v403_v31, %v396_v30  ;;  %v2321_v27 = vpack.c.bf16 %v444_v18, %v437_v17  ;;  %v451_v31 = vld [vmem:[#allocation2 + $0xbd0] sm:$0xff] }
  0x5d   :  { %597 = vmatprep.mubr.f32.mxu0 %v34_v42  ;;  %871 = vmatprep.mubr.f32.mxu1 %v34_v42  ;;  %v2435_v42 = vpack.c.bf16 %v405_v33, %v398_v32  ;;  %v458_v32 = vld [vmem:[#allocation2 + $0xc08] sm:$0xff]  ;;  %v453_v33 = vld [vmem:[#allocation2 + $0xbe0] sm:$0xff]  ;;  %v475_v39 = vld [vmem:[#allocation2 + $0xc90] sm:$0xff] }
  0x5e   :  { %598 = vmatmul.mubr.f32.gmra.mrb[4].mxu0 %v33_v44  ;;  %872 = vmatmul.mubr.f32.gmra.mrb[4].mxu1 %v33_v44  ;;  %v410_v44 = vld [vmem:[#allocation2 + $0xa88] sm:$0xff]  ;;  %v2974_v54 = vld [vmem:[%s3785_s0 + $0x18] sm:$0xff]  ;;  %v507_v18 = vld [vmem:[#allocation2 + $0xd90] sm:$0xff] }
  0x5f   :  { %2290 = vmatpush1.bf16.msra.mxu0 %v2289_v43  ;;  %2418 = vmatpush1.bf16.msra.mxu1 %v2417_v45  ;;  %v404_v43 = vld [vmem:[#allocation2 + $0xa58] sm:$0xff]  ;;  %v417_v45 = vld [vmem:[#allocation2 + $0xac0] sm:$0xff]  ;;  %v2961_v40 = vld [vmem:[%s3785_s0 + $0x168] sm:$0xff] }
  0x60   :  { %2292 = vmatprep.subr.bf16.mxu0 %v2291_v46  ;;  %2420 = vmatprep.subr.bf16.mxu1 %v2419_v50  ;;  %v412_v46 = vld [vmem:[#allocation2 + $0xa98] sm:$0xff]  ;;  %v53_v50 = vld [vmem:[%s3785_s0 + $0xe0] sm:$0xff]  ;;  %v2437_v51 = vpack.c.bf16 %v404_v43, %v397_v41  ;;  %v2311_v52 = vpack.c.bf16 %v417_v45, %v410_v44  ;;  %v2325_v41 = vpack.c.bf16 %v458_v32, %v451_v31 }
  0x61   :  { %603 = vmatprep.mubr.f32.mxu0 %v38_v56  ;;  %877 = vmatprep.mubr.f32.mxu1 %v38_v56  ;;  %v2439_v56 = vpack.c.bf16 %v419_v47, %v412_v46  ;;  %v465_v45 = vld [vmem:[#allocation2 + $0xc40] sm:$0xff]  ;;  %v472_v46 = vld [vmem:[#allocation2 + $0xc78] sm:$0xff]  ;;  %v467_v47 = vld [vmem:[#allocation2 + $0xc50] sm:$0xff] }
  0x62   :  { %604 = vmatmul.mubr.f32.gmra.mrb[6].mxu0 %v37_v58  ;;  %878 = vmatmul.mubr.f32.gmra.mrb[6].mxu1 %v37_v58  ;;  %v424_v58 = vld [vmem:[#allocation2 + $0xaf8] sm:$0xff] }
  0x63   :  { %2294 = vmatpush1.bf16.msra.mxu0 %v2293_v57  ;;  %2422 = vmatpush1.bf16.msra.mxu1 %v2421_v59  ;;  %v418_v57 = vld [vmem:[#allocation2 + $0xac8] sm:$0xff]  ;;  %v431_v59 = vld [vmem:[#allocation2 + $0xb30] sm:$0xff]  ;;  %v84_v31 = vld [vmem:[#allocation2 + $0x58] sm:$0xff] }
  0x64   :  { %2296 = vmatprep.subr.bf16.mxu0 %v2295_v60  ;;  %2424 = vmatprep.subr.bf16.mxu1 %v2423_v0  ;;  %v426_v60 = vld [vmem:[#allocation2 + $0xb08] sm:$0xff]  ;;  %v57_v0 = vld [vmem:[%s3785_s0 + $0x100] sm:$0xff]  ;;  %v2441_v1 = vpack.c.bf16 %v418_v57, %v411_v55  ;;  %v2315_v2 = vpack.c.bf16 %v431_v59, %v424_v58  ;;  %v2329_v55 = vpack.c.bf16 %v472_v46, %v465_v45  ;;  %v479_v58 = vld [vmem:[#allocation2 + $0xcb0] sm:$0xff] }
  0x65   :  { %609 = vmatprep.mubr.f32.mxu0 %v42_v6  ;;  %883 = vmatprep.mubr.f32.mxu1 %v42_v6  ;;  %v2443_v6 = vpack.c.bf16 %v433_v61, %v426_v60  ;;  %v486_v59 = vld [vmem:[#allocation2 + $0xce8] sm:$0xff]  ;;  %v481_v60 = vld [vmem:[#allocation2 + $0xcc0] sm:$0xff]  ;;  %v92_v32 = vld [vmem:[#allocation2 + $0x98] sm:$0xff] }
  0x66   :  { %610 = vmatmul.mubr.f32.gmra.mrb[8].mxu0 %v41_v8  ;;  %884 = vmatmul.mubr.f32.gmra.mrb[8].mxu1 %v41_v8  ;;  %v438_v8 = vld [vmem:[#allocation2 + $0xb68] sm:$0xff]  ;;  %v2333_v3 = vpack.c.bf16 %v486_v59, %v479_v58  ;;  %v2987_v45 = vld [vmem:[%s3785_s0 + $0x38] sm:$0xff]  ;;  %v105_v58 = vld [vmem:[#allocation2 + $0x100] sm:$0xff] }
  0x67   :  { %2298 = vmatpush1.bf16.msra.mxu0 %v2297_v7  ;;  %2426 = vmatpush1.bf16.msra.mxu1 %v2425_v9  ;;  %v432_v7 = vld [vmem:[#allocation2 + $0xb38] sm:$0xff]  ;;  %v445_v9 = vld [vmem:[#allocation2 + $0xba0] sm:$0xff] }
  0x68   :  { %2300 = vmatprep.subr.bf16.mxu0 %v2299_v10  ;;  %2428 = vmatprep.subr.bf16.mxu1 %v2427_v14  ;;  %v440_v10 = vld [vmem:[#allocation2 + $0xb78] sm:$0xff]  ;;  %v61_v14 = vld [vmem:[%s3785_s0 + $0x120] sm:$0xff]  ;;  %v2445_v15 = vpack.c.bf16 %v432_v7, %v425_v5  ;;  %v2319_v16 = vpack.c.bf16 %v445_v9, %v438_v8  ;;  %v495_v8 = vld [vmem:[#allocation2 + $0xd30] sm:$0xff] }
  0x69   :  { %615 = vmatprep.mubr.f32.mxu0 %v46_v20  ;;  %889 = vmatprep.mubr.f32.mxu1 %v46_v20  ;;  %v2447_v20 = vpack.c.bf16 %v447_v11, %v440_v10  ;;  %v500_v7 = vld [vmem:[#allocation2 + $0xd58] sm:$0xff]  ;;  %v502_v10 = vld [vmem:[#allocation2 + $0xd68] sm:$0xff] }
  0x6a   :  { %616 = vmatmul.mubr.f32.gmra.mrb[10].mxu0 %v45_v22  ;;  %890 = vmatmul.mubr.f32.gmra.mrb[10].mxu1 %v45_v22  ;;  %v452_v22 = vld [vmem:[#allocation2 + $0xbd8] sm:$0xff] }
  0x6b   :  { %2302 = vmatpush1.bf16.msra.mxu0 %v2301_v21  ;;  %2430 = vmatpush1.bf16.msra.mxu1 %v2429_v23  ;;  %v446_v21 = vld [vmem:[#allocation2 + $0xba8] sm:$0xff]  ;;  %v459_v23 = vld [vmem:[#allocation2 + $0xc10] sm:$0xff]  ;;  %v508_v11 = vld [vmem:[#allocation2 + $0xd98] sm:$0xff] }
  0x6c   :  { %2304 = vmatprep.subr.bf16.mxu0 %v2303_v24  ;;  %2432 = vmatprep.subr.bf16.mxu1 %v2431_v28  ;;  %v454_v24 = vld [vmem:[#allocation2 + $0xbe8] sm:$0xff]  ;;  %v65_v28 = vld [vmem:[%s3785_s0 + $0x140] sm:$0xff]  ;;  %v2449_v29 = vpack.c.bf16 %v446_v21, %v439_v19  ;;  %v2323_v30 = vpack.c.bf16 %v459_v23, %v452_v22  ;;  %v516_v22 = vld [vmem:[#allocation2 + $0xdd8] sm:$0xff] }
  0x6d   :  { %621 = vmatprep.mubr.f32.mxu0 %v50_v34  ;;  %895 = vmatprep.mubr.f32.mxu1 %v50_v34  ;;  %v2451_v34 = vpack.c.bf16 %v461_v25, %v454_v24  ;;  %v514_v19 = vld [vmem:[#allocation2 + $0xdc8] sm:$0xff]  ;;  %v85_v24 = vld [vmem:[#allocation2 + $0x60] sm:$0xff]  ;;  %v191_v25 = vld [vmem:[#allocation2 + $0x3b0] sm:$0xff] }
  0x6e   :  { %622 = vmatmul.mubr.f32.gmra.mrb[12].mxu0 %v49_v36  ;;  %896 = vmatmul.mubr.f32.gmra.mrb[12].mxu1 %v49_v36  ;;  %v466_v36 = vld [vmem:[#allocation2 + $0xc48] sm:$0xff]  ;;  %v112_v59 = vld [vmem:[#allocation2 + $0x138] sm:$0xff] }
  0x6f   :  { %2306 = vmatpush1.bf16.msra.mxu0 %v2305_v35  ;;  %2434 = vmatpush1.bf16.msra.mxu1 %v2433_v37  ;;  %v460_v35 = vld [vmem:[#allocation2 + $0xc18] sm:$0xff]  ;;  %v473_v37 = vld [vmem:[#allocation2 + $0xc80] sm:$0xff]  ;;  %v78_v23 = vld [vmem:[#allocation2 + $0x28] sm:$0xff] }
  0x70   :  { %2308 = vmatprep.subr.bf16.mxu0 %v2307_v38  ;;  %2436 = vmatprep.subr.bf16.mxu1 %v2435_v42  ;;  %v468_v38 = vld [vmem:[#allocation2 + $0xc58] sm:$0xff]  ;;  %v2966_v42 = vld [vmem:[%s3785_s0 + $0x160] sm:$0xff]  ;;  %v2453_v43 = vpack.c.bf16 %v460_v35, %v453_v33  ;;  %v2327_v44 = vpack.c.bf16 %v473_v37, %v466_v36  ;;  %v79_v35 = vld [vmem:[#allocation2 + $0x30] sm:$0xff] }
  0x71   :  { %627 = vmatprep.mubr.f32.mxu0 %v54_v48  ;;  %901 = vmatprep.mubr.f32.mxu1 %v54_v48  ;;  %v2455_v48 = vpack.c.bf16 %v475_v39, %v468_v38  ;;  %v86_v36 = vld [vmem:[#allocation2 + $0x68] sm:$0xff]  ;;  %v2982_v37 = vld [vmem:[%s3785_s0 + $0x10] sm:$0xff]  ;;  %v205_v39 = vld [vmem:[#allocation2 + $0x420] sm:$0xff] }
  0x72   :  { %628 = vmatmul.mubr.f32.gmra.mrb[14].mxu0 %v53_v50  ;;  %902 = vmatmul.mubr.f32.gmra.mrb[14].mxu1 %v53_v50  ;;  %v480_v50 = vld [vmem:[#allocation2 + $0xcb8] sm:$0xff] }
  0x73   :  { %2310 = vmatpush1.bf16.msra.mxu0 %v2309_v49  ;;  %2438 = vmatpush1.bf16.msra.mxu1 %v2437_v51  ;;  %v474_v49 = vld [vmem:[#allocation2 + $0xc88] sm:$0xff]  ;;  %v487_v51 = vld [vmem:[#allocation2 + $0xcf0] sm:$0xff] }
  0x74   :  { %2312 = vmatprep.subr.bf16.mxu0 %v2311_v52  ;;  %2440 = vmatprep.subr.bf16.mxu1 %v2439_v56  ;;  %v482_v52 = vld [vmem:[#allocation2 + $0xcc8] sm:$0xff]  ;;  %v2457_v56 = vpack.c.bf16 %v474_v49, %v467_v47  ;;  %v2331_v57 = vpack.c.bf16 %v487_v51, %v480_v50  ;;  %v113_v49 = vld [vmem:[#allocation2 + $0x140] sm:$0xff] }
  0x75   :  { %633 = vmatprep.mubr.f32.mxu0 %v58_v62  ;;  %907 = vmatprep.mubr.f32.mxu1 %v58_v62  ;;  %v2459_v61 = vpack.c.bf16 %v489_v53, %v482_v52  ;;  %v488_v62 = vld [vmem:[#allocation2 + $0xcf8] sm:$0xff]  ;;  %v106_v47 = vld [vmem:[#allocation2 + $0x108] sm:$0xff]  ;;  %v93_v51 = vld [vmem:[#allocation2 + $0xa0] sm:$0xff] }
  0x76   :  { %634 = vmatmul.mubr.f32.gmra.mrb[16].mxu0 %v57_v0  ;;  %908 = vmatmul.mubr.f32.gmra.mrb[16].mxu1 %v57_v0  ;;  %v501_v0 = vld [vmem:[#allocation2 + $0xd60] sm:$0xff]  ;;  %v2461_v4 = vpack.c.bf16 %v488_v62, %v481_v60  ;;  %v100_v52 = vld [vmem:[#allocation2 + $0xd8] sm:$0xff]  ;;  %v2994_v53 = vld [vmem:[%s3785_s0 + $0x30] sm:$0xff] }
  0x77   :  { %2314 = vmatpush1.bf16.msra.mxu0 %v2313_v63  ;;  %2442 = vmatpush1.bf16.msra.mxu1 %v2441_v1  ;;  %v494_v63 = vld [vmem:[#allocation2 + $0xd28] sm:$0xff]  ;;  %v496_v1 = vld [vmem:[#allocation2 + $0xd38] sm:$0xff] }
  0x78   :  { %2316 = vmatprep.subr.bf16.mxu0 %v2315_v2  ;;  %2444 = vmatprep.subr.bf16.mxu1 %v2443_v6  ;;  %v503_v2 = vld [vmem:[#allocation2 + $0xd70] sm:$0xff]  ;;  %v2335_v5 = vpack.c.bf16 %v501_v0, %v494_v63  ;;  %v493_v6 = vld [vmem:[#allocation2 + $0xd20] sm:$0xff]  ;;  %v3001_v60 = vld [vmem:[%s3785_s0 + $0x58] sm:$0xff]  ;;  %v2605_v63 = vpack.c.bf16 %v100_v52, %v93_v51 }
  0x79   :  { %639 = vmatprep.mubr.f32.mxu0 %v62_v12  ;;  %913 = vmatprep.mubr.f32.mxu1 %v62_v12  ;;  %v2463_v9 = vpack.c.bf16 %v503_v2, %v496_v1  ;;  %v515_v12 = vld [vmem:[#allocation2 + $0xdd0] sm:$0xff]  ;;  %v120_v62 = vld [vmem:[#allocation2 + $0x178] sm:$0xff] }
  0x7a   :  { %640 = vmatmul.mubr.f32.gmra.mrb[18].mxu0 %v61_v14  ;;  %914 = vmatmul.mubr.f32.gmra.mrb[18].mxu1 %v61_v14  ;;  %v517_v14 = vld [vmem:[#allocation2 + $0xde0] sm:$0xff]  ;;  %v2339_v17 = vpack.c.bf16 %v515_v12, %v508_v11  ;;  %v127_v0 = vld [vmem:[#allocation2 + $0x1b0] sm:$0xff]  ;;  %v134_v12 = vld [vmem:[#allocation2 + $0x1e8] sm:$0xff] }
  0x7b   :  { %2318 = vmatpush1.bf16.msra.mxu0 %v2317_v13  ;;  %2446 = vmatpush1.bf16.msra.mxu1 %v2445_v15  ;;  %v510_v13 = vld [vmem:[#allocation2 + $0xda8] sm:$0xff]  ;;  %v2337_v15 = vpack.c.bf16 %v500_v7, %v493_v6  ;;  %v107_v2 = vld [vmem:[#allocation2 + $0x110] sm:$0xff]  ;;  %v233_v6 = vld [vmem:[#allocation2 + $0x500] sm:$0xff]  ;;  %v2483_v11 = vpack.c.bf16 %v127_v0, %v120_v62 }
  0x7c   :  { %2320 = vmatprep.subr.bf16.mxu0 %v2319_v16  ;;  %2448 = vmatprep.subr.bf16.mxu1 %v2447_v20  ;;  %v2465_v16 = vpack.c.bf16 %v502_v10, %v495_v8  ;;  %v509_v20 = vld [vmem:[#allocation2 + $0xda0] sm:$0xff]  ;;  %v2467_v21 = vpack.c.bf16 %v517_v14, %v510_v13  ;;  %v240_v7 = vld [vmem:[#allocation2 + $0x538] sm:$0xff]  ;;  %v119_v8 = vld [vmem:[#allocation2 + $0x170] sm:$0xff] }
  0x7d   :  { %645 = vmatprep.mubr.f32.mxu0 %v66_v26  ;;  %919 = vmatprep.mubr.f32.mxu1 %v66_v26  ;;  %v198_v26 = vld [vmem:[#allocation2 + $0x3e8] sm:$0xff]  ;;  %v3015_v10 = vld [vmem:[%s3785_s0 + $0x78] sm:$0xff]  ;;  %v141_v14 = vld [vmem:[#allocation2 + $0x220] sm:$0xff] }
  0x7e   :  { %646 = vmatmul.mubr.f32.gmra.mrb[20].mxu0 %v65_v28  ;;  %920 = vmatmul.mubr.f32.gmra.mrb[20].mxu1 %v65_v28  ;;  %v2469_v28 = vpack.c.bf16 %v516_v22, %v509_v20  ;;  %v2599_v33 = vpack.c.bf16 %v198_v26, %v191_v25  ;;  %v247_v20 = vld [vmem:[#allocation2 + $0x570] sm:$0xff]  ;;  %v133_v22 = vld [vmem:[#allocation2 + $0x1e0] sm:$0xff]  ;;  %v2487_v25 = vpack.c.bf16 %v141_v14, %v134_v12  ;;  %v148_v26 = vld [vmem:[#allocation2 + $0x258] sm:$0xff] }
  0x7f   :  { %2322 = vmatpush1.bf16.msra.mxu0 %v2321_v27  ;;  %2450 = vmatpush1.bf16.msra.mxu1 %v2449_v29  ;;  %v2341_v27 = vpack.c.bf16 %v514_v19, %v507_v18  ;;  %v2471_v29 = vpack.c.bf16 %v85_v24, %v78_v23  ;;  %v3022_v18 = vld [vmem:[%s3785_s0 + $0x70] sm:$0xff]  ;;  %v140_v23 = vld [vmem:[#allocation2 + $0x218] sm:$0xff] }
  0x80   :  { %2324 = vmatprep.subr.bf16.mxu0 %v2323_v30  ;;  %2452 = vmatprep.subr.bf16.mxu1 %v2451_v34  ;;  %v77_v30 = vld [vmem:[#allocation2 + $0x20] sm:$0xff]  ;;  %v99_v34 = vld [vmem:[#allocation2 + $0xd0] sm:$0xff]  ;;  %v3029_v24 = vld [vmem:[%s3785_s0 + $0x98] sm:$0xff] }
  0x81   :  { %651 = vmatprep.mubr.f32.mxu0 %v2961_v40  ;;  %925 = vmatprep.mubr.f32.mxu1 %v2961_v40  ;;  %v2473_v38 = vpack.c.bf16 %v84_v31, %v77_v30  ;;  %v2475_v46 = vpack.c.bf16 %v99_v34, %v92_v32  ;;  %v135_v30 = vld [vmem:[#allocation2 + $0x1f0] sm:$0xff]  ;;  %v142_v31 = vld [vmem:[#allocation2 + $0x228] sm:$0xff]  ;;  %v261_v34 = vld [vmem:[#allocation2 + $0x5e0] sm:$0xff] }
  0x82   :  { %652 = vmatmul.mubr.f32.gmra.mrb[22].mxu0 %v2966_v42  ;;  %926 = vmatmul.mubr.f32.gmra.mrb[22].mxu1 %v2966_v42  ;;  %v3036_v32 = vld [vmem:[%s3785_s0 + $0x90] sm:$0xff] }
  0x83   :  { %2326 = vmatpush1.bf16.msra.mxu0 %v2325_v41  ;;  %2454 = vmatpush1.bf16.msra.mxu1 %v2453_v43  ;;  %v212_v41 = vld [vmem:[#allocation2 + $0x458] sm:$0xff]  ;;  %v91_v43 = vld [vmem:[#allocation2 + $0x90] sm:$0xff] }
  0x84   :  { %2328 = vmatprep.subr.bf16.mxu0 %v2327_v44  ;;  %2456 = vmatprep.subr.bf16.mxu1 %v2455_v48  ;;  %v98_v44 = vld [vmem:[#allocation2 + $0xc8] sm:$0xff]  ;;  %v2601_v48 = vpack.c.bf16 %v86_v36, %v79_v35  ;;  %v2603_v50 = vpack.c.bf16 %v212_v41, %v205_v39  ;;  %v268_v35 = vld [vmem:[#allocation2 + $0x618] sm:$0xff]  ;;  %v147_v36 = vld [vmem:[#allocation2 + $0x250] sm:$0xff] }
  0x85   :  { %722 = vmatprep.mubr.f32.mxu0 %v2974_v54  ;;  %996 = vmatprep.mubr.f32.mxu1 %v2974_v54  ;;  %v3043_v39 = vld [vmem:[%s3785_s0 + $0xb8] sm:$0xff]  ;;  %v275_v52 = vld [vmem:[#allocation2 + $0x650] sm:$0xff] }
  0x87   :  { %2330 = vmatpush1.bf16.msra.mxu0 %v2329_v55  ;;  %2458 = vmatpush1.bf16.msra.mxu1 %v2457_v56  ;;  %v2477_v55 = vpack.c.bf16 %v98_v44, %v91_v43  ;;  %v219_v56 = vld [vmem:[#allocation2 + $0x490] sm:$0xff]  ;;  %v162_v43 = vld [vmem:[#allocation2 + $0x2c8] sm:$0xff]  ;;  %v2617_v44 = vpack.c.bf16 %v142_v31, %v135_v30  ;;  %v204_v30 = vld [vmem:[#allocation2 + $0x418] sm:$0xff] }
  0x88   :  { %2332 = vmatprep.subr.bf16.mxu0 %v2331_v57  ;;  %2460 = vmatprep.subr.bf16.mxu1 %v2459_v61  ;;  %v226_v57 = vld [vmem:[#allocation2 + $0x4c8] sm:$0xff]  ;;  %v2479_v61 = vpack.c.bf16 %v113_v49, %v106_v47  ;;  %v2619_v47 = vpack.c.bf16 %v268_v35, %v261_v34  ;;  %v156_v49 = vld [vmem:[#allocation2 + $0x298] sm:$0xff]  ;;  %v211_v31 = vld [vmem:[#allocation2 + $0x450] sm:$0xff] }
  0x89   :  { %v2607_v1 = vpack.c.bf16 %v226_v57, %v219_v56  ;;  %v161_v56 = vld [vmem:[#allocation2 + $0x2c0] sm:$0xff]  ;;  %v168_v57 = vld [vmem:[#allocation2 + $0x2f8] sm:$0xff]  ;;  %v3092_v34 = vld [vmem:[%s3785_s0 + $0x110] sm:$0xff] }
  0x8b   :  { %2334 = vmatpush1.bf16.msra.mxu0 %v2333_v3  ;;  %2462 = vmatpush1.bf16.msra.mxu1 %v2461_v4  ;;  %v114_v3 = vld [vmem:[#allocation2 + $0x148] sm:$0xff]  ;;  %v3008_v4 = vld [vmem:[%s3785_s0 + $0x50] sm:$0xff] }
  0x8c   :  { %2336 = vmatprep.subr.bf16.mxu0 %v2335_v5  ;;  %2464 = vmatprep.subr.bf16.mxu1 %v2463_v9  ;;  %v2481_v5 = vpack.c.bf16 %v112_v59, %v105_v58  ;;  %v126_v9 = vld [vmem:[#allocation2 + $0x1a8] sm:$0xff]  ;;  %v2609_v13 = vpack.c.bf16 %v114_v3, %v107_v2  ;;  %v3057_v58 = vld [vmem:[%s3785_s0 + $0xd8] sm:$0xff]  ;;  %v3064_v3 = vld [vmem:[%s3785_s0 + $0xd0] sm:$0xff] }
  0x8d   :  { %v2485_v19 = vpack.c.bf16 %v126_v9, %v119_v8  ;;  %v170_v2 = vld [vmem:[#allocation2 + $0x308] sm:$0xff]  ;;  %v175_v8 = vld [vmem:[#allocation2 + $0x330] sm:$0xff] }
  0x8e   :  { %v182_v9 = vld [vmem:[#allocation2 + $0x368] sm:$0xff] }
  0x8f   :  { %2338 = vmatpush1.bf16.msra.mxu0 %v2337_v15  ;;  %2466 = vmatpush1.bf16.msra.mxu1 %v2465_v16  ;;  %v2611_v15 = vpack.c.bf16 %v240_v7, %v233_v6  ;;  %v121_v16 = vld [vmem:[#allocation2 + $0x180] sm:$0xff]  ;;  %v296_v7 = vld [vmem:[#allocation2 + $0x6f8] sm:$0xff] }
  0x90   :  { %2340 = vmatprep.subr.bf16.mxu0 %v2339_v17  ;;  %2468 = vmatprep.subr.bf16.mxu1 %v2467_v21  ;;  %v128_v17 = vld [vmem:[#allocation2 + $0x1b8] sm:$0xff]  ;;  %v254_v21 = vld [vmem:[#allocation2 + $0x5a8] sm:$0xff]  ;;  %v289_v6 = vld [vmem:[#allocation2 + $0x6c0] sm:$0xff] }
  0x93   :  { %2342 = vmatpush1.bf16.msra.mxu0 %v2341_v27  ;;  %2470 = vmatpush1.bf16.msra.mxu1 %v2469_v28  ;;  %v2613_v27 = vpack.c.bf16 %v128_v17, %v121_v16  ;;  %v155_v28 = vld [vmem:[#allocation2 + $0x290] sm:$0xff]  ;;  %v2627_v16 = vpack.c.bf16 %v296_v7, %v289_v6  ;;  %v177_v17 = vld [vmem:[#allocation2 + $0x340] sm:$0xff] }
  0x94   :  { %2472 = vmatprep.subr.bf16.mxu0 %v2471_v29  ;;  %2600 = vmatprep.subr.bf16.mxu1 %v2599_v33  ;;  %v2615_v29 = vpack.c.bf16 %v254_v21, %v247_v20  ;;  %v2489_v33 = vpack.c.bf16 %v140_v23, %v133_v22  ;;  %v2491_v41 = vpack.c.bf16 %v155_v28, %v148_v26  ;;  %v3078_v20 = vld [vmem:[%s3785_s0 + $0xf0] sm:$0xff]  ;;  %v422_v23 = vld [vmem:[#allocation2 + $0xae8] sm:$0xff]  ;;  %v196_v26 = vld [vmem:[#allocation2 + $0x3d8] sm:$0xff] }
  0x95   :  { %v2501_v21 = vpack.c.bf16 %v182_v9, %v175_v8  ;;  %v415_v22 = vld [vmem:[#allocation2 + $0xab0] sm:$0xff]  ;;  %v245_v9 = vld [vmem:[#allocation2 + $0x560] sm:$0xff] }
  0x96   :  { %723 = vmatmul.mubr.f32.vlgmr.msra.gmra.mrb[0].mxu0 %v2982_v37  ;;  %997 = vmatmul.mubr.f32.vlgmr.msra.gmra.mrb[0].mxu1 %v2982_v37  ;;  %v3134_v6 = vld [vmem:[%s3785_s0 + $0x170] sm:$0xff] }
  0x97   :  { %2474 = vmatpush1.bf16.msra.mxu0 %v2473_v38  ;;  %728 = vmatprep.mubr.f32.mxu0 %v2987_v45  ;;  %v154_v38 = vld [vmem:[#allocation2 + $0x288] sm:$0xff] }
  0x98   :  { %1002 = vmatprep.mubr.f32.mxu1 %v2987_v45  ;;  %2476 = vmatprep.subr.bf16.mxu0 %v2475_v46  ;;  %v169_v46 = vld [vmem:[#allocation2 + $0x300] sm:$0xff]  ;;  %v2493_v51 = vpack.c.bf16 %v154_v38, %v147_v36  ;;  %v203_v36 = vld [vmem:[#allocation2 + $0x410] sm:$0xff]  ;;  %v210_v38 = vld [vmem:[#allocation2 + $0x448] sm:$0xff] }
  0x99   :  { %2602 = vmatpush3.bf16.msra.mxu1 %v2601_v48  ;;  %v149_v48 = vld [vmem:[#allocation2 + $0x260] sm:$0xff]  ;;  %v2495_v59 = vpack.c.bf16 %v169_v46, %v162_v43  ;;  %v2507_v43 = vpack.c.bf16 %v211_v31, %v204_v30 }
  0x9a   :  { %729 = vmatmul.mubr.f32.gmra.mrb[2].mxu0 %v2994_v53  ;;  %2604 = vmatprep.subr.bf16.mxu1 %v2603_v50  ;;  %v3050_v50 = vld [vmem:[%s3785_s0 + $0xb0] sm:$0xff]  ;;  %v2621_v62 = vpack.c.bf16 %v156_v49, %v149_v48  ;;  %v225_v46 = vld [vmem:[#allocation2 + $0x4c0] sm:$0xff]  ;;  %v2509_v48 = vpack.c.bf16 %v210_v38, %v203_v36 }
  0x9b   :  { %1003 = vmatmul.mubr.f32.gmra.mrb[2].mxu1 %v2994_v53  ;;  %2478 = vmatpush1.bf16.msra.mxu0 %v2477_v55  ;;  %v282_v55 = vld [vmem:[#allocation2 + $0x688] sm:$0xff]  ;;  %v217_v49 = vld [vmem:[#allocation2 + $0x480] sm:$0xff] }
  0x9c   :  { %734 = vmatprep.mubr.f32.mxu0 %v3001_v60  ;;  %1008 = vmatprep.mubr.f32.mxu1 %v3001_v60  ;;  %v2623_v0 = vpack.c.bf16 %v282_v55, %v275_v52  ;;  %v3113_v52 = vld [vmem:[%s3785_s0 + $0x158] sm:$0xff]  ;;  %v3150_v36 = vld [vmem:[%s3785_s0] sm:$0xff] }
  0x9d   :  { %2480 = vmatprep.subr.bf16.mxu0 %v2479_v61  ;;  %2606 = vmatpush3.bf16.msra.mxu1 %v2605_v63  ;;  %v176_v61 = vld [vmem:[#allocation2 + $0x338] sm:$0xff]  ;;  %v183_v63 = vld [vmem:[#allocation2 + $0x370] sm:$0xff] }
  0x9e   :  { %735 = vmatmul.mubr.f32.gmra.mrb[4].mxu0 %v3008_v4  ;;  %2608 = vmatprep.subr.bf16.mxu1 %v2607_v1  ;;  %v163_v1 = vld [vmem:[#allocation2 + $0x2d0] sm:$0xff]  ;;  %v2499_v12 = vpack.c.bf16 %v183_v63, %v176_v61  ;;  %v238_v63 = vld [vmem:[#allocation2 + $0x528] sm:$0xff] }
  0x9f   :  { %1009 = vmatmul.mubr.f32.gmra.mrb[4].mxu1 %v3008_v4  ;;  %2482 = vmatpush1.bf16.msra.mxu0 %v2481_v5  ;;  %v2497_v5 = vpack.c.bf16 %v168_v57, %v161_v56  ;;  %v2625_v14 = vpack.c.bf16 %v170_v2, %v163_v1  ;;  %v232_v56 = vld [vmem:[#allocation2 + $0x4f8] sm:$0xff]  ;;  %v239_v57 = vld [vmem:[#allocation2 + $0x530] sm:$0xff]  ;;  %v246_v2 = vld [vmem:[#allocation2 + $0x568] sm:$0xff] }
  0xa0   :  { %740 = vmatprep.mubr.f32.mxu0 %v3015_v10  ;;  %1014 = vmatprep.mubr.f32.mxu1 %v3015_v10  ;;  %v2515_v1 = vpack.c.bf16 %v239_v57, %v232_v56  ;;  %v295_v56 = vld [vmem:[#allocation2 + $0x6f0] sm:$0xff] }
  0xa1   :  { %2484 = vmatprep.subr.bf16.mxu0 %v2483_v11  ;;  %2610 = vmatpush3.bf16.msra.mxu1 %v2609_v13  ;;  %v3071_v11 = vld [vmem:[%s3785_s0 + $0xf8] sm:$0xff]  ;;  %v190_v13 = vld [vmem:[#allocation2 + $0x3a8] sm:$0xff] }
  0xa2   :  { %741 = vmatmul.mubr.f32.gmra.mrb[6].mxu0 %v3022_v18  ;;  %2612 = vmatprep.subr.bf16.mxu1 %v2611_v15  ;;  %v197_v15 = vld [vmem:[#allocation2 + $0x3e0] sm:$0xff] }
  0xa3   :  { %1015 = vmatmul.mubr.f32.gmra.mrb[6].mxu1 %v3022_v18  ;;  %2486 = vmatpush1.bf16.msra.mxu0 %v2485_v19  ;;  %v184_v19 = vld [vmem:[#allocation2 + $0x378] sm:$0xff]  ;;  %v2503_v28 = vpack.c.bf16 %v197_v15, %v190_v13  ;;  %v303_v15 = vld [vmem:[#allocation2 + $0x730] sm:$0xff] }
  0xa4   :  { %746 = vmatprep.mubr.f32.mxu0 %v3029_v24  ;;  %1020 = vmatprep.mubr.f32.mxu1 %v3029_v24  ;;  %v260_v13 = vld [vmem:[#allocation2 + $0x5d8] sm:$0xff] }
  0xa5   :  { %2488 = vmatprep.subr.bf16.mxu0 %v2487_v25  ;;  %2614 = vmatpush3.bf16.msra.mxu1 %v2613_v27  ;;  %v189_v25 = vld [vmem:[#allocation2 + $0x3a0] sm:$0xff]  ;;  %v3085_v27 = vld [vmem:[%s3785_s0 + $0x118] sm:$0xff] }
  0xa6   :  { %747 = vmatmul.mubr.f32.gmra.mrb[8].mxu0 %v3036_v32  ;;  %2616 = vmatprep.subr.bf16.mxu1 %v2615_v29  ;;  %v2629_v29 = vpack.c.bf16 %v184_v19, %v177_v17  ;;  %v2505_v35 = vpack.c.bf16 %v196_v26, %v189_v25  ;;  %v429_v19 = vld [vmem:[#allocation2 + $0xb20] sm:$0xff]  ;;  %v259_v25 = vld [vmem:[#allocation2 + $0x5d0] sm:$0xff]  ;;  %v266_v26 = vld [vmem:[#allocation2 + $0x608] sm:$0xff] }
  0xa7   :  { %1021 = vmatmul.mubr.f32.gmra.mrb[8].mxu1 %v3036_v32  ;;  %2490 = vmatpush1.bf16.msra.mxu0 %v2489_v33  ;;  %v2631_v33 = vpack.c.bf16 %v422_v23, %v415_v22  ;;  %v3143_v22 = vld [vmem:[%s3785_s0 + $0x8] sm:$0xff]  ;;  %v2525_v38 = vpack.c.bf16 %v266_v26, %v259_v25  ;;  %v471_v26 = vld [vmem:[#allocation2 + $0xc70] sm:$0xff] }
  0xa8   :  { %752 = vmatprep.mubr.f32.mxu0 %v3043_v39  ;;  %1026 = vmatprep.mubr.f32.mxu1 %v3043_v39 }
  0xa9   :  { %2492 = vmatprep.subr.bf16.mxu0 %v2491_v41  ;;  %2618 = vmatpush3.bf16.msra.mxu1 %v2617_v44  ;;  %v3099_v41 = vld [vmem:[%s3785_s0 + $0x138] sm:$0xff]  ;;  %v218_v44 = vld [vmem:[#allocation2 + $0x488] sm:$0xff] }
  0xaa   :  { %753 = vmatmul.mubr.f32.gmra.mrb[10].mxu0 %v3050_v50  ;;  %2620 = vmatprep.subr.bf16.mxu1 %v2619_v47  ;;  %v3106_v47 = vld [vmem:[%s3785_s0 + $0x130] sm:$0xff]  ;;  %v2511_v55 = vpack.c.bf16 %v225_v46, %v218_v44  ;;  %v450_v44 = vld [vmem:[#allocation2 + $0xbc8] sm:$0xff] }
  0xab   :  { %1027 = vmatmul.mubr.f32.gmra.mrb[10].mxu1 %v3050_v50  ;;  %2494 = vmatpush1.bf16.msra.mxu0 %v2493_v51  ;;  %v224_v51 = vld [vmem:[#allocation2 + $0x4b8] sm:$0xff]  ;;  %v3156_v46 = vld [vmem:[%s3785_s0 + $0x28] sm:$0xff] }
  0xac   :  { %758 = vmatprep.mubr.f32.mxu0 %v3057_v58  ;;  %1032 = vmatprep.mubr.f32.mxu1 %v3057_v58  ;;  %v2513_v61 = vpack.c.bf16 %v224_v51, %v217_v49  ;;  %v273_v49 = vld [vmem:[#allocation2 + $0x640] sm:$0xff]  ;;  %v280_v51 = vld [vmem:[#allocation2 + $0x678] sm:$0xff] }
  0xad   :  { %2496 = vmatprep.subr.bf16.mxu0 %v2495_v59  ;;  %2622 = vmatpush3.bf16.msra.mxu1 %v2621_v62  ;;  %v3120_v59 = vld [vmem:[%s3785_s0 + $0x150] sm:$0xff] }
  0xae   :  { %759 = vmatmul.mubr.f32.gmra.mrb[12].mxu0 %v3064_v3  ;;  %2624 = vmatprep.subr.bf16.mxu1 %v2623_v0  ;;  %v231_v62 = vld [vmem:[#allocation2 + $0x4f0] sm:$0xff]  ;;  %v3127_v0 = vld [vmem:[%s3785_s0 + $0x178] sm:$0xff] }
  0xaf   :  { %1033 = vmatmul.mubr.f32.gmra.mrb[12].mxu1 %v3064_v3  ;;  %2498 = vmatpush1.bf16.msra.mxu0 %v2497_v5  ;;  %v253_v5 = vld [vmem:[#allocation2 + $0x5a0] sm:$0xff]  ;;  %v2517_v7 = vpack.c.bf16 %v238_v63, %v231_v62  ;;  %v331_v62 = vld [vmem:[#allocation2 + $0x810] sm:$0xff]  ;;  %v338_v63 = vld [vmem:[#allocation2 + $0x848] sm:$0xff] }
  0xb0   :  { %764 = vmatprep.mubr.f32.mxu0 %v3071_v11  ;;  %1038 = vmatprep.mubr.f32.mxu1 %v3071_v11  ;;  %v2519_v8 = vpack.c.bf16 %v253_v5, %v246_v2  ;;  %v2529_v2 = vpack.c.bf16 %v280_v51, %v273_v49  ;;  %v457_v5 = vld [vmem:[#allocation2 + $0xc00] sm:$0xff]  ;;  %v366_v49 = vld [vmem:[#allocation2 + $0x928] sm:$0xff] }
  0xb1   :  { %2500 = vmatprep.subr.bf16.mxu0 %v2499_v12  ;;  %2626 = vmatpush3.bf16.msra.mxu1 %v2625_v14  ;;  %v252_v12 = vld [vmem:[#allocation2 + $0x598] sm:$0xff]  ;;  %v267_v14 = vld [vmem:[#allocation2 + $0x610] sm:$0xff]  ;;  %v3186_v51 = vld [vmem:[%s3785_s0 + $0x60] sm:$0xff] }
  0xb2   :  { %765 = vmatmul.mubr.f32.gmra.mrb[14].mxu0 %v3078_v20  ;;  %2628 = vmatprep.subr.bf16.mxu1 %v2627_v16  ;;  %v310_v16 = vld [vmem:[#allocation2 + $0x768] sm:$0xff]  ;;  %v2521_v17 = vpack.c.bf16 %v252_v12, %v245_v9  ;;  %v2523_v23 = vpack.c.bf16 %v267_v14, %v260_v13  ;;  %v287_v12 = vld [vmem:[#allocation2 + $0x6b0] sm:$0xff] }
  0xb3   :  { %1039 = vmatmul.mubr.f32.gmra.mrb[14].mxu1 %v3078_v20  ;;  %2502 = vmatpush1.bf16.msra.mxu0 %v2501_v21  ;;  %v436_v21 = vld [vmem:[#allocation2 + $0xb58] sm:$0xff]  ;;  %v2633_v30 = vpack.c.bf16 %v310_v16, %v303_v15  ;;  %v294_v13 = vld [vmem:[#allocation2 + $0x6e8] sm:$0xff]  ;;  %v309_v15 = vld [vmem:[#allocation2 + $0x760] sm:$0xff]  ;;  %v2641_v16 = vpack.c.bf16 %v338_v63, %v331_v62 }
  0xb4   :  { %770 = vmatprep.mubr.f32.mxu0 %v3085_v27  ;;  %1044 = vmatprep.mubr.f32.mxu1 %v3085_v27  ;;  %v2635_v31 = vpack.c.bf16 %v436_v21, %v429_v19  ;;  %v302_v14 = vld [vmem:[#allocation2 + $0x728] sm:$0xff]  ;;  %v345_v19 = vld [vmem:[#allocation2 + $0x880] sm:$0xff]  ;;  %v352_v21 = vld [vmem:[#allocation2 + $0x8b8] sm:$0xff]  ;;  %v2533_v25 = vpack.c.bf16 %v294_v13, %v287_v12 }
  0xb5   :  { %2504 = vmatprep.subr.bf16.mxu0 %v2503_v28  ;;  %2630 = vmatpush3.bf16.msra.mxu1 %v2629_v29  ;;  %v274_v28 = vld [vmem:[#allocation2 + $0x648] sm:$0xff]  ;;  %v281_v29 = vld [vmem:[#allocation2 + $0x680] sm:$0xff]  ;;  %v315_v63 = vld [vmem:[#allocation2 + $0x790] sm:$0xff] }
  0xb6   :  { %771 = vmatmul.mubr.f32.gmra.mrb[16].mxu0 %v3092_v34  ;;  %2632 = vmatprep.subr.bf16.mxu1 %v2631_v33  ;;  %v317_v33 = vld [vmem:[#allocation2 + $0x7a0] sm:$0xff] }
  0xb7   :  { %1045 = vmatmul.mubr.f32.gmra.mrb[16].mxu1 %v3092_v34  ;;  %2506 = vmatpush1.bf16.msra.mxu0 %v2505_v35  ;;  %v324_v35 = vld [vmem:[#allocation2 + $0x7d8] sm:$0xff]  ;;  %v373_v13 = vld [vmem:[#allocation2 + $0x960] sm:$0xff] }
  0xb8   :  { %776 = vmatprep.mubr.f32.mxu0 %v3099_v41  ;;  %1050 = vmatprep.mubr.f32.mxu1 %v3099_v41  ;;  %v2637_v57 = vpack.c.bf16 %v324_v35, %v317_v33  ;;  %v308_v33 = vld [vmem:[#allocation2 + $0x758] sm:$0xff] }
  0xb9   :  { %2508 = vmatprep.subr.bf16.mxu0 %v2507_v43  ;;  %v443_v43 = vld [vmem:[#allocation2 + $0xb90] sm:$0xff]  ;;  %v316_v35 = vld [vmem:[#allocation2 + $0x798] sm:$0xff] }
  0xba   :  { %777 = vmatmul.mubr.f32.gmra.mrb[18].mxu0 %v3106_v47 }
  0xbb   :  { %1051 = vmatmul.mubr.f32.gmra.mrb[18].mxu1 %v3106_v47  ;;  %2510 = vmatpush1.bf16.msra.mxu0 %v2509_v48  ;;  %v2527_v48 = vpack.c.bf16 %v281_v29, %v274_v28  ;;  %v478_v28 = vld [vmem:[#allocation2 + $0xca8] sm:$0xff] }
  0xbc   :  { %782 = vmatprep.mubr.f32.mxu0 %v3113_v52  ;;  %1056 = vmatprep.mubr.f32.mxu1 %v3113_v52  ;;  %v3180_v29 = vld [vmem:[%s3785_s0 + $0x68] sm:$0xff] }
  0xbd   :  { %2512 = vmatprep.subr.bf16.mxu0 %v2511_v55  ;;  %v288_v55 = vld [vmem:[#allocation2 + $0x6b8] sm:$0xff] }
  0xbe   :  { %783 = vmatmul.mubr.f32.gmra.mrb[20].mxu0 %v3120_v59  ;;  %v2531_v9 = vpack.c.bf16 %v295_v56, %v288_v55  ;;  %v485_v56 = vld [vmem:[#allocation2 + $0xce0] sm:$0xff] }
  0xbf   :  { %1057 = vmatmul.mubr.f32.gmra.mrb[20].mxu1 %v3120_v59  ;;  %2514 = vmatpush1.bf16.msra.mxu0 %v2513_v61  ;;  %v2639_v61 = vpack.c.bf16 %v450_v44, %v443_v43  ;;  %v2645_v43 = vpack.c.bf16 %v352_v21, %v345_v19  ;;  %v2647_v44 = vpack.c.bf16 %v478_v28, %v471_v26  ;;  %v506_v19 = vld [vmem:[#allocation2 + $0xd88] sm:$0xff]  ;;  %v329_v26 = vld [vmem:[#allocation2 + $0x800] sm:$0xff]  ;;  %v336_v28 = vld [vmem:[#allocation2 + $0x838] sm:$0xff] }
  0xc0   :  { %788 = vmatprep.mubr.f32.mxu0 %v3127_v0  ;;  %1062 = vmatprep.mubr.f32.mxu1 %v3127_v0  ;;  %v3205_v21 = vld [vmem:[%s3785_s0 + $0xa8] sm:$0xff] }
  0xc1   :  { %2516 = vmatprep.subr.bf16.mxu0 %v2515_v1  ;;  %v3162_v1 = vld [vmem:[%s3785_s0 + $0x20] sm:$0xff] }
  0xc2   :  { %789 = vmatmul.mubr.f32.gmra.mrb[22].mxu0 %v3134_v6 }
  0xc3   :  { %1063 = vmatmul.mubr.f32.gmra.mrb[22].mxu1 %v3134_v6  ;;  %2518 = vmatpush1.bf16.msra.mxu0 %v2517_v7  ;;  %v464_v7 = vld [vmem:[#allocation2 + $0xc38] sm:$0xff] }
  0xc4   :  { %1407 = vmatprep.mubr.f32.mxu1 %v3143_v22  ;;  %2520 = vmatprep.subr.bf16.mxu0 %v2519_v8  ;;  %v3168_v8 = vld [vmem:[%s3785_s0 + $0x48] sm:$0xff] }
  0xc5   :  { %1133 = vmatprep.mubr.f32.mxu0 %v3143_v22 }
  0xc7   :  { %1408 = vmatmul.mubr.f32.vlgmr.msra.gmra.mrb[24].mxu1 %v3150_v36  ;;  %2522 = vmatpush1.bf16.msra.mxu0 %v2521_v17  ;;  %v2643_v17 = vpack.c.bf16 %v464_v7, %v457_v5  ;;  %v330_v5 = vld [vmem:[#allocation2 + $0x808] sm:$0xff]  ;;  %v337_v7 = vld [vmem:[#allocation2 + $0x840] sm:$0xff] }
  0xc8   :  { %1412 = vmatprep.mubr.f32.mxu1 %v3156_v46  ;;  %2524 = vmatprep.subr.bf16.mxu0 %v2523_v23  ;;  %v3174_v23 = vld [vmem:[%s3785_s0 + $0x40] sm:$0xff] }
  0xc9   :  { %2634 = vmatpush3.bf16.msra.mxu1 %v2633_v30  ;;  %v2535_v30 = vpack.c.bf16 %v309_v15, %v302_v14  ;;  %v380_v14 = vld [vmem:[#allocation2 + $0x998] sm:$0xff]  ;;  %v3199_v15 = vld [vmem:[%s3785_s0 + $0x80] sm:$0xff] }
  0xca   :  { %2636 = vmatprep.subr.bf16.mxu1 %v2635_v31  ;;  %v301_v31 = vld [vmem:[#allocation2 + $0x720] sm:$0xff] }
  0xcb   :  { %1413 = vmatmul.mubr.f32.gmra.mrb[26].mxu1 %v3162_v1  ;;  %2526 = vmatpush1.bf16.msra.mxu0 %v2525_v38  ;;  %v323_v38 = vld [vmem:[#allocation2 + $0x7d0] sm:$0xff]  ;;  %v2537_v55 = vpack.c.bf16 %v308_v33, %v301_v31  ;;  %v2653_v33 = vpack.c.bf16 %v380_v14, %v373_v13  ;;  %v408_v13 = vld [vmem:[#allocation2 + $0xa78] sm:$0xff]  ;;  %v3227_v14 = vld [vmem:[%s3785_s0 + $0xc0] sm:$0xff] }
  0xcc   :  { %1417 = vmatprep.mubr.f32.mxu1 %v3168_v8  ;;  %2528 = vmatprep.subr.bf16.mxu0 %v2527_v48  ;;  %v359_v48 = vld [vmem:[#allocation2 + $0x8f0] sm:$0xff]  ;;  %v2539_v62 = vpack.c.bf16 %v323_v38, %v316_v35 }
  0xcd   :  { %2638 = vmatpush3.bf16.msra.mxu1 %v2637_v57  ;;  %v492_v57 = vld [vmem:[#allocation2 + $0xd18] sm:$0xff]  ;;  %v351_v31 = vld [vmem:[#allocation2 + $0x8b0] sm:$0xff] }
  0xce   :  { %2640 = vmatprep.subr.bf16.mxu1 %v2639_v61  ;;  %v3192_v61 = vld [vmem:[%s3785_s0 + $0x88] sm:$0xff]  ;;  %v2651_v12 = vpack.c.bf16 %v492_v57, %v485_v56  ;;  %v387_v38 = vld [vmem:[#allocation2 + $0x9d0] sm:$0xff] }
  0xcf   :  { %1418 = vmatmul.mubr.f32.gmra.mrb[28].mxu1 %v3174_v23  ;;  %2530 = vmatpush1.bf16.msra.mxu0 %v2529_v2  ;;  %v322_v2 = vld [vmem:[#allocation2 + $0x7c8] sm:$0xff] }
  0xd0   :  { %1422 = vmatprep.mubr.f32.mxu1 %v3180_v29  ;;  %2532 = vmatprep.subr.bf16.mxu0 %v2531_v9  ;;  %v2649_v9 = vpack.c.bf16 %v366_v49, %v359_v48  ;;  %v2545_v48 = vpack.c.bf16 %v336_v28, %v329_v26  ;;  %v513_v49 = vld [vmem:[#allocation2 + $0xdc0] sm:$0xff]  ;;  %v3219_v56 = vld [vmem:[%s3785_s0 + $0xc8] sm:$0xff]  ;;  %v364_v26 = vld [vmem:[#allocation2 + $0x918] sm:$0xff] }
  0xd1   :  { %2642 = vmatpush3.bf16.msra.mxu1 %v2641_v16  ;;  %v2541_v16 = vpack.c.bf16 %v322_v2, %v315_v63  ;;  %v350_v63 = vld [vmem:[#allocation2 + $0x8a8] sm:$0xff]  ;;  %v372_v28 = vld [vmem:[#allocation2 + $0x958] sm:$0xff] }
  0xd2   :  { %2644 = vmatprep.subr.bf16.mxu1 %v2643_v17  ;;  %v499_v17 = vld [vmem:[#allocation2 + $0xd50] sm:$0xff]  ;;  %v358_v2 = vld [vmem:[#allocation2 + $0x8e8] sm:$0xff] }
  0xd3   :  { %1423 = vmatmul.mubr.f32.gmra.mrb[30].mxu1 %v3186_v51  ;;  %2534 = vmatpush1.bf16.msra.mxu0 %v2533_v25  ;;  %v2543_v25 = vpack.c.bf16 %v337_v7, %v330_v5  ;;  %v2655_v35 = vpack.c.bf16 %v506_v19, %v499_v17  ;;  %v365_v5 = vld [vmem:[#allocation2 + $0x920] sm:$0xff]  ;;  %v3233_v17 = vld [vmem:[%s3785_s0 + $0xe8] sm:$0xff] }
  0xd4   :  { %1427 = vmatprep.mubr.f32.mxu1 %v3192_v61  ;;  %2536 = vmatprep.subr.bf16.mxu0 %v2535_v30  ;;  %v344_v30 = vld [vmem:[#allocation2 + $0x878] sm:$0xff]  ;;  %v2551_v19 = vpack.c.bf16 %v365_v5, %v358_v2  ;;  %v3261_v2 = vld [vmem:[%s3785_s0 + $0x128] sm:$0xff] }
  0xd5   :  { %2646 = vmatpush3.bf16.msra.mxu1 %v2645_v43  ;;  %v394_v43 = vld [vmem:[#allocation2 + $0xa08] sm:$0xff]  ;;  %v2547_v57 = vpack.c.bf16 %v351_v31, %v344_v30  ;;  %v379_v30 = vld [vmem:[#allocation2 + $0x990] sm:$0xff] }
  0xd6   :  { %1134 = vmatmul.mubr.f32.vlgmr.msra.gmra.mrb[24].mxu0 %v3150_v36  ;;  %2648 = vmatprep.subr.bf16.mxu1 %v2647_v44  ;;  %v3213_v44 = vld [vmem:[%s3785_s0 + $0xa0] sm:$0xff]  ;;  %v2657_v7 = vpack.c.bf16 %v394_v43, %v387_v38  ;;  %v3247_v38 = vld [vmem:[%s3785_s0 + $0x108] sm:$0xff]  ;;  %v2555_v43 = vpack.c.bf16 %v379_v30, %v372_v28  ;;  %v399_v28 = vld [vmem:[#allocation2 + $0xa30] sm:$0xff] }
  0xd7   :  { %1428 = vmatmul.mubr.f32.gmra.mrb[32].mxu1 %v3199_v15  ;;  %2538 = vmatpush1.bf16.msra.mxu0 %v2537_v55  ;;  %v520_v55 = vld [vmem:[#allocation2 + $0xdf8] sm:$0xff]  ;;  %v406_v30 = vld [vmem:[#allocation2 + $0xa68] sm:$0xff] }
  0xd8   :  { %1432 = vmatprep.mubr.f32.mxu1 %v3205_v21  ;;  %2540 = vmatprep.subr.bf16.mxu0 %v2539_v62  ;;  %v343_v62 = vld [vmem:[#allocation2 + $0x870] sm:$0xff] }
  0xd9   :  { %2650 = vmatpush3.bf16.msra.mxu1 %v2649_v9  ;;  %1139 = vmatprep.mubr.f32.mxu0 %v3156_v46  ;;  %v2659_v9 = vpack.c.bf16 %v520_v55, %v513_v49  ;;  %v378_v49 = vld [vmem:[#allocation2 + $0x988] sm:$0xff] }
  0xda   :  { %1140 = vmatmul.mubr.f32.gmra.mrb[26].mxu0 %v3162_v1  ;;  %2652 = vmatprep.subr.bf16.mxu1 %v2651_v12  ;;  %v401_v12 = vld [vmem:[#allocation2 + $0xa40] sm:$0xff]  ;;  %v386_v55 = vld [vmem:[#allocation2 + $0x9c8] sm:$0xff] }
  0xdb   :  { %1433 = vmatmul.mubr.f32.gmra.mrb[34].mxu1 %v3213_v44  ;;  %2542 = vmatpush1.bf16.msra.mxu0 %v2541_v16  ;;  %v2549_v16 = vpack.c.bf16 %v350_v63, %v343_v62  ;;  %v2661_v31 = vpack.c.bf16 %v408_v13, %v401_v12  ;;  %v3255_v62 = vld [vmem:[%s3785_s0 + $0x100] sm:$0xff]  ;;  %v400_v12 = vld [vmem:[#allocation2 + $0xa38] sm:$0xff]  ;;  %v407_v13 = vld [vmem:[#allocation2 + $0xa70] sm:$0xff] }
  0xdc   :  { %1437 = vmatprep.mubr.f32.mxu1 %v3219_v56  ;;  %2544 = vmatprep.subr.bf16.mxu0 %v2543_v25  ;;  %v357_v25 = vld [vmem:[#allocation2 + $0x8e0] sm:$0xff] }
  0xdd   :  { %2654 = vmatpush3.bf16.msra.mxu1 %v2653_v33  ;;  %1145 = vmatprep.mubr.f32.mxu0 %v3168_v8  ;;  %v3241_v33 = vld [vmem:[%s3785_s0 + $0xe0] sm:$0xff] }
  0xde   :  { %1146 = vmatmul.mubr.f32.gmra.mrb[28].mxu0 %v3174_v23  ;;  %2656 = vmatprep.subr.bf16.mxu1 %v2655_v35  ;;  %v2553_v35 = vpack.c.bf16 %v364_v26, %v357_v25  ;;  %v3275_v25 = vld [vmem:[%s3785_s0 + $0x148] sm:$0xff]  ;;  %v2563_v26 = vpack.c.bf16 %v407_v13, %v400_v12  ;;  %v427_v12 = vld [vmem:[#allocation2 + $0xb10] sm:$0xff] }
  0xdf   :  { %1438 = vmatmul.mubr.f32.gmra.mrb[36].mxu1 %v3227_v14  ;;  %2546 = vmatpush1.bf16.msra.mxu0 %v2545_v48  ;;  %v371_v48 = vld [vmem:[#allocation2 + $0x950] sm:$0xff]  ;;  %v442_v13 = vld [vmem:[#allocation2 + $0xb88] sm:$0xff] }
  0xe0   :  { %1442 = vmatprep.mubr.f32.mxu1 %v3233_v17  ;;  %2548 = vmatprep.subr.bf16.mxu0 %v2547_v57  ;;  %v393_v57 = vld [vmem:[#allocation2 + $0xa00] sm:$0xff]  ;;  %v2557_v63 = vpack.c.bf16 %v378_v49, %v371_v48  ;;  %v2565_v48 = vpack.c.bf16 %v406_v30, %v399_v28  ;;  %v456_v30 = vld [vmem:[#allocation2 + $0xbf8] sm:$0xff] }
  0xe1   :  { %2658 = vmatpush3.bf16.msra.mxu1 %v2657_v7  ;;  %1151 = vmatprep.mubr.f32.mxu0 %v3180_v29  ;;  %v2559_v5 = vpack.c.bf16 %v393_v57, %v386_v55  ;;  %v385_v7 = vld [vmem:[#allocation2 + $0x9c0] sm:$0xff]  ;;  %v420_v57 = vld [vmem:[#allocation2 + $0xad8] sm:$0xff] }
  0xe2   :  { %1152 = vmatmul.mubr.f32.gmra.mrb[30].mxu0 %v3186_v51  ;;  %2660 = vmatprep.subr.bf16.mxu1 %v2659_v9  ;;  %v392_v9 = vld [vmem:[#allocation2 + $0x9f8] sm:$0xff]  ;;  %v413_v55 = vld [vmem:[#allocation2 + $0xaa0] sm:$0xff] }
  0xe3   :  { %1443 = vmatmul.mubr.f32.gmra.mrb[38].mxu1 %v3241_v33  ;;  %2550 = vmatpush1.bf16.msra.mxu0 %v2549_v16  ;;  %v3269_v16 = vld [vmem:[%s3785_s0 + $0x120] sm:$0xff] }
  0xe4   :  { %1447 = vmatprep.mubr.f32.mxu1 %v3247_v38  ;;  %2552 = vmatprep.subr.bf16.mxu0 %v2551_v19  ;;  %v2561_v19 = vpack.c.bf16 %v392_v9, %v385_v7  ;;  %v2569_v7 = vpack.c.bf16 %v420_v57, %v413_v55  ;;  %v441_v28 = vld [vmem:[#allocation2 + $0xb80] sm:$0xff]  ;;  %v462_v55 = vld [vmem:[#allocation2 + $0xc28] sm:$0xff] }
  0xe5   :  { %2662 = vmatpush3.bf16.msra.mxu1 %v2661_v31  ;;  %1157 = vmatprep.mubr.f32.mxu0 %v3192_v61  ;;  %v414_v31 = vld [vmem:[#allocation2 + $0xaa8] sm:$0xff] }
  0xe6   :  { %1158 = vmatmul.mubr.f32.gmra.mrb[32].mxu0 %v3199_v15  ;;  %v470_v57 = vld [vmem:[#allocation2 + $0xc68] sm:$0xff] }
  0xe7   :  { %1448 = vmatmul.mubr.f32.gmra.mrb[40].mxu1 %v3255_v62  ;;  %2554 = vmatpush1.bf16.msra.mxu0 %v2553_v35  ;;  %v421_v35 = vld [vmem:[#allocation2 + $0xae0] sm:$0xff] }
  0xe8   :  { %1452 = vmatprep.mubr.f32.mxu1 %v3261_v2  ;;  %2556 = vmatprep.subr.bf16.mxu0 %v2555_v43  ;;  %v3283_v43 = vld [vmem:[%s3785_s0 + $0x140] sm:$0xff]  ;;  %v2567_v49 = vpack.c.bf16 %v421_v35, %v414_v31  ;;  %v463_v31 = vld [vmem:[#allocation2 + $0xc30] sm:$0xff] }
  0xe9   :  { %1163 = vmatprep.mubr.f32.mxu0 %v3205_v21 }
  0xea   :  { %1164 = vmatmul.mubr.f32.gmra.mrb[34].mxu0 %v3213_v44 }
  0xeb   :  { %1453 = vmatmul.mubr.f32.gmra.mrb[42].mxu1 %v3269_v16  ;;  %2558 = vmatpush1.bf16.msra.mxu0 %v2557_v63  ;;  %v428_v63 = vld [vmem:[#allocation2 + $0xb18] sm:$0xff] }
  0xec   :  { %1457 = vmatprep.mubr.f32.mxu1 %v3275_v25  ;;  %2560 = vmatprep.subr.bf16.mxu0 %v2559_v5  ;;  %v435_v5 = vld [vmem:[#allocation2 + $0xb50] sm:$0xff] }
  0xed   :  { %1169 = vmatprep.mubr.f32.mxu0 %v3219_v56  ;;  %v2571_v9 = vpack.c.bf16 %v435_v5, %v428_v63  ;;  %v477_v63 = vld [vmem:[#allocation2 + $0xca0] sm:$0xff] }
  0xee   :  { %1170 = vmatmul.mubr.f32.gmra.mrb[36].mxu0 %v3227_v14 }
  0xef   :  { %1458 = vmatmul.mubr.f32.gmra.mrb[44].mxu1 %v3283_v43  ;;  %2562 = vmatpush1.bf16.msra.mxu0 %v2561_v19  ;;  %v449_v19 = vld [vmem:[#allocation2 + $0xbc0] sm:$0xff] }
  0xf0   :  { %1462 = vmatprep.mubr.f32.mxu1 %v2961_v40  ;;  %2564 = vmatprep.subr.bf16.mxu0 %v2563_v26  ;;  %v434_v40 = vld [vmem:[#allocation2 + $0xb48] sm:$0xff] }
  0xf1   :  { %1175 = vmatprep.mubr.f32.mxu0 %v3233_v17  ;;  %v2573_v26 = vpack.c.bf16 %v434_v40, %v427_v12  ;;  %v476_v12 = vld [vmem:[#allocation2 + $0xc98] sm:$0xff] }
  0xf2   :  { %1176 = vmatmul.mubr.f32.gmra.mrb[38].mxu0 %v3241_v33  ;;  %v484_v40 = vld [vmem:[#allocation2 + $0xcd8] sm:$0xff] }
  0xf3   :  { %1463 = vmatmul.mubr.f32.gmra.mrb[46].mxu1 %v2966_v42  ;;  %2566 = vmatpush1.bf16.msra.mxu0 %v2565_v48  ;;  %v2575_v42 = vpack.c.bf16 %v449_v19, %v442_v13  ;;  %v2579_v48 = vpack.c.bf16 %v463_v31, %v456_v30  ;;  %v491_v13 = vld [vmem:[#allocation2 + $0xd10] sm:$0xff]  ;;  %v3306_v19 = vld [vmem:[%s3785_s0 + $0x168] sm:$0xff] }
  0xf4   :  { %1532 = vmatprep.mubr.f32.mxu1 %v2974_v54  ;;  %2568 = vmatprep.subr.bf16.mxu0 %v2567_v49  ;;  %v448_v54 = vld [vmem:[#allocation2 + $0xbb8] sm:$0xff]  ;;  %v455_v49 = vld [vmem:[#allocation2 + $0xbf0] sm:$0xff]  ;;  %v490_v30 = vld [vmem:[#allocation2 + $0xd08] sm:$0xff] }
  0xf5   :  { %1181 = vmatprep.mubr.f32.mxu0 %v3247_v38  ;;  %v2577_v35 = vpack.c.bf16 %v448_v54, %v441_v28  ;;  %v2581_v5 = vpack.c.bf16 %v462_v55, %v455_v49  ;;  %v2587_v28 = vpack.c.bf16 %v491_v13, %v484_v40  ;;  %v483_v54 = vld [vmem:[#allocation2 + $0xcd0] sm:$0xff]  ;;  %v498_v31 = vld [vmem:[#allocation2 + $0xd48] sm:$0xff] }
  0xf6   :  { %1182 = vmatmul.mubr.f32.gmra.mrb[40].mxu0 %v3255_v62  ;;  %v2589_v49 = vpack.c.bf16 %v490_v30, %v483_v54  ;;  %v511_v40 = vld [vmem:[#allocation2 + $0xdb0] sm:$0xff]  ;;  %v518_v13 = vld [vmem:[#allocation2 + $0xde8] sm:$0xff] }
  0xf7   :  { %1533 = vmatmul.mubr.f32.vlgmr.msra.gmra.mrb[48].mxu1 %v2982_v37  ;;  %2570 = vmatpush1.bf16.msra.mxu0 %v2569_v7  ;;  %v2583_v7 = vpack.c.bf16 %v477_v63, %v470_v57  ;;  %v497_v57 = vld [vmem:[#allocation2 + $0xd40] sm:$0xff]  ;;  %v504_v63 = vld [vmem:[#allocation2 + $0xd78] sm:$0xff] }
  0xf8   :  { %1537 = vmatprep.mubr.f32.mxu1 %v2987_v45  ;;  %2572 = vmatprep.subr.bf16.mxu0 %v2571_v9  ;;  %v469_v9 = vld [vmem:[#allocation2 + $0xc60] sm:$0xff] }
  0xf9   :  { %1187 = vmatprep.mubr.f32.mxu0 %v3261_v2 }
  0xfa   :  { %1188 = vmatmul.mubr.f32.gmra.mrb[42].mxu0 %v3269_v16 }
  0xfb   :  { %1538 = vmatmul.mubr.f32.gmra.mrb[50].mxu1 %v2994_v53  ;;  %2574 = vmatpush1.bf16.msra.mxu0 %v2573_v26  ;;  %v3312_v26 = vld [vmem:[%s3785_s0 + $0x160] sm:$0xff] }
  0xfc   :  { %1542 = vmatprep.mubr.f32.mxu1 %v3001_v60  ;;  %2576 = vmatprep.subr.bf16.mxu0 %v2575_v42  ;;  %v2585_v42 = vpack.c.bf16 %v476_v12, %v469_v9  ;;  %v2593_v9 = vpack.c.bf16 %v504_v63, %v497_v57  ;;  %v1593_v63 = vsub.f32 %v3150_v36, %v3227_v14 }
  0xfd   :  { %1193 = vmatprep.mubr.f32.mxu0 %v3275_v25 }
  0xfe   :  { %1194 = vmatmul.mubr.f32.gmra.mrb[44].mxu0 %v3283_v43 }
  0xff   :  { %1543 = vmatmul.mubr.f32.gmra.mrb[52].mxu1 %v3008_v4  ;;  %2578 = vmatpush1.bf16.msra.mxu0 %v2577_v35  ;;  %v505_v35 = vld [vmem:[#allocation2 + $0xd80] sm:$0xff] }
 0x100   :  { %1547 = vmatprep.mubr.f32.mxu1 %v3015_v10  ;;  %2580 = vmatprep.subr.bf16.mxu0 %v2579_v48  ;;  %v3320_v48 = vld [vmem:[%s3785_s0 + $0x18] sm:$0xff]  ;;  %v2591_v55 = vpack.c.bf16 %v505_v35, %v498_v31 }
 0x101   :  { %1199 = vmatprep.mubr.f32.mxu0 %v3306_v19 }
 0x102   :  { %1200 = vmatmul.mubr.f32.gmra.mrb[46].mxu0 %v3312_v26 }
 0x103   :  { %1548 = vmatmul.mubr.f32.gmra.mrb[54].mxu1 %v3022_v18  ;;  %2582 = vmatpush1.bf16.msra.mxu0 %v2581_v5  ;;  %v512_v5 = vld [vmem:[#allocation2 + $0xdb8] sm:$0xff] }
 0x104   :  { %1552 = vmatprep.mubr.f32.mxu1 %v3029_v24  ;;  %2584 = vmatprep.subr.bf16.mxu0 %v2583_v7  ;;  %v519_v7 = vld [vmem:[#allocation2 + $0xdf0] sm:$0xff] }
 0x105   :  { %1270 = vmatprep.mubr.f32.mxu0 %v3320_v48  ;;  %v2595_v12 = vpack.c.bf16 %v519_v7, %v512_v5  ;;  %v1606_v5 = vsub.f32 %v3180_v29, %v3261_v2 }
 0x107   :  { %1553 = vmatmul.mubr.f32.gmra.mrb[56].mxu1 %v3036_v32  ;;  %2586 = vmatpush1.bf16.msra.mxu0 %v2585_v42  ;;  %v2597_v42 = vpack.c.bf16 %v518_v13, %v511_v40  ;;  %v1605_v40 = vsub.f32 %v3186_v51, %v3269_v16  ;;  %v1630_v29 = vand.u32 2147483647, %v1606_v5  ;;  %v1609_v5 = vsub.f32 %v3199_v15, %v3283_v43 }
 0x108   :  { %1557 = vmatprep.mubr.f32.mxu1 %v3043_v39  ;;  %2588 = vmatprep.subr.bf16.mxu0 %v2587_v28 }
 0x10b   :  { %1558 = vmatmul.mubr.f32.gmra.mrb[58].mxu1 %v3050_v50  ;;  %2590 = vmatpush1.bf16.msra.mxu0 %v2589_v49 }
 0x10c   :  { %1562 = vmatprep.mubr.f32.mxu1 %v3057_v58  ;;  %2592 = vmatprep.subr.bf16.mxu0 %v2591_v55  ;;  %v1594_v55 = vsub.f32 %v3143_v22, %v3219_v56 }
 0x10e   :  { %v1618_v14 = vand.u32 2147483647, %v1594_v55 }
 0x10f   :  { %1563 = vmatmul.mubr.f32.gmra.mrb[60].mxu1 %v3064_v3  ;;  %2594 = vmatpush1.bf16.msra.mxu0 %v2593_v9 }
 0x110   :  { %1567 = vmatprep.mubr.f32.mxu1 %v3071_v11  ;;  %2596 = vmatprep.subr.bf16.mxu0 %v2595_v12 }
 0x113   :  { %1568 = vmatmul.mubr.f32.gmra.mrb[62].mxu1 %v3078_v20  ;;  %2598 = vmatpush1.bf16.msra.mxu0 %v2597_v42  ;;  %v1617_v42 = vand.u32 2147483647, %v1593_v63  ;;  %v1597_v63 = vsub.f32 %v3162_v1, %v3241_v33 }
 0x114   :  { %1572 = vmatprep.mubr.f32.mxu1 %v3085_v27 }
 0x116   :  { %1271 = vmatmul.mubr.f32.vlgmr.msra.gmra.mrb[24].mxu0 %v2982_v37 }
 0x117   :  { %1573 = vmatmul.mubr.f32.gmra.mrb[64].mxu1 %v3092_v34  ;;  %1276 = vmatprep.mubr.f32.mxu0 %v2987_v45 }
 0x118   :  { %1577 = vmatprep.mubr.f32.mxu1 %v3099_v41 }
 0x11a   :  { %1277 = vmatmul.mubr.f32.gmra.mrb[26].mxu0 %v2994_v53 }
 0x11b   :  { %1578 = vmatmul.mubr.f32.gmra.mrb[66].mxu1 %v3106_v47  ;;  %1282 = vmatprep.mubr.f32.mxu0 %v3001_v60 }
 0x11c   :  { %1582 = vmatprep.mubr.f32.mxu1 %v3113_v52 }
 0x11e   :  { %1283 = vmatmul.mubr.f32.gmra.mrb[28].mxu0 %v3008_v4 }
 0x11f   :  { %1583 = vmatmul.mubr.f32.gmra.mrb[68].mxu1 %v3120_v59  ;;  %1288 = vmatprep.mubr.f32.mxu0 %v3015_v10 }
 0x120   :  { %1587 = vmatprep.mubr.f32.mxu1 %v3127_v0 }
 0x122   :  { %1289 = vmatmul.mubr.f32.gmra.mrb[30].mxu0 %v3022_v18 }
 0x123   :  { %1588 = vmatmul.mubr.f32.gmra.mrb[70].mxu1 %v3134_v6  ;;  %1294 = vmatprep.mubr.f32.mxu0 %v3029_v24 }
 0x126   :  { %1295 = vmatmul.mubr.f32.gmra.mrb[32].mxu0 %v3036_v32 }
 0x127   :  { %1300 = vmatprep.mubr.f32.mxu0 %v3043_v39 }
 0x12a   :  { %1301 = vmatmul.mubr.f32.gmra.mrb[34].mxu0 %v3050_v50 }
 0x12b   :  { %1306 = vmatprep.mubr.f32.mxu0 %v3057_v58 }
 0x12e   :  { %1307 = vmatmul.mubr.f32.gmra.mrb[36].mxu0 %v3064_v3 }
 0x12f   :  { %1312 = vmatprep.mubr.f32.mxu0 %v3071_v11 }
 0x132   :  { %1313 = vmatmul.mubr.f32.gmra.mrb[38].mxu0 %v3078_v20 }
 0x133   :  { %1318 = vmatprep.mubr.f32.mxu0 %v3085_v27 }
 0x136   :  { %1319 = vmatmul.mubr.f32.gmra.mrb[40].mxu0 %v3092_v34 }
 0x137   :  { %1324 = vmatprep.mubr.f32.mxu0 %v3099_v41 }
 0x13a   :  { %1325 = vmatmul.mubr.f32.gmra.mrb[42].mxu0 %v3106_v47 }
 0x13b   :  { %1330 = vmatprep.mubr.f32.mxu0 %v3113_v52 }
 0x13e   :  { %1331 = vmatmul.mubr.f32.gmra.mrb[44].mxu0 %v3120_v59 }
 0x13f   :  { %1336 = vmatprep.mubr.f32.mxu0 %v3127_v0 }
 0x142   :  { %1337 = vmatmul.mubr.f32.gmra.mrb[46].mxu0 %v3134_v6 }
 0x169   :  { %v724_v37 = vpop.f32.mrb[0].mxu0  ;;  %v998_v45 = vpop.f32.mrb[0].mxu1 }
 0x16a   :  { %2025 = vst [vmem:[%s3787_s2] sm:$0xff] %v724_v37  ;;  %v726_v53 = vpop.f32.mrb[1].mxu0  ;;  %v1000_v60 = vpop.f32.mrb[1].mxu1  ;;  %v1684_v24 = vmul.f32 %v998_v45, %v998_v45  ;;  %v1629_v37 = vand.u32 2147483647, %v1605_v40  ;;  %v2820_v45 = vld [vmem:[%s3785_s0 + $0x70] sm:$0xff]  ;;  %v1596_v40 = vsub.f32 %v3320_v48, %v3057_v58 }
 0x16b   :  { %v1683_v32 = vmul.f32 %v726_v53, %v726_v53  ;;  %v1685_v27 = vmul.f32 %v1000_v60, %v1000_v60  ;;  %v1607_v51 = vsub.f32 %v2820_v45, %v3106_v47  ;;  %v2821_v47 = vld [vmem:[%s3785_s0 + $0x10] sm:$0xff]  ;;  %v3429_v58 = vand.u32 2147483647, %v1597_v63 }
 0x16d   :  { %v730_v4 = vpop.f32.mrb[2].mxu0 }
 0x16e   :  { %2026 = vst [vmem:[%s3787_s2 + $0x8] sm:$0xff] %v730_v4  ;;  %v1004_v10 = vpop.f32.mrb[2].mxu1  ;;  %v732_v18 = vpop.f32.mrb[3].mxu0 }
 0x16f   :  { %v1690_v39 = vmul.f32 %v1004_v10, %v1004_v10  ;;  %v1689_v50 = vmul.f32 %v732_v18, %v732_v18  ;;  %v1006_v11 = vpop.f32.mrb[3].mxu1 }
 0x170   :  { %v1691_v34 = vmul.f32 %v1006_v11, %v1006_v11 }
 0x171   :  { %v1756_v52 = vadd.f32 %v1690_v39, %v1684_v24  ;;  %v1755_v0 = vadd.f32 %v1689_v50, %v1683_v32  ;;  %v736_v6 = vpop.f32.mrb[4].mxu0  ;;  %v1595_v50 = vsub.f32 %v2821_v47, %v3064_v3  ;;  %v1598_v3 = vsub.f32 %v3156_v46, %v3233_v17 }
 0x172   :  { %v1757_v28 = vadd.f32 %v1691_v34, %v1685_v27  ;;  %2027 = vst [vmem:[%s3787_s2 + $0x10] sm:$0xff] %v736_v6  ;;  %v1010_v54 = vpop.f32.mrb[4].mxu1  ;;  %v738_v30 = vpop.f32.mrb[5].mxu0 }
 0x173   :  { %v1696_v31 = vmul.f32 %v1010_v54, %v1010_v54  ;;  %v1695_v35 = vmul.f32 %v738_v30, %v738_v30  ;;  %v1012_v49 = vpop.f32.mrb[5].mxu1 }
 0x174   :  { %v1697_v57 = vmul.f32 %v1012_v49, %v1012_v49 }
 0x175   :  { %v3376_v7 = vadd.f32 %v1756_v52, %v1696_v31  ;;  %v3378_v9 = vadd.f32 %v1755_v0, %v1695_v35  ;;  %v742_v12 = vpop.f32.mrb[6].mxu0  ;;  %v1662_v52 = vadd.f32 %v1630_v29, %v1629_v37  ;;  %v2822_v0 = vld [vmem:[%s3785_s0 + $0x78] sm:$0xff]  ;;  %v1641_v35 = vadd.f32 %v1618_v14, %v1617_v42 }
 0x176   :  { %v3382_v13 = vadd.f32 %v1757_v28, %v1697_v57  ;;  %2028 = vst [vmem:[%s3787_s2 + $0x18] sm:$0xff] %v742_v12  ;;  %v1016_v22 = vpop.f32.mrb[6].mxu1  ;;  %v744_v56 = vpop.f32.mrb[7].mxu0  ;;  %v1608_v6 = vsub.f32 %v2822_v0, %v3099_v41  ;;  %v1631_v28 = vand.u32 2147483647, %v1607_v51  ;;  %v1610_v41 = vsub.f32 %v3192_v61, %v3275_v25 }
 0x177   :  { %v1018_v36 = vpop.f32.mrb[7].mxu1  ;;  %2747 = vrsqrt.f32 %v3376_v7  ;;  %v1702_v16 = vmul.f32 %v1016_v22, %v1016_v22  ;;  %v1701_v4 = vmul.f32 %v744_v56, %v744_v56  ;;  %v1619_v22 = vand.u32 2147483647, %v1595_v50 }
 0x178   :  { %2749 = vrsqrt.f32 %v3378_v9  ;;  %v1703_v32 = vmul.f32 %v1018_v36, %v1018_v36  ;;  %v1632_v36 = vand.u32 2147483647, %v1608_v6  ;;  %v1663_v14 = vadd.f32 %v1662_v52, %v1631_v28 }
 0x179   :  { %v748_v2 = vpop.f32.mrb[8].mxu0  ;;  %2751 = vrsqrt.f32 %v3382_v13  ;;  %v3427_v25 = vand.u32 2147483647, %v1598_v3  ;;  %v3431_v43 = vand.u32 2147483647, %v1610_v41  ;;  %v3438_v37 = vadd.f32 %v1641_v35, %v1619_v22 }
 0x17a   :  { %2029 = vst [vmem:[%s3787_s2 + $0x20] sm:$0xff] %v748_v2  ;;  %v1022_v53 = vpop.f32.mrb[8].mxu1  ;;  %v750_v60 = vpop.f32.mrb[9].mxu0  ;;  %v3434_v29 = vand.u32 2147483647, %v1609_v5  ;;  %vm1769_vm0 = vcmp.eq.f32.partialorder %v3378_v9, inf }
 0x17b   :  { %v1708_v10 = vmul.f32 %v1022_v53, %v1022_v53  ;;  %v1707_v18 = vmul.f32 %v750_v60, %v750_v60  ;;  %v1024_v24 = vpop.f32.mrb[9].mxu1  ;;  %v3436_v2 = vand.u32 2147483647, %v1596_v40  ;;  %v3447_v60 = vadd.f32 %v1663_v14, %v1632_v36 }
 0x17c   :  { %v1709_v39 = vmul.f32 %v1024_v24, %v1024_v24  ;;  %vm1771_vm1 = vcmp.eq.f32.partialorder %v3378_v9, 0.0  ;;  %v1772_v63 = vand.u32 2147483648, %v3378_v9  ;;  %vm1776_vm2 = vcmp.eq.f32.partialorder %v3376_v7, inf }
 0x17d   :  { %v1810_v11 = vadd.f32 %v1708_v10, %v1702_v16  ;;  %v1809_v27 = vadd.f32 %v1707_v18, %v1701_v4  ;;  %v754_v34 = vpop.f32.mrb[10].mxu0  ;;  %v3443_v16 = vld [vmem:[%s3785_s0 + $0x30] sm:$0xff]  ;;  %vm1783_vm3 = vcmp.eq.f32.partialorder %v3382_v13, inf  ;;  %v1779_v36 = vand.u32 2147483648, %v3376_v7 }
 0x17e   :  { %v1811_v54 = vadd.f32 %v1709_v39, %v1703_v32  ;;  %2030 = vst [vmem:[%s3787_s2 + $0x28] sm:$0xff] %v754_v34  ;;  %v1028_v30 = vpop.f32.mrb[10].mxu1  ;;  %v756_v31 = vpop.f32.mrb[11].mxu0  ;;  %v1599_v53 = vsub.f32 %v3443_v16, %v3078_v20  ;;  %v2824_v4 = vld [vmem:[%s3785_s0 + $0x90] sm:$0xff]  ;;  %vm1778_vm4 = vcmp.eq.f32.partialorder %v3376_v7, 0.0  ;;  %vm1785_vm5 = vcmp.eq.f32.partialorder %v3382_v13, 0.0 }
 0x17f   :  { %v1714_v49 = vmul.f32 %v1028_v30, %v1028_v30  ;;  %v1713_v55 = vmul.f32 %v756_v31, %v756_v31  ;;  %v1030_v57 = vpop.f32.mrb[11].mxu1  ;;  %v1611_v10 = vsub.f32 %v2824_v4, %v3120_v59 }
 0x180   :  { %v1715_v12 = vmul.f32 %v1030_v57, %v1030_v57 }
 0x181   :  { %v3418_v56 = vadd.f32 %v1810_v11, %v1714_v49  ;;  %v3420_v46 = vadd.f32 %v1809_v27, %v1713_v55  ;;  %v760_v17 = vpop.f32.mrb[12].mxu0  ;;  %v2748_v33 = vpop.eup %2747  ;;  %v3461_v30 = vand.u32 2147483647, %v1611_v10 }
 0x182   :  { %v3422_v42 = vadd.f32 %v1811_v54, %v1715_v12  ;;  %2031 = vst [vmem:[%s3787_s2 + $0x30] sm:$0xff] %v760_v17  ;;  %v1034_v1 = vpop.f32.mrb[12].mxu1  ;;  %v762_v61 = vpop.f32.mrb[13].mxu0  ;;  %v1775_v0 = vmul.f32 %v2748_v33, %v3376_v7 }
 0x183   :  { %v1036_v15 = vpop.f32.mrb[13].mxu1  ;;  %2753 = vrsqrt.f32 %v3418_v56  ;;  %v2750_v48 = vpop.eup %2749  ;;  %v1720_v18 = vmul.f32 %v1034_v1, %v1034_v1  ;;  %v1719_v39 = vmul.f32 %v762_v61, %v762_v61  ;;  %vm1823_vm6 = vcmp.eq.f32.partialorder %v3420_v46, inf }
 0x184   :  { %v2752_v51 = vpop.eup %2751  ;;  %2755 = vrsqrt.f32 %v3420_v46  ;;  %v1721_v27 = vmul.f32 %v1036_v15, %v1036_v15  ;;  %v1768_v52 = vmul.f32 %v2750_v48, %v3378_v9  ;;  %v1777_v12 = vsel %vm1776_vm2, %v3376_v7, %v1775_v0 }
 0x185   :  { %v766_v45 = vpop.f32.mrb[14].mxu0  ;;  %2757 = vrsqrt.f32 %v3422_v42  ;;  %v1782_v54 = vmul.f32 %v2752_v51, %v3382_v13  ;;  %v1786_v48 = vand.u32 2147483648, %v3382_v13  ;;  %v3491_v4 = vsel %vm1778_vm4, %v1779_v36, %v1777_v12 }
 0x186   :  { %2032 = vst [vmem:[%s3787_s2 + $0x38] sm:$0xff] %v766_v45  ;;  %v1040_v24 = vpop.f32.mrb[14].mxu1  ;;  %v768_v32 = vpop.f32.mrb[15].mxu0  ;;  %v1770_v5 = vsel %vm1769_vm0, %v3378_v9, %v1768_v52  ;;  %v1826_v10 = vand.u32 2147483648, %v3420_v46  ;;  %vm1830_vm7 = vcmp.eq.f32.partialorder %v3418_v56, inf  ;;  %v1833_v7 = vand.u32 2147483648, %v3418_v56 }
 0x187   :  { %v1726_v47 = vmul.f32 %v1040_v24, %v1040_v24  ;;  %v1725_v50 = vmul.f32 %v768_v32, %v768_v32  ;;  %v1042_v11 = vpop.f32.mrb[15].mxu1  ;;  %v1784_v14 = vsel %vm1783_vm3, %v3382_v13, %v1782_v54  ;;  %v3489_v51 = vsel %vm1771_vm1, %v1772_v63, %v1770_v5  ;;  %v2826_v63 = vld [vmem:[%s3785_s0 + $0xf8] sm:$0xff] }
 0x188   :  { %v1727_v34 = vmul.f32 %v1042_v11, %v1042_v11  ;;  %v1840_v24 = vand.u32 2147483648, %v3422_v42  ;;  %vm1832_vm8 = vcmp.eq.f32.partialorder %v3418_v56, 0.0  ;;  %vm1825_vm9 = vcmp.eq.f32.partialorder %v3420_v46, 0.0 }
 0x189   :  { %v1864_v59 = vadd.f32 %v1726_v47, %v1720_v18  ;;  %v1863_v6 = vadd.f32 %v1725_v50, %v1719_v39  ;;  %v772_v28 = vpop.f32.mrb[16].mxu0  ;;  %v3495_v18 = vsel %vm1785_vm5, %v1786_v48, %v1784_v14  ;;  %v1643_v39 = vadd.f32 %v3438_v37, %v3436_v2 }
 0x18a   :  { %v1865_v31 = vadd.f32 %v1727_v34, %v1721_v27  ;;  %2033 = vst [vmem:[%s3787_s2 + $0x40] sm:$0xff] %v772_v28  ;;  %v1046_v35 = vpop.f32.mrb[16].mxu1  ;;  %v774_v3 = vpop.f32.mrb[17].mxu0  ;;  %vm1837_vm0 = vcmp.eq.f32.partialorder %v3422_v42, inf }
 0x18b   :  { %v1732_v49 = vmul.f32 %v1046_v35, %v1046_v35  ;;  %v1731_v55 = vmul.f32 %v774_v3, %v774_v3  ;;  %v1048_v57 = vpop.f32.mrb[17].mxu1  ;;  %v1644_v37 = vadd.f32 %v1643_v39, %v3429_v58  ;;  %v1623_v58 = vand.u32 2147483647, %v1599_v53 }
 0x18c   :  { %v1733_v41 = vmul.f32 %v1048_v57, %v1048_v57  ;;  %v2825_v57 = vld [vmem:[%s3785_s0 + $0x38] sm:$0xff] }
 0x18d   :  { %v3473_v40 = vadd.f32 %v1864_v59, %v1732_v49  ;;  %v3475_v22 = vadd.f32 %v1863_v6, %v1731_v55  ;;  %v778_v17 = vpop.f32.mrb[18].mxu0  ;;  %v2754_v1 = vpop.eup %2753  ;;  %v1645_v36 = vadd.f32 %v1644_v37, %v3427_v25 }
 0x18e   :  { %v3479_v61 = vadd.f32 %v1865_v31, %v1733_v41  ;;  %2034 = vst [vmem:[%s3787_s2 + $0x48] sm:$0xff] %v778_v17  ;;  %v1052_v15 = vpop.f32.mrb[18].mxu1  ;;  %v780_v33 = vpop.f32.mrb[19].mxu0  ;;  %v1829_v47 = vmul.f32 %v2754_v1, %v3418_v56  ;;  %v1600_v41 = vsub.f32 %v2825_v57, %v2826_v63 }
 0x18f   :  { %v1054_v45 = vpop.f32.mrb[19].mxu1  ;;  %v2756_v13 = vpop.eup %2755  ;;  %2759 = vrsqrt.f32 %v3473_v40  ;;  %v1738_v9 = vmul.f32 %v1052_v15, %v1052_v15  ;;  %v1737_v50 = vmul.f32 %v780_v33, %v780_v33  ;;  %v1880_v52 = vand.u32 2147483648, %v3475_v22 }
 0x190   :  { %2761 = vrsqrt.f32 %v3475_v22  ;;  %v1739_v11 = vmul.f32 %v1054_v45, %v1054_v45  ;;  %v2758_v0 = vpop.eup %2757  ;;  %v1887_v54 = vand.u32 2147483648, %v3473_v40  ;;  %v1894_v31 = vand.u32 2147483648, %v3479_v61 }
 0x191   :  { %v784_v32 = vpop.f32.mrb[20].mxu0  ;;  %2763 = vrsqrt.f32 %v3479_v61  ;;  %v1822_v35 = vmul.f32 %v2756_v13, %v3420_v46  ;;  %v3530_v14 = vsel %vm1830_vm7, %v3418_v56, %v1829_v47  ;;  %v3534_v1 = vmul.f32 %v2758_v0, %v3422_v42  ;;  %v2830_v0 = vld [vmem:[%s3785_s0 + $0x110] sm:$0xff] }
 0x192   :  { %2035 = vst [vmem:[%s3787_s2 + $0x50] sm:$0xff] %v784_v32  ;;  %v1058_v27 = vpop.f32.mrb[20].mxu1  ;;  %v786_v34 = vpop.f32.mrb[21].mxu0  ;;  %v1601_v15 = vsub.f32 %v3174_v23, %v3255_v62  ;;  %v1624_v33 = vand.u32 2147483647, %v1600_v41  ;;  %v1646_v48 = vadd.f32 %v1645_v36, %v1623_v58  ;;  %v1665_v45 = vadd.f32 %v3447_v60, %v3434_v29  ;;  %v2827_v60 = vld [vmem:[%s3785_s0 + $0x98] sm:$0xff] }
 0x193   :  { %v1744_v59 = vmul.f32 %v1058_v27, %v1058_v27  ;;  %v1743_v6 = vmul.f32 %v786_v34, %v786_v34  ;;  %v1060_v2 = vpop.f32.mrb[21].mxu1  ;;  %vm1877_vm10 = vcmp.eq.f32.partialorder %v3475_v22, inf  ;;  %v1824_v13 = vsel %vm1823_vm6, %v3420_v46, %v1822_v35  ;;  %v2829_v34 = vld [vmem:[%s3785_s0 + $0x50] sm:$0xff] }
 0x194   :  { %v1745_v28 = vmul.f32 %v1060_v2, %v1060_v2  ;;  %v1602_v23 = vsub.f32 %v3168_v8, %v3247_v38  ;;  %v1625_v62 = vand.u32 2147483647, %v1601_v15  ;;  %vm1879_vm11 = vcmp.eq.f32.partialorder %v3475_v22, 0.0 }
 0x195   :  { %v1918_v3 = vadd.f32 %v1744_v59, %v1738_v9  ;;  %v1917_v49 = vadd.f32 %v1743_v6, %v1737_v50  ;;  %v790_v55 = vpop.f32.mrb[22].mxu0  ;;  %v1647_v29 = vadd.f32 %v1646_v48, %v1624_v33  ;;  %v2828_v50 = vld [vmem:[%s3785_s0 + $0x158] sm:$0xff]  ;;  %v1666_v27 = vadd.f32 %v1665_v45, %v3431_v43 }
 0x196   :  { %v1919_v5 = vadd.f32 %v1745_v28, %v1739_v11  ;;  %2036 = vst [vmem:[%s3787_s2 + $0x58] sm:$0xff] %v790_v55  ;;  %v1064_v12 = vpop.f32.mrb[22].mxu1  ;;  %v792_v17 = vpop.f32.mrb[23].mxu0  ;;  %v1612_v11 = vsub.f32 %v2827_v60, %v2828_v50  ;;  %vm1884_vm12 = vcmp.eq.f32.partialorder %v3473_v40, inf  ;;  %vm1891_vm13 = vcmp.eq.f32.partialorder %v3479_v61, inf  ;;  %v2831_v43 = vld [vmem:[%s3785_s0 + $0x58] sm:$0xff] }
 0x197   :  { %v1750_v20 = vmul.f32 %v1064_v12, %v1064_v12  ;;  %v1749_v16 = vmul.f32 %v792_v17, %v792_v17  ;;  %v1066_v53 = vpop.f32.mrb[23].mxu1  ;;  %v1603_v59 = vsub.f32 %v2829_v34, %v2830_v0  ;;  %v2832_v6 = vld [vmem:[%s3785_s0 + $0x118] sm:$0xff]  ;;  %v1626_v37 = vand.u32 2147483647, %v1602_v23  ;;  %v2833_v12 = vld [vmem:[%s3785_s0 + $0xb0] sm:$0xff] }
 0x198   :  { %v1751_v25 = vmul.f32 %v1066_v53, %v1066_v53  ;;  %v1604_v2 = vsub.f32 %v2831_v43, %v2832_v6  ;;  %vm1886_vm14 = vcmp.eq.f32.partialorder %v3473_v40, 0.0  ;;  %vm1893_vm15 = vcmp.eq.f32.partialorder %v3479_v61, 0.0  ;;  %v2834_v17 = vld [vmem:[%s3785_s0 + $0x170] sm:$0xff] }
 0x199   :  { %v3545_v9 = vadd.f32 %v1918_v3, %v1750_v20  ;;  %v3547_v32 = vadd.f32 %v1917_v49, %v1749_v16  ;;  %v2760_v8 = vpop.eup %2759  ;;  %v1648_v3 = vadd.f32 %v1647_v29, %v1625_v62  ;;  %v1613_v49 = vsub.f32 %v3213_v44, %v3312_v26  ;;  %v2835_v44 = vld [vmem:[%s3785_s0 + $0xb8] sm:$0xff] }
 0x19a   :  { %v3552_v39 = vadd.f32 %v1919_v5, %v1751_v25  ;;  %v2111_v47 = vpop.f32.mrb[24].mxu1  ;;  %v2762_v28 = vpop.eup %2761  ;;  %v1627_v57 = vand.u32 2147483647, %v1603_v59  ;;  %v1628_v63 = vand.u32 2147483647, %v1604_v2  ;;  %v1614_v41 = vsub.f32 %v3205_v21, %v3306_v19  ;;  %v2836_v26 = vld [vmem:[%s3785_s0 + $0x178] sm:$0xff] }
 0x19b   :  { %2765 = vrsqrt.f32 %v3545_v9  ;;  %v2112_v38 = vpop.f32.mrb[25].mxu1  ;;  %v2764_v55 = vpop.eup %2763  ;;  %v1649_v5 = vadd.f32 %v1648_v3, %v1626_v37  ;;  %v1615_v36 = vsub.f32 %v2833_v12, %v2834_v17  ;;  %v1616_v21 = vsub.f32 %v2835_v44, %v2836_v26 }
 0x19c   :  { %2767 = vrsqrt.f32 %v3547_v32  ;;  %v3579_v35 = vadd.f32 %v2112_v38, %v2111_v47  ;;  %v1636_v19 = vand.u32 2147483647, %v1612_v11  ;;  %v1637_v16 = vand.u32 2147483647, %v1613_v49 }
 0x19d   :  { %2769 = vrsqrt.f32 %v3552_v39  ;;  %v1667_v53 = vadd.f32 %v1666_v27, %v3461_v30  ;;  %v1876_v15 = vmul.f32 %v2762_v28, %v3475_v22  ;;  %v3605_v33 = vsel %vm1832_vm8, %v1833_v7, %v3530_v14 }
 0x19e   :  { %v2114_v58 = vpop.f32.mrb[26].mxu1  ;;  %v1650_v48 = vadd.f32 %v1649_v5, %v1627_v57  ;;  %v1638_v45 = vand.u32 2147483647, %v1614_v41  ;;  %v3613_v23 = vsel %vm1825_vm9, %v1826_v10, %v1824_v13  ;;  %v1883_v47 = vmul.f32 %v2760_v8, %v3473_v40 }
 0x19f   :  { %v2115_v20 = vpop.f32.mrb[27].mxu1  ;;  %v1668_v30 = vadd.f32 %v1667_v53, %v1636_v19  ;;  %v1878_v62 = vsel %vm1877_vm10, %v3475_v22, %v1876_v15  ;;  %v1890_v56 = vmul.f32 %v2764_v55, %v3479_v61  ;;  %v1639_v29 = vand.u32 2147483647, %v1615_v36 }
 0x1a0   :  { %v3607_v25 = vadd.f32 %v2115_v20, %v2114_v58  ;;  %v1651_v14 = vadd.f32 %v1650_v48, %v1628_v63  ;;  %v1640_v60 = vand.u32 2147483647, %v1616_v21  ;;  %v1881_v46 = vsel %vm1879_vm11, %v1880_v52, %v1878_v62 }
 0x1a1   :  { %v1669_v13 = vadd.f32 %v1668_v30, %v1637_v16  ;;  %v1885_v50 = vsel %vm1884_vm12, %v3473_v40, %v1883_v47  ;;  %v1892_v11 = vsel %vm1891_vm13, %v3479_v61, %v1890_v56  ;;  %v1971_v27 = vsub.f32 %v3489_v51, %v1881_v46 }
 0x1a2   :  { %v2117_v7 = vpop.f32.mrb[28].mxu1  ;;  %1652 = vadd.xlane.f32.xlu0 %v1651_v14  ;;  %v1888_v22 = vsel %vm1886_vm14, %v1887_v54, %v1885_v50  ;;  %v1895_v52 = vsel %vm1893_vm15, %v1894_v31, %v1892_v11  ;;  %vm1931_vm1 = vcmp.eq.f32.partialorder %v3547_v32, inf  ;;  %vm1933_vm2 = vcmp.eq.f32.partialorder %v3547_v32, 0.0 }
 0x1a3   :  { %v2118_v10 = vpop.f32.mrb[29].mxu1  ;;  %v1670_v34 = vadd.f32 %v1669_v13, %v1638_v45  ;;  %v1972_v0 = vsub.f32 %v3491_v4, %v1888_v22  ;;  %v1973_v51 = vsub.f32 %v3495_v18, %v1895_v52  ;;  %v1977_v59 = vand.u32 2147483647, %v1971_v27 }
 0x1a4   :  { %v3632_v8 = vadd.f32 %v2118_v10, %v2117_v7  ;;  %v1934_v40 = vand.u32 2147483648, %v3547_v32  ;;  %vm1938_vm3 = vcmp.eq.f32.partialorder %v3545_v9, inf  ;;  %vm1940_vm4 = vcmp.eq.f32.partialorder %v3545_v9, 0.0 }
 0x1a5   :  { %v2766_v38 = vpop.eup %2765  ;;  %v1671_v2 = vadd.f32 %v1670_v34, %v1639_v29  ;;  %v1978_v37 = vand.u32 2147483647, %v1972_v0  ;;  %v1979_v28 = vand.u32 2147483647, %v1973_v51  ;;  %v1941_v49 = vand.u32 2147483648, %v3545_v9 }
 0x1a6   :  { %v2768_v43 = vpop.eup %2767  ;;  %v2120_v6 = vpop.f32.mrb[30].mxu1  ;;  %v1937_v54 = vmul.f32 %v2766_v38, %v3545_v9  ;;  %v1838_v5 = vsel %vm1837_vm0, %v3422_v42, %v3534_v1  ;;  %vm1945_vm5 = vcmp.eq.f32.partialorder %v3552_v39, inf  ;;  %v1948_v26 = vand.u32 2147483648, %v3552_v39 }
 0x1a7   :  { %v2770_v61 = vpop.eup %2769  ;;  %v2121_v31 = vpop.f32.mrb[31].mxu1  ;;  %v1930_v4 = vmul.f32 %v2768_v43, %v3547_v32  ;;  %v1672_v55 = vadd.f32 %v1671_v2, %v1640_v60  ;;  %v1983_v57 = vadd.f32 %v1978_v37, %v1977_v59  ;;  %vm1839_vm6 = vcmp.eq.f32.partialorder %v3422_v42, 0.0 }
 0x1a8   :  { %v3650_v3 = vadd.f32 %v2121_v31, %v2120_v6  ;;  %v1939_v18 = vsel %vm1938_vm3, %v3545_v9, %v1937_v54  ;;  %v1944_v41 = vmul.f32 %v2770_v61, %v3552_v39  ;;  %vm1947_vm7 = vcmp.eq.f32.partialorder %v3552_v39, 0.0 }
 0x1a9   :  { %v1932_v63 = vsel %vm1931_vm1, %v3547_v32, %v1930_v4  ;;  %v1942_v17 = vsel %vm1940_vm4, %v1941_v49, %v1939_v18  ;;  %1673 = vadd.xlane.f32.xlu0 %v1672_v55  ;;  %v3666_v36 = vadd.f32 %v1983_v57, %v1979_v28  ;;  %v1841_v32 = vsel %vm1839_vm6, %v1840_v24, %v1838_v5 }
 0x1aa   :  { %v2123_v58 = vpop.f32.mrb[32].mxu1  ;;  %v1935_v12 = vsel %vm1933_vm2, %v1934_v40, %v1932_v63  ;;  %v1946_v44 = vsel %vm1945_vm5, %v3552_v39, %v1944_v41  ;;  %v1999_v1 = vsub.f32 %v3605_v33, %v1942_v17 }
 0x1ab   :  { %v2124_v9 = vpop.f32.mrb[33].mxu1  ;;  %v1998_v21 = vsub.f32 %v3613_v23, %v1935_v12  ;;  %v1949_v20 = vsel %vm1947_vm7, %v1948_v26, %v1946_v44 }
 0x1ac   :  { %v2125_v19 = vadd.f32 %v2124_v9, %v2123_v58  ;;  %v2000_v15 = vsub.f32 %v1841_v32, %v1949_v20  ;;  %v2005_v48 = vand.u32 2147483647, %v1999_v1 }
 0x1ad   :  { %v2004_v16 = vand.u32 2147483647, %v1998_v21 }
 0x1ae   :  { %v2126_v53 = vpop.f32.mrb[34].mxu1  ;;  %v2006_v62 = vand.u32 2147483647, %v2000_v15 }
 0x1af   :  { %v2127_v45 = vpop.f32.mrb[35].mxu1  ;;  %v2010_v47 = vadd.f32 %v2005_v48, %v2004_v16 }
 0x1b0   :  { %v2128_v30 = vadd.f32 %v2127_v45, %v2126_v53 }
 0x1b1   :  { %v3676_v56 = vadd.f32 %v2010_v47, %v2006_v62 }
 0x1b2   :  { %v2129_v23 = vpop.f32.mrb[36].mxu1 }
 0x1b3   :  { %v2130_v7 = vpop.f32.mrb[37].mxu1 }
 0x1b4   :  { %v2131_v14 = vadd.f32 %v2130_v7, %v2129_v23 }
 0x1b6   :  { %v2132_v39 = vpop.f32.mrb[38].mxu1 }
 0x1b7   :  { %v2133_v29 = vpop.f32.mrb[39].mxu1 }
 0x1b8   :  { %v2134_v33 = vadd.f32 %v2133_v29, %v2132_v39 }
 0x1ba   :  { %v2135_v60 = vpop.f32.mrb[40].mxu1 }
 0x1bb   :  { %v2136_v42 = vpop.f32.mrb[41].mxu1 }
 0x1bc   :  { %v3678_v24 = vadd.f32 %v2136_v42, %v2135_v60 }
 0x1be   :  { %v2138_v46 = vpop.f32.mrb[42].mxu1 }
 0x1bf   :  { %v2139_v10 = vpop.f32.mrb[43].mxu1 }
 0x1c0   :  { %v3680_v13 = vadd.f32 %v2139_v10, %v2138_v46 }
 0x1c2   :  { %v2141_v50 = vpop.f32.mrb[44].mxu1 }
 0x1c3   :  { %v2142_v11 = vpop.f32.mrb[45].mxu1 }
 0x1c4   :  { %v3682_v27 = vadd.f32 %v2142_v11, %v2141_v50 }
 0x1c6   :  { %v2144_v22 = vpop.f32.mrb[46].mxu1 }
 0x1c7   :  { %v2145_v52 = vpop.f32.mrb[47].mxu1 }
 0x1c8   :  { %v3684_v38 = vadd.f32 %v2145_v52, %v2144_v22 }
 0x1ca   :  { %v2179_v34 = vpop.f32.mrb[48].mxu1 }
 0x1cb   :  { %v2180_v0 = vpop.f32.mrb[49].mxu1 }
 0x1cc   :  { %v2181_v51 = vadd.f32 %v2180_v0, %v2179_v34 }
 0x1ce   :  { %v1535_v59 = vadd.f32 %v2181_v51, %v3579_v35  ;;  %v2182_v43 = vpop.f32.mrb[50].mxu1 }
 0x1cf   :  { %v2183_v6 = vpop.f32.mrb[51].mxu1 }
 0x1d0   :  { %v2184_v40 = vadd.f32 %v2183_v6, %v2182_v43  ;;  %v1688_v2 = vmul.f32 %v1535_v59, %v1535_v59 }
 0x1d2   :  { %v1540_v54 = vadd.f32 %v2184_v40, %v3607_v25  ;;  %v2185_v61 = vpop.f32.mrb[52].mxu1 }
 0x1d3   :  { %v2186_v31 = vpop.f32.mrb[53].mxu1 }
 0x1d4   :  { %v1694_v37 = vmul.f32 %v1540_v54, %v1540_v54  ;;  %v2187_v28 = vadd.f32 %v2186_v31, %v2185_v61 }
 0x1d6   :  { %v1760_v4 = vadd.f32 %v1694_v37, %v1688_v2  ;;  %v1545_v18 = vadd.f32 %v2187_v28, %v3632_v8  ;;  %v2188_v49 = vpop.f32.mrb[54].mxu1 }
 0x1d7   :  { %v2189_v55 = vpop.f32.mrb[55].mxu1 }
 0x1d8   :  { %v1700_v57 = vmul.f32 %v1545_v18, %v1545_v18  ;;  %v2190_v63 = vadd.f32 %v2189_v55, %v2188_v49 }
 0x1da   :  { %v3689_v41 = vadd.f32 %v1760_v4, %v1700_v57  ;;  %v1550_v35 = vadd.f32 %v2190_v63, %v3650_v3  ;;  %v2191_v58 = vpop.f32.mrb[56].mxu1 }
 0x1db   :  { %v2192_v5 = vpop.f32.mrb[57].mxu1 }
 0x1dc   :  { %v2193_v12 = vadd.f32 %v2192_v5, %v2191_v58  ;;  %v1706_v44 = vmul.f32 %v1550_v35, %v1550_v35  ;;  %2771 = vrsqrt.f32 %v3689_v41  ;;  %vm1804_vm8 = vcmp.eq.f32.partialorder %v3689_v41, inf }
 0x1dd   :  { %vm1806_vm10 = vcmp.eq.f32.partialorder %v3689_v41, 0.0 }
 0x1de   :  { %v1555_v25 = vadd.f32 %v2193_v12, %v2125_v19  ;;  %v2194_v17 = vpop.f32.mrb[58].mxu1 }
 0x1df   :  { %v2195_v9 = vpop.f32.mrb[59].mxu1 }
 0x1e0   :  { %v1712_v26 = vmul.f32 %v1555_v25, %v1555_v25  ;;  %v2196_v21 = vadd.f32 %v2195_v9, %v2194_v17 }
 0x1e2   :  { %v1814_v1 = vadd.f32 %v1712_v26, %v1706_v44  ;;  %v1560_v32 = vadd.f32 %v2196_v21, %v2128_v30  ;;  %v2197_v8 = vpop.f32.mrb[60].mxu1 }
 0x1e3   :  { %v2198_v20 = vpop.f32.mrb[61].mxu1 }
 0x1e4   :  { %v1718_v16 = vmul.f32 %v1560_v32, %v1560_v32  ;;  %v2199_v53 = vadd.f32 %v2198_v20, %v2197_v8 }
 0x1e6   :  { %v3692_v15 = vadd.f32 %v1814_v1, %v1718_v16  ;;  %v1565_v48 = vadd.f32 %v2199_v53, %v2131_v14  ;;  %v2200_v45 = vpop.f32.mrb[62].mxu1  ;;  %v2772_v35 = vpop.eup %2771 }
 0x1e7   :  { %v2201_v3 = vpop.f32.mrb[63].mxu1  ;;  %v1803_v8 = vmul.f32 %v2772_v35, %v3689_v41 }
 0x1e8   :  { %v2202_v62 = vadd.f32 %v2201_v3, %v2200_v45  ;;  %v1724_v29 = vmul.f32 %v1565_v48, %v1565_v48  ;;  %vm1858_vm12 = vcmp.eq.f32.partialorder %v3692_v15, inf  ;;  %vm1860_vm14 = vcmp.eq.f32.partialorder %v3692_v15, 0.0 }
 0x1e9   :  { %v1272_v47 = vpop.f32.mrb[24].mxu0 }
 0x1ea   :  { %v1570_v23 = vadd.f32 %v2202_v62, %v2134_v33  ;;  %v2203_v19 = vpop.f32.mrb[64].mxu1  ;;  %v1274_v7 = vpop.f32.mrb[25].mxu0  ;;  %v1686_v10 = vmul.f32 %v1272_v47, %v1272_v47 }
 0x1eb   :  { %v2204_v39 = vpop.f32.mrb[65].mxu1  ;;  %v1687_v52 = vmul.f32 %v1274_v7, %v1274_v7 }
 0x1ec   :  { %v1730_v60 = vmul.f32 %v1570_v23, %v1570_v23  ;;  %v2205_v42 = vadd.f32 %v2204_v39, %v2203_v19  ;;  %v1807_v23 = vand.u32 2147483648, %v3689_v41 }
 0x1ed   :  { %v1278_v46 = vpop.f32.mrb[26].mxu0 }
 0x1ee   :  { %v1868_v30 = vadd.f32 %v1730_v60, %v1724_v29  ;;  %v1575_v50 = vadd.f32 %v2205_v42, %v3678_v24  ;;  %v1692_v11 = vmul.f32 %v1278_v46, %v1278_v46  ;;  %v2206_v14 = vpop.f32.mrb[66].mxu1  ;;  %v1280_v22 = vpop.f32.mrb[27].mxu0 }
 0x1ef   :  { %v1693_v34 = vmul.f32 %v1280_v22, %v1280_v22  ;;  %v2207_v0 = vpop.f32.mrb[67].mxu1 }
 0x1f0   :  { %v1736_v33 = vmul.f32 %v1575_v50, %v1575_v50  ;;  %v1758_v51 = vadd.f32 %v1692_v11, %v1686_v10  ;;  %v2208_v59 = vadd.f32 %v2207_v0, %v2206_v14 }
 0x1f1   :  { %v1759_v43 = vadd.f32 %v1693_v34, %v1687_v52  ;;  %v1284_v6 = vpop.f32.mrb[28].mxu0 }
 0x1f2   :  { %v1874_v40 = vadd.f32 %v1868_v30, %v1736_v33  ;;  %v1580_v54 = vadd.f32 %v2208_v59, %v3680_v13  ;;  %v1698_v61 = vmul.f32 %v1284_v6, %v1284_v6  ;;  %v2209_v31 = vpop.f32.mrb[68].mxu1  ;;  %v1286_v2 = vpop.f32.mrb[29].mxu0 }
 0x1f3   :  { %v1699_v37 = vmul.f32 %v1286_v2, %v1286_v2  ;;  %v2210_v28 = vpop.f32.mrb[69].mxu1 }
 0x1f4   :  { %v3697_v24 = vadd.f32 %v1758_v51, %v1698_v61  ;;  %v2211_v4 = vadd.f32 %v2210_v28, %v2209_v31  ;;  %2773 = vrsqrt.f32 %v1874_v40  ;;  %v1742_v5 = vmul.f32 %v1580_v54, %v1580_v54 }
 0x1f5   :  { %v3699_v18 = vadd.f32 %v1759_v43, %v1699_v37  ;;  %v1290_v49 = vpop.f32.mrb[30].mxu0  ;;  %2775 = vrsqrt.f32 %v3692_v15  ;;  %vm1912_vm9 = vcmp.eq.f32.partialorder %v1874_v40, inf  ;;  %v1915_v39 = vand.u32 2147483648, %v1874_v40 }
 0x1f6   :  { %v1585_v55 = vadd.f32 %v2211_v4, %v3682_v27  ;;  %v2212_v57 = vpop.f32.mrb[70].mxu1  ;;  %v1292_v63 = vpop.f32.mrb[31].mxu0  ;;  %v1704_v9 = vmul.f32 %v1290_v49, %v1290_v49  ;;  %vm1914_vm11 = vcmp.eq.f32.partialorder %v1874_v40, 0.0  ;;  %vm1790_vm0 = vcmp.eq.f32.partialorder %v3697_v24, inf }
 0x1f7   :  { %v2213_v58 = vpop.f32.mrb[71].mxu1  ;;  %v1705_v1 = vmul.f32 %v1292_v63, %v1292_v63  ;;  %vm1792_vm1 = vcmp.eq.f32.partialorder %v3697_v24, 0.0  ;;  %vm1797_vm2 = vcmp.eq.f32.partialorder %v3699_v18, inf  ;;  %vm1799_vm3 = vcmp.eq.f32.partialorder %v3699_v18, 0.0 }
 0x1f8   :  { %v1748_v13 = vmul.f32 %v1585_v55, %v1585_v55  ;;  %v2214_v12 = vadd.f32 %v2213_v58, %v2212_v57  ;;  %v1861_v57 = vand.u32 2147483648, %v3692_v15 }
 0x1f9   :  { %v1296_v25 = vpop.f32.mrb[32].mxu0 }
 0x1fa   :  { %v1922_v17 = vadd.f32 %v1748_v13, %v1742_v5  ;;  %v1590_v44 = vadd.f32 %v2214_v12, %v3684_v38  ;;  %v1710_v26 = vmul.f32 %v1296_v25, %v1296_v25  ;;  %v1298_v21 = vpop.f32.mrb[33].mxu0  ;;  %v1805_v38 = vsel %vm1804_vm8, %v3689_v41, %v1803_v8 }
 0x1fb   :  { %v1711_v32 = vmul.f32 %v1298_v21, %v1298_v21  ;;  %v3713_v30 = vsel %vm1806_vm10, %v1807_v23, %v1805_v38 }
 0x1fc   :  { %v1754_v20 = vmul.f32 %v1590_v44, %v1590_v44  ;;  %v1812_v27 = vadd.f32 %v1710_v26, %v1704_v9 }
 0x1fd   :  { %v1813_v16 = vadd.f32 %v1711_v32, %v1705_v1  ;;  %v1302_v53 = vpop.f32.mrb[34].mxu0 }
 0x1fe   :  { %v2774_v48 = vpop.eup %2773  ;;  %v1928_v45 = vadd.f32 %v1922_v17, %v1754_v20  ;;  %v1716_v3 = vmul.f32 %v1302_v53, %v1302_v53  ;;  %v1304_v62 = vpop.f32.mrb[35].mxu0 }
 0x1ff   :  { %v1717_v47 = vmul.f32 %v1304_v62, %v1304_v62  ;;  %v1911_v19 = vmul.f32 %v2774_v48, %v1874_v40  ;;  %v2776_v34 = vpop.eup %2775  ;;  %v1793_v48 = vand.u32 2147483648, %v3697_v24 }
 0x200   :  { %v3708_v7 = vadd.f32 %v1812_v27, %v1716_v3  ;;  %2777 = vrsqrt.f32 %v1928_v45  ;;  %v1857_v54 = vmul.f32 %v2776_v34, %v3692_v15  ;;  %vm1966_vm13 = vcmp.eq.f32.partialorder %v1928_v45, inf }
 0x201   :  { %v3710_v29 = vadd.f32 %v1813_v16, %v1717_v47  ;;  %v1308_v60 = vpop.f32.mrb[36].mxu0  ;;  %v1913_v42 = vsel %vm1912_vm9, %v1874_v40, %v1911_v19  ;;  %2779 = vrsqrt.f32 %v3697_v24  ;;  %v1969_v63 = vand.u32 2147483648, %v1928_v45 }
 0x202   :  { %v1310_v46 = vpop.f32.mrb[37].mxu0  ;;  %v3715_v10 = vsel %vm1914_vm11, %v1915_v39, %v1913_v42  ;;  %v1722_v14 = vmul.f32 %v1308_v60, %v1308_v60  ;;  %2781 = vrsqrt.f32 %v3699_v18  ;;  %v1859_v49 = vsel %vm1858_vm12, %v3692_v15, %v1857_v54 }
 0x203   :  { %v1976_v50 = vsub.f32 %v3713_v30, %v3715_v10  ;;  %v1723_v0 = vmul.f32 %v1310_v46, %v1310_v46  ;;  %vm1968_vm15 = vcmp.eq.f32.partialorder %v1928_v45, 0.0  ;;  %v3729_v5 = vsel %vm1860_vm14, %v1861_v57, %v1859_v49 }
 0x204   :  { %v1800_v47 = vand.u32 2147483648, %v3699_v18  ;;  %vm1844_vm8 = vcmp.eq.f32.partialorder %v3708_v7, inf  ;;  %vm1846_vm9 = vcmp.eq.f32.partialorder %v3708_v7, 0.0  ;;  %vm1851_vm10 = vcmp.eq.f32.partialorder %v3710_v29, inf }
 0x205   :  { %v1314_v11 = vpop.f32.mrb[38].mxu0  ;;  %vm1853_vm11 = vcmp.eq.f32.partialorder %v3710_v29, 0.0 }
 0x206   :  { %v1728_v22 = vmul.f32 %v1314_v11, %v1314_v11  ;;  %v1316_v52 = vpop.f32.mrb[39].mxu0 }
 0x207   :  { %v1729_v33 = vmul.f32 %v1316_v52, %v1316_v52 }
 0x208   :  { %v1866_v41 = vadd.f32 %v1728_v22, %v1722_v14 }
 0x209   :  { %v1867_v51 = vadd.f32 %v1729_v33, %v1723_v0  ;;  %v1320_v59 = vpop.f32.mrb[40].mxu0 }
 0x20a   :  { %v2778_v43 = vpop.eup %2777  ;;  %v1734_v6 = vmul.f32 %v1320_v59, %v1320_v59  ;;  %v1322_v40 = vpop.f32.mrb[41].mxu0 }
 0x20b   :  { %v1735_v61 = vmul.f32 %v1322_v40, %v1322_v40  ;;  %v1965_v31 = vmul.f32 %v2778_v43, %v1928_v45  ;;  %v2780_v35 = vpop.eup %2779 }
 0x20c   :  { %v1872_v2 = vadd.f32 %v1866_v41, %v1734_v6  ;;  %v2782_v12 = vpop.eup %2781  ;;  %v1789_v15 = vmul.f32 %v2780_v35, %v3697_v24 }
 0x20d   :  { %v3722_v37 = vadd.f32 %v1867_v51, %v1735_v61  ;;  %v1326_v28 = vpop.f32.mrb[42].mxu0  ;;  %v1967_v55 = vsel %vm1966_vm13, %v1928_v45, %v1965_v31  ;;  %v1796_v20 = vmul.f32 %v2782_v12, %v3699_v18  ;;  %v1982_v61 = vand.u32 2147483647, %v1976_v50 }
 0x20e   :  { %2783 = vrsqrt.f32 %v1872_v2  ;;  %v1328_v4 = vpop.f32.mrb[43].mxu0  ;;  %v3731_v13 = vsel %vm1968_vm15, %v1969_v63, %v1967_v55  ;;  %v1740_v25 = vmul.f32 %v1326_v28, %v1326_v28  ;;  %v1791_v62 = vsel %vm1790_vm0, %v3697_v24, %v1789_v15 }
 0x20f   :  { %2785 = vrsqrt.f32 %v3722_v37  ;;  %v2003_v44 = vsub.f32 %v3729_v5, %v3731_v13  ;;  %v1741_v26 = vmul.f32 %v1328_v4, %v1328_v4  ;;  %v1798_v19 = vsel %vm1797_vm2, %v3699_v18, %v1796_v20 }
 0x210   :  { %2787 = vrsqrt.f32 %v3708_v7  ;;  %vm1898_vm4 = vcmp.eq.f32.partialorder %v1872_v2, inf  ;;  %vm1900_vm5 = vcmp.eq.f32.partialorder %v1872_v2, 0.0  ;;  %v1901_v60 = vand.u32 2147483648, %v1872_v2 }
 0x211   :  { %v1332_v58 = vpop.f32.mrb[44].mxu0  ;;  %2789 = vrsqrt.f32 %v3710_v29  ;;  %vm1905_vm6 = vcmp.eq.f32.partialorder %v3722_v37, inf  ;;  %v1908_v11 = vand.u32 2147483648, %v3722_v37  ;;  %v1794_v14 = vsel %vm1792_vm1, %v1793_v48, %v1791_v62 }
 0x212   :  { %v1746_v17 = vmul.f32 %v1332_v58, %v1332_v58  ;;  %v1334_v9 = vpop.f32.mrb[45].mxu0  ;;  %vm1907_vm7 = vcmp.eq.f32.partialorder %v3722_v37, 0.0  ;;  %v1801_v34 = vsel %vm1799_vm3, %v1800_v47, %v1798_v19  ;;  %v1854_v4 = vand.u32 2147483648, %v3710_v29 }
 0x213   :  { %v1747_v21 = vmul.f32 %v1334_v9, %v1334_v9  ;;  %v2009_v15 = vand.u32 2147483647, %v2003_v44 }
 0x214   :  { %v1920_v1 = vadd.f32 %v1746_v17, %v1740_v25 }
 0x215   :  { %v1921_v32 = vadd.f32 %v1747_v21, %v1741_v26  ;;  %v1338_v8 = vpop.f32.mrb[46].mxu0 }
 0x216   :  { %v1752_v27 = vmul.f32 %v1338_v8, %v1338_v8  ;;  %v1340_v16 = vpop.f32.mrb[47].mxu0 }
 0x217   :  { %v1753_v53 = vmul.f32 %v1340_v16, %v1340_v16 }
 0x218   :  { %v2784_v45 = vpop.eup %2783  ;;  %v1926_v3 = vadd.f32 %v1920_v1, %v1752_v27 }
 0x219   :  { %v2786_v38 = vpop.eup %2785  ;;  %v1927_v23 = vadd.f32 %v1921_v32, %v1753_v53  ;;  %v1897_v39 = vmul.f32 %v2784_v45, %v1872_v2 }
 0x21a   :  { %2791 = vrsqrt.f32 %v1926_v3  ;;  %v1904_v42 = vmul.f32 %v2786_v38, %v3722_v37  ;;  %v2788_v41 = vpop.eup %2787  ;;  %vm1952_vm12 = vcmp.eq.f32.partialorder %v1926_v3, inf  ;;  %v1955_v50 = vand.u32 2147483648, %v1926_v3 }
 0x21b   :  { %2793 = vrsqrt.f32 %v1927_v23  ;;  %v1899_v46 = vsel %vm1898_vm4, %v1872_v2, %v1897_v39  ;;  %v2790_v59 = vpop.eup %2789  ;;  %v1843_v24 = vmul.f32 %v2788_v41, %v3708_v7  ;;  %v1847_v2 = vand.u32 2147483648, %v3708_v7 }
 0x21c   :  { %v1902_v22 = vsel %vm1900_vm5, %v1901_v60, %v1899_v46  ;;  %v1906_v52 = vsel %vm1905_vm6, %v3722_v37, %v1904_v42  ;;  %v1850_v54 = vmul.f32 %v2790_v59, %v3710_v29  ;;  %vm1954_vm13 = vcmp.eq.f32.partialorder %v1926_v3, 0.0 }
 0x21d   :  { %v1909_v0 = vsel %vm1907_vm7, %v1908_v11, %v1906_v52  ;;  %v1974_v33 = vsub.f32 %v1794_v14, %v1902_v22  ;;  %v1845_v28 = vsel %vm1844_vm8, %v3708_v7, %v1843_v24  ;;  %vm1959_vm14 = vcmp.eq.f32.partialorder %v1927_v23, inf }
 0x21e   :  { %v1975_v51 = vsub.f32 %v1801_v34, %v1909_v0  ;;  %v1852_v10 = vsel %vm1851_vm10, %v3710_v29, %v1850_v54  ;;  %v1962_v57 = vand.u32 2147483648, %v1927_v23  ;;  %v1848_v63 = vsel %vm1846_vm9, %v1847_v2, %v1845_v28 }
 0x21f   :  { %v1980_v43 = vand.u32 2147483647, %v1974_v33  ;;  %vm1961_vm15 = vcmp.eq.f32.partialorder %v1927_v23, 0.0  ;;  %v1855_v12 = vsel %vm1853_vm11, %v1854_v4, %v1852_v10  ;;  %v2037_v33 = vlaneseq }
 0x220   :  { %v1981_v6 = vand.u32 2147483647, %v1975_v51  ;;  %v2864_v24 = vmov 0.0  }
 0x221   :  { %v1985_v40 = vadd.f32 %v3666_v36, %v1980_v43  ;;  %v2038_v41 = vshrl.u32 %v2037_v33, 7  ;;  %v2040_v51 = vand.u32 127, %v2037_v33 }
 0x223   :  { %v1986_v31 = vadd.f32 %v1985_v40, %v1981_v6  ;;  %vm2042_vm0 = vcmp.eq.s32.totalorder %v2038_v41, 0  ;;  %vm2043_vm1 = vcmp.eq.s32.totalorder %v2040_v51, 0  ;;  %vm2049_vm2 = vcmp.eq.s32.totalorder %v2040_v51, 1 }
 0x224   :  { %v2792_v18 = vpop.eup %2791  ;;  %vm2044_vm3 = vmand %vm2042_vm0, %vm2043_vm1  ;;  %vm2056_vm5 = vcmp.eq.s32.totalorder %v2040_v51, 2  ;;  %vm2063_vm7 = vcmp.eq.s32.totalorder %v2040_v51, 3 }
 0x225   :  { %v2794_v36 = vpop.eup %2793  ;;  %v1987_v37 = vadd.f32 %v1986_v31, %v1982_v61  ;;  %v1951_v30 = vmul.f32 %v2792_v18, %v1926_v3  ;;  %vm2050_vm4 = vmand %vm2042_vm0, %vm2049_vm2  ;;  %v2075_v54 = vsel %vm2044_vm3, 1.0, %v2864_v24 }
 0x226   :  { %v1958_v49 = vmul.f32 %v2794_v36, %v1927_v23  ;;  %v2076_v61 = vsel %vm2050_vm4, 1.0, %v2864_v24  ;;  %vm2057_vm6 = vmand %vm2042_vm0, %vm2056_vm5 }
 0x227   :  { %1988 = vadd.xlane.f32.xlu1 %v1987_v37  ;;  %v1953_v55 = vsel %vm1952_vm12, %v1926_v3, %v1951_v30  ;;  %v2077_v37 = vsel %vm2057_vm6, 1.0, %v2864_v24  ;;  %vm2064_vm8 = vmand %vm2042_vm0, %vm2063_vm7 }
 0x228   :  { %v1956_v35 = vsel %vm1954_vm13, %v1955_v50, %v1953_v55  ;;  %v1960_v58 = vsel %vm1959_vm14, %v1927_v23, %v1958_v49  ;;  %v2078_v10 = vsel %vm2064_vm8, 1.0, %v2864_v24 }
 0x229   :  { %v1963_v25 = vsel %vm1961_vm15, %v1962_v57, %v1960_v58  ;;  %v2001_v17 = vsub.f32 %v1848_v63, %v1956_v35 }
 0x22a   :  { %v2002_v9 = vsub.f32 %v1855_v12, %v1963_v25 }
 0x22b   :  { %v2007_v26 = vand.u32 2147483647, %v2001_v17 }
 0x22c   :  { %v2008_v21 = vand.u32 2147483647, %v2002_v9 }
 0x22d   :  { %v2012_v1 = vadd.f32 %v3676_v56, %v2007_v26 }
 0x22f   :  { %v2013_v32 = vadd.f32 %v2012_v1, %v2008_v21  ;;  %v1653_v8 = vpop.xlane.xlu0 %1652 }
 0x230   :  { %v1654_v20 = vrot.slane %v1653_v8, 4 }
 0x231   :  { %v2014_v7 = vadd.f32 %v2013_v32, %v2009_v15 }
 0x232   :  { %v1655_v27 = vadd.f32 %v1654_v20, %v1653_v8 }
 0x233   :  { %2015 = vadd.xlane.f32.xlu1 %v2014_v7 }
 0x234   :  { %v1656_v16 = vrot.slane %v1655_v27, 2 }
 0x236   :  { %v1674_v29 = vpop.xlane.xlu0 %1673  ;;  %v1657_v48 = vadd.f32 %v1656_v16, %v1655_v27 }
 0x237   :  { %v1675_v53 = vrot.slane %v1674_v29, 4 }
 0x238   :  { %v1658_v3 = vrot.slane %v1657_v48, 1 }
 0x239   :  { %v1676_v45 = vadd.f32 %v1675_v53, %v1674_v29 }
 0x23a   :  { %v1659_v47 = vadd.f32 %v1658_v3, %v1657_v48 }
 0x23b   :  { %v1677_v62 = vrot.slane %v1676_v45, 2 }
 0x23c   :  { %2735 = vpush %v1659_v47 }
 0x23d   :  { %v1678_v38 = vadd.f32 %v1677_v62, %v1676_v45 }
 0x23f   :  { %v1679_v56 = vrot.slane %v1678_v38, 1 }
 0x241   :  { %v1680_v23 = vadd.f32 %v1679_v56, %v1678_v38 }
 0x243   :  { %2737 = vpush %v1680_v23 }
 0x26d   :  { %s2736_s0 = spop %2735 }
 0x26e   :  { %v1661_v59 = vstv %s2736_s0 }
 0x26f   :  { %v2041_v6 = vmul.f32 64.0, %v1661_v59 }
 0x271   :  { %v2047_v18 = vmul.f32 %v2075_v54, %v2041_v6 }
 0x274   :  { %s2738_s23 = spop %2737 }
 0x275   :  { %v1682_v43 = vstv %s2738_s23 }
 0x276   :  { %v2048_v40 = vmul.f32 64.0, %v1682_v43 }
 0x278   :  { %v2053_v2 = vmul.f32 %v2076_v61, %v2048_v40 }
 0x27a   :  { %v2054_v28 = vadd.f32 %v2053_v2, %v2047_v18 }
 0x2b4   :  { %v1989_v5 = vpop.xlane.xlu1 %1988 }
 0x2b5   :  { %v1990_v13 = vrot.slane %v1989_v5, 4 }
 0x2b7   :  { %v1991_v44 = vadd.f32 %v1990_v13, %v1989_v5 }
 0x2b9   :  { %v1992_v19 = vrot.slane %v1991_v44, 2 }
 0x2bb   :  { %v1993_v39 = vadd.f32 %v1992_v19, %v1991_v44 }
 0x2bd   :  { %v1994_v60 = vrot.slane %v1993_v39, 1 }
 0x2bf   :  { %v1995_v42 = vadd.f32 %v1994_v60, %v1993_v39 }
 0x2c0   :  { %v2016_v46 = vpop.xlane.xlu1 %2015 }
 0x2c1   :  { %v2017_v11 = vrot.slane %v2016_v46, 4  ;;  %2739 = vpush %v1995_v42 }
 0x2c3   :  { %v2018_v14 = vadd.f32 %v2017_v11, %v2016_v46 }
 0x2c5   :  { %v2019_v22 = vrot.slane %v2018_v14, 2 }
 0x2c7   :  { %v2020_v52 = vadd.f32 %v2019_v22, %v2018_v14 }
 0x2c9   :  { %v2021_v34 = vrot.slane %v2020_v52, 1 }
 0x2cb   :  { %v2022_v0 = vadd.f32 %v2021_v34, %v2020_v52 }
 0x2cd   :  { %2741 = vpush %v2022_v0 }
 0x2f2   :  { %s2740_s24 = spop %2739 }
 0x2f3   :  { %v1997_v31 = vstv %s2740_s24 }
 0x2f4   :  { %v2055_v36 = vmul.f32 64.0, %v1997_v31 }
 0x2f6   :  { %v2060_v4 = vmul.f32 %v2077_v37, %v2055_v36 }
 0x2f8   :  { %v2061_v49 = vadd.f32 %v2060_v4, %v2054_v28 }
 0x2fe   :  { %s2742_s25 = spop %2741 }
 0x2ff   :  { %v2024_v30 = vstv %s2742_s25 }
 0x300   :  { %v2062_v50 = vmul.f32 64.0, %v2024_v30 }
 0x302   :  { %v2067_v55 = vmul.f32 %v2078_v10, %v2062_v50 }
 0x304   :  { %v2068_v57 = vadd.f32 %v2067_v55, %v2061_v49 }
 0x306   :  { %2069 = vst [vmem:[%s3787_s2 + $0x60] sm:$0xff] %v2068_v57 }
 0x307   :  { %2074 = vsyncpa [#allocation3], 1 }

</bundles_post_ra>
